<compile_context>
chip_gen: v7x
topology: tpu7x:2x2x1
jax: 0.10.0
libtpu: 0.0.40
codegen_flags: <defaults>
</compile_context>

<pallas_src>
import jax
import jax.numpy as jnp
import numpy as np
from jax.experimental import pallas as pl
from jax.experimental.pallas import tpu as pltpu


MATMUL_DTYPE = jnp.bfloat16        # MXU-native; halves HBM activation bytes
ROW_TILE_CAP = 2048                # max matmul-M rows per grid step
VMEM_LIMIT = 32 * 1024 * 1024      # explicit scoped-VMEM budget (v5e..v7x safe)


# ----------------------------- Pallas kernel -------------------------------

def _make_tap_matmul_kernel(taps):
    """out = PReLU(sum_t shift_t(x) @ w[t] + b), all taps on the MXU.

    x_ref     : (1, Hin, Win, Kc)  full (padded) image of one batch element,
                resident in VMEM across the row-tile grid axis.
    w_ref     : (n_taps, Kc, C)    per-tap (fused) weights, bf16.
    b_ref     : (1, C)             f32 bias.
    alpha_ref : (1, 1)             f32 PReLU slope, in SMEM.
    o_ref     : (1, TH, Wo, C)     output row tile.
    """
    def kernel(x_ref, w_ref, b_ref, alpha_ref, o_ref):
        _, TH, Wo, C = o_ref.shape
        Kc = x_ref.shape[3]
        r0 = pl.program_id(1) * TH                       # first output row of tile
        acc = jnp.zeros((TH * Wo, C), jnp.float32)
        for t, (dh, dw) in enumerate(taps):              # static unroll
            xs = x_ref[:, pl.ds(r0 + dh, TH), pl.ds(dw, Wo), :]   # (1,TH,Wo,Kc)
            acc = acc + jnp.dot(xs.reshape(TH * Wo, Kc), w_ref[t],
                                preferred_element_type=jnp.float32)
        y = acc + b_ref[...].astype(jnp.float32)
        a = alpha_ref[0, 0]                              # scalar from SMEM
        y = jnp.where(y >= 0.0, y, a * y)                # PReLU in f32
        o_ref[...] = y.reshape(1, TH, Wo, C).astype(o_ref.dtype)
    return kernel


# ------------------------------- wrappers -----------------------------------

def _pick_row_tile(n_rows, row_width, cap=ROW_TILE_CAP):
    """Largest divisor TH of n_rows with TH*row_width matmul rows <= cap."""
    th = 1
    for cand in range(1, n_rows + 1):
        if n_rows % cand == 0 and cand * row_width <= cap:
            th = cand
    return th


def _tap_conv_call(x_full, taps, w, b, alpha, out_hw, out_dtype):
    """x_full laid out so every tap is a unit-stride (dh, dw) shift."""
    N, Hin, Win, Kc = x_full.shape
    Ho, Wo = out_hw
    C = w.shape[-1]
    TH = _pick_row_tile(Ho, Wo)

    flops = 2 * N * Ho * Wo * len(taps) * Kc * C
    bytes_accessed = (int(x_full.size) * x_full.dtype.itemsize
                      + int(w.size) * w.dtype.itemsize
                      + N * Ho * Wo * C * jnp.dtype(out_dtype).itemsize)

    return pl.pallas_call(
        _make_tap_matmul_kernel(taps),
        out_shape=jax.ShapeDtypeStruct((N, Ho, Wo, C), out_dtype),
        grid=(N, Ho // TH),
        in_specs=[
            # full image: same block across the row-tile axis -> fetched once/batch
            pl.BlockSpec((1, Hin, Win, Kc), lambda bidx, i: (bidx, 0, 0, 0)),
            pl.BlockSpec(w.shape, lambda bidx, i: (0, 0, 0)),
            pl.BlockSpec((1, C), lambda bidx, i: (0, 0)),
            pl.BlockSpec(memory_space=pltpu.MemorySpace.SMEM),   # PReLU alpha
        ],
        out_specs=pl.BlockSpec((1, TH, Wo, C), lambda bidx, i: (bidx, i, 0, 0)),
        compiler_params=pltpu.CompilerParams(
            dimension_semantics=("parallel", "arbitrary"),
            vmem_limit_bytes=VMEM_LIMIT),
        cost_estimate=pl.CostEstimate(flops=flops, transcendentals=0,
                                      bytes_accessed=bytes_accessed),
    )(x_full, w, b, alpha)


def down_block(x, p, out_dtype=None):
    """Depthwise 4x4 s2 p1 + pointwise 1x1 + PReLU, fused into one 2x2 conv
    over a space-to-depth(2) input (all work on the MXU).  NHWC -> NHWC/2."""
    N, H, W, C = x.shape
    assert H % 2 == 0 and W % 2 == 0, "stride-2 block needs even spatial dims"
    Ho, Wo = H // 2, W // 2
    Hs, Ws = Ho + 1, Wo + 1
    out_dtype = out_dtype or x.dtype

    # pad=1 then space-to-depth(2):
    #   xs[n, r, s, (dh*2+dw)*C + c] = x_padded[n, 2r+dh, 2s+dw, c]
    xp = jnp.pad(x, ((0, 0), (1, 1), (1, 1), (0, 0)))
    xs = xp.reshape(N, Hs, 2, Ws, 2, C).transpose(0, 1, 3, 2, 4, 5)
    xs = xs.reshape(N, Hs, Ws, 4 * C).astype(MATMUL_DTYPE)

    # fold depthwise into pointwise:
    #   wf[sh*2+sw, (dh*2+dw)*C + c, d] = dw_w[2sh+dh, 2sw+dw, c] * pw_w[c, d]
    dwr = p['dw_w'].astype(jnp.float32).reshape(2, 2, 2, 2, C)  # (sh,dh,sw,dw,c)
    pw = p['pw_w'].astype(jnp.float32)
    wf = jnp.einsum('abtuc,ce->atbuce', dwr, pw).reshape(4, 4 * C, C)
    wf = wf.astype(MATMUL_DTYPE)
    bf = (p['dw_b'].astype(jnp.float32) @ pw
          + p['pw_b'].astype(jnp.float32)).reshape(1, C)

    taps = [(sh, sw) for sh in range(2) for sw in range(2)]
    return _tap_conv_call(xs, taps, wf, bf, p['alpha'].astype(jnp.float32),
                          (Ho, Wo), out_dtype)


def conv_block(x, p, out_dtype=None):
    """3x3 s1 p1 conv + PReLU: 9 shifted MXU matmuls on the resident image."""
    N, H, W, C = x.shape
    out_dtype = out_dtype or x.dtype
    xp = jnp.pad(x, ((0, 0), (1, 1), (1, 1), (0, 0))).astype(MATMUL_DTYPE)
    w = p['w'].astype(MATMUL_DTYPE).reshape(9, C, C)       # tap = kh*3 + kw
    b = p['b'].astype(jnp.float32).reshape(1, C)
    taps = [(kh, kw) for kh in range(3) for kw in range(3)]
    return _tap_conv_call(xp, taps, w, b, p['alpha'].astype(jnp.float32),
                          (H, W), out_dtype)


def ds_forward(x_nchw, params):
    """DS.forward: down1 -> conv1 -> down2 -> conv2.  Input/output NCHW."""
    x = jnp.transpose(x_nchw, (0, 2, 3, 1)).astype(MATMUL_DTYPE)   # NCHW -> NHWC
    x = down_block(x, params['down1'])
    x = conv_block(x, params['conv1'])
    x = down_block(x, params['down2'])
    x = conv_block(x, params['conv2'])
    return jnp.transpose(x, (0, 3, 1, 2)).astype(jnp.float32)      # NHWC -> NCHW


# --------------------------- parameters & reference -------------------------

def init_params(key, C):
    def nrm(k, shape, scale):
        return scale * jax.random.normal(k, shape, jnp.float32)

    def down_params(k):
        k1, k2, k3, k4 = jax.random.split(k, 4)
        return {
            'dw_w': nrm(k1, (4, 4, C), 0.1),      # depthwise (kh, kw, c)
            'dw_b': nrm(k2, (C,), 0.01),
            'pw_w': nrm(k3, (C, C), 0.1),         # pointwise (cin, cout)
            'pw_b': nrm(k4, (C,), 0.01),
            'alpha': jnp.full((1, 1), 0.25, jnp.float32),   # PReLU init
        }

    def conv_params(k, alpha):
        k1, k2 = jax.random.split(k, 2)
        return {
            'w': nrm(k1, (3, 3, C, C), 0.1),      # (kh, kw, cin, cout)
            'b': nrm(k2, (C,), 0.01),
            'alpha': alpha,                       # shared `act` in torch
        }

    ks = jax.random.split(key, 4)
    shared_alpha = jnp.full((1, 1), 0.25, jnp.float32)
    return {
        'down1': down_params(ks[0]),
        'conv1': conv_params(ks[1], shared_alpha),
        'down2': down_params(ks[2]),
        'conv2': conv_params(ks[3], shared_alpha),
    }


def ref_forward(x_nchw, params):
    """Pure-JAX f32 reference (lax.conv_general_dilated) for validation."""
    def prelu(y, a):
        return jnp.where(y >= 0.0, y, a * y)

    def down_ref(x, p):
        C = x.shape[-1]
        dw = p['dw_w'].reshape(4, 4, 1, C)
        y = jax.lax.conv_general_dilated(
            x, dw, (2, 2), ((1, 1), (1, 1)),
            dimension_numbers=('NHWC', 'HWIO', 'NHWC'), feature_group_count=C)
        y = y + p['dw_b'].reshape(1, 1, 1, C)
        y = jnp.einsum('nhwc,cd->nhwd', y, p['pw_w']) + p['pw_b'].reshape(1, 1, 1, C)
        return prelu(y, p['alpha'][0, 0])

    def conv_ref(x, p):
        C = x.shape[-1]
        y = jax.lax.conv_general_dilated(
            x, p['w'], (1, 1), ((1, 1), (1, 1)),
            dimension_numbers=('NHWC', 'HWIO', 'NHWC'))
        y = y + p['b'].reshape(1, 1, 1, C)
        return prelu(y, p['alpha'][0, 0])

    x = jnp.transpose(x_nchw, (0, 2, 3, 1))
    x = down_ref(x, params['down1'])
    x = conv_ref(x, params['conv1'])
    x = down_ref(x, params['down2'])
    x = conv_ref(x, params['conv2'])
    return jnp.transpose(x, (0, 3, 1, 2))


# ---------------------------------- main ------------------------------------

if __name__ == "__main__":
    key = jax.random.PRNGKey(0)
    k_param, k_x = jax.random.split(key)

    n_feats = 8               # small stand-in for the default 56
    N, H, W = 2, 16, 16       # NCHW input, spatial divisible by 4 (two stride-2 downs)

    params = init_params(k_param, n_feats)
    x = jax.random.normal(k_x, (N, n_feats, H, W), jnp.float32)

    y = jax.jit(ds_forward)(x, params)
    y = jax.block_until_ready(y)

    assert y.shape == (N, n_feats, H // 4, W // 4), y.shape

    y_ref = ref_forward(x, params)
    # bf16 MXU operands vs. f32 reference -> slightly relaxed tolerance
    np.testing.assert_allclose(np.asarray(y), np.asarray(y_ref),
                               rtol=3e-2, atol=3e-2)

    print("KERNEL_OK")
</pallas_src>

<mosaic_0001>
module attributes {stable_mosaic.version = 11 : i64} {
  func.func @kernel(%arg0: i32, %arg1: i32, %arg2: memref<1x9x9x32xbf16, #tpu.memory_space<vmem>>, %arg3: memref<4x32x8xbf16, #tpu.memory_space<vmem>>, %arg4: memref<1x8xf32, #tpu.memory_space<vmem>>, %arg5: memref<1x1xf32, #tpu.memory_space<smem>>, %arg6: memref<1x8x8x8xbf16, #tpu.memory_space<vmem>>) attributes {dimension_semantics = [#tpu.dimension_semantics<parallel>, #tpu.dimension_semantics<arbitrary>], iteration_bounds = array<i64: 2, 1>, scalar_prefetch = 0 : i64, scratch_operands = 0 : i64, tpu.core_type = #tpu.core_type<tc>, window_params = [{transform_indices = @transform_0, window_bounds = array<i64: 1, 9, 9, 32>}, {pipeline_mode = #tpu.pipeline_mode<synchronous>, transform_indices = @transform_1, window_bounds = array<i64: 4, 32, 8>}, {pipeline_mode = #tpu.pipeline_mode<synchronous>, transform_indices = @transform_2, window_bounds = array<i64: 1, 8>}, {transform_indices = @transform_3, window_bounds = array<i64: 1, 1>}, {transform_indices = @transform_4, window_bounds = array<i64: 1, 8, 8, 8>}]} {
    %c8_i32 = arith.constant 8 : i32
    %0 = arith.muli %arg1, %c8_i32 : i32
    %cst = arith.constant 0.000000e+00 : f32
    %1 = vector.broadcast %cst : f32 to vector<64x8xf32>
    %c0_i32 = arith.constant 0 : i32
    %2 = arith.addi %0, %c0_i32 : i32
    %c0 = arith.constant 0 : index
    %3 = arith.index_cast %2 : i32 to index
    %c0_0 = arith.constant 0 : index
    %c0_1 = arith.constant 0 : index
    %4 = vector.load %arg2[%c0, %3, %c0_0, %c0_1] : memref<1x9x9x32xbf16, #tpu.memory_space<vmem>>, vector<1x8x8x32xbf16>
    %5 = vector.shape_cast %4 : vector<1x8x8x32xbf16> to vector<64x32xbf16>
    %c0_2 = arith.constant 0 : index
    %c0_3 = arith.constant 0 : index
    %c0_4 = arith.constant 0 : index
    %6 = vector.load %arg3[%c0_2, %c0_3, %c0_4] : memref<4x32x8xbf16, #tpu.memory_space<vmem>>, vector<1x32x8xbf16>
    %7 = vector.shape_cast %6 : vector<1x32x8xbf16> to vector<32x8xbf16>
    %cst_5 = arith.constant dense<0.000000e+00> : vector<64x8xf32>
    %8 = tpu.matmul %5, %7, %cst_5 {dimension_numbers = #tpu.dot_dimension_numbers<[1], [0], [0], [1], [0, 0, 1, 1], [], []>} : vector<64x32xbf16>, vector<32x8xbf16>, vector<64x8xf32> -> vector<64x8xf32>
    %9 = arith.addf %1, %8 : vector<64x8xf32>
    %c0_i32_6 = arith.constant 0 : i32
    %10 = arith.addi %0, %c0_i32_6 : i32
    %c0_7 = arith.constant 0 : index
    %11 = arith.index_cast %10 : i32 to index
    %c1 = arith.constant 1 : index
    %c0_8 = arith.constant 0 : index
    %12 = vector.load %arg2[%c0_7, %11, %c1, %c0_8] : memref<1x9x9x32xbf16, #tpu.memory_space<vmem>>, vector<1x8x8x32xbf16>
    %13 = vector.shape_cast %12 : vector<1x8x8x32xbf16> to vector<64x32xbf16>
    %c1_9 = arith.constant 1 : index
    %c0_10 = arith.constant 0 : index
    %c0_11 = arith.constant 0 : index
    %14 = vector.load %arg3[%c1_9, %c0_10, %c0_11] : memref<4x32x8xbf16, #tpu.memory_space<vmem>>, vector<1x32x8xbf16>
    %15 = vector.shape_cast %14 : vector<1x32x8xbf16> to vector<32x8xbf16>
    %cst_12 = arith.constant dense<0.000000e+00> : vector<64x8xf32>
    %16 = tpu.matmul %13, %15, %cst_12 {dimension_numbers = #tpu.dot_dimension_numbers<[1], [0], [0], [1], [0, 0, 1, 1], [], []>} : vector<64x32xbf16>, vector<32x8xbf16>, vector<64x8xf32> -> vector<64x8xf32>
    %17 = arith.addf %9, %16 : vector<64x8xf32>
    %c1_i32 = arith.constant 1 : i32
    %18 = arith.addi %0, %c1_i32 : i32
    %c0_13 = arith.constant 0 : index
    %19 = arith.index_cast %18 : i32 to index
    %c0_14 = arith.constant 0 : index
    %c0_15 = arith.constant 0 : index
    %20 = vector.load %arg2[%c0_13, %19, %c0_14, %c0_15] : memref<1x9x9x32xbf16, #tpu.memory_space<vmem>>, vector<1x8x8x32xbf16>
    %21 = vector.shape_cast %20 : vector<1x8x8x32xbf16> to vector<64x32xbf16>
    %c2 = arith.constant 2 : index
    %c0_16 = arith.constant 0 : index
    %c0_17 = arith.constant 0 : index
    %22 = vector.load %arg3[%c2, %c0_16, %c0_17] : memref<4x32x8xbf16, #tpu.memory_space<vmem>>, vector<1x32x8xbf16>
    %23 = vector.shape_cast %22 : vector<1x32x8xbf16> to vector<32x8xbf16>
    %cst_18 = arith.constant dense<0.000000e+00> : vector<64x8xf32>
    %24 = tpu.matmul %21, %23, %cst_18 {dimension_numbers = #tpu.dot_dimension_numbers<[1], [0], [0], [1], [0, 0, 1, 1], [], []>} : vector<64x32xbf16>, vector<32x8xbf16>, vector<64x8xf32> -> vector<64x8xf32>
    %25 = arith.addf %17, %24 : vector<64x8xf32>
    %c1_i32_19 = arith.constant 1 : i32
    %26 = arith.addi %0, %c1_i32_19 : i32
    %c0_20 = arith.constant 0 : index
    %27 = arith.index_cast %26 : i32 to index
    %c1_21 = arith.constant 1 : index
    %c0_22 = arith.constant 0 : index
    %28 = vector.load %arg2[%c0_20, %27, %c1_21, %c0_22] : memref<1x9x9x32xbf16, #tpu.memory_space<vmem>>, vector<1x8x8x32xbf16>
    %29 = vector.shape_cast %28 : vector<1x8x8x32xbf16> to vector<64x32xbf16>
    %c3 = arith.constant 3 : index
    %c0_23 = arith.constant 0 : index
    %c0_24 = arith.constant 0 : index
    %30 = vector.load %arg3[%c3, %c0_23, %c0_24] : memref<4x32x8xbf16, #tpu.memory_space<vmem>>, vector<1x32x8xbf16>
    %31 = vector.shape_cast %30 : vector<1x32x8xbf16> to vector<32x8xbf16>
    %cst_25 = arith.constant dense<0.000000e+00> : vector<64x8xf32>
    %32 = tpu.matmul %29, %31, %cst_25 {dimension_numbers = #tpu.dot_dimension_numbers<[1], [0], [0], [1], [0, 0, 1, 1], [], []>} : vector<64x32xbf16>, vector<32x8xbf16>, vector<64x8xf32> -> vector<64x8xf32>
    %33 = arith.addf %25, %32 : vector<64x8xf32>
    %c0_26 = arith.constant 0 : index
    %c0_27 = arith.constant 0 : index
    %34 = vector.load %arg4[%c0_26, %c0_27] : memref<1x8xf32, #tpu.memory_space<vmem>>, vector<1x8xf32>
    %35 = vector.broadcast %34 : vector<1x8xf32> to vector<64x8xf32>
    %36 = arith.addf %33, %35 : vector<64x8xf32>
    %c0_28 = arith.constant 0 : index
    %c0_29 = arith.constant 0 : index
    %37 = memref.load %arg5[%c0_28, %c0_29] : memref<1x1xf32, #tpu.memory_space<smem>>
    %cst_30 = arith.constant 0.000000e+00 : f32
    %38 = vector.broadcast %cst_30 : f32 to vector<64x8xf32>
    %39 = arith.cmpf oge, %36, %38 : vector<64x8xf32>
    %40 = vector.broadcast %37 : f32 to vector<64x8xf32>
    %41 = arith.mulf %40, %36 : vector<64x8xf32>
    %42 = arith.select %39, %36, %41 : vector<64x8xi1>, vector<64x8xf32>
    %43 = vector.shape_cast %42 : vector<64x8xf32> to vector<1x8x8x8xf32>
    %44 = arith.truncf %43 : vector<1x8x8x8xf32> to vector<1x8x8x8xbf16>
    %c0_31 = arith.constant 0 : index
    %c0_32 = arith.constant 0 : index
    %c0_33 = arith.constant 0 : index
    %c0_34 = arith.constant 0 : index
    %45 = vector.load %arg6[%c0_31, %c0_32, %c0_33, %c0_34] : memref<1x8x8x8xbf16, #tpu.memory_space<vmem>>, vector<1x8x8x8xbf16>
    tpu.vector_store %arg6[%c0_31, %c0_32, %c0_33, %c0_34], %44 {strides = array<i32>} : memref<1x8x8x8xbf16, #tpu.memory_space<vmem>>, vector<1x8x8x8xbf16>,
    return
  }
  func.func @transform_0(%arg0: i32, %arg1: i32) -> (i32, i32, i32, i32) {
    %c0_i32 = arith.constant 0 : i32
    %c0_i32_0 = arith.constant 0 : i32
    %c0_i32_1 = arith.constant 0 : i32
    %c0_i32_2 = arith.constant 0 : i32
    return %arg0, %c0_i32, %c0_i32_0, %c0_i32_1 : i32, i32, i32, i32
  }
  func.func @transform_1(%arg0: i32, %arg1: i32) -> (i32, i32, i32) {
    %c0_i32 = arith.constant 0 : i32
    %c0_i32_0 = arith.constant 0 : i32
    %c0_i32_1 = arith.constant 0 : i32
    %c0_i32_2 = arith.constant 0 : i32
    return %c0_i32, %c0_i32_0, %c0_i32_1 : i32, i32, i32
  }
  func.func @transform_2(%arg0: i32, %arg1: i32) -> (i32, i32) {
    %c0_i32 = arith.constant 0 : i32
    %c0_i32_0 = arith.constant 0 : i32
    %c0_i32_1 = arith.constant 0 : i32
    return %c0_i32, %c0_i32_0 : i32, i32
  }
  func.func @transform_3(%arg0: i32, %arg1: i32) -> (i32, i32) {
    %c0_i32 = arith.constant 0 : i32
    %c0_i32_0 = arith.constant 0 : i32
    %c0_i32_1 = arith.constant 0 : i32
    return %c0_i32, %c0_i32_0 : i32, i32
  }
  func.func @transform_4(%arg0: i32, %arg1: i32) -> (i32, i32, i32, i32) {
    %c0_i32 = arith.constant 0 : i32
    %c0_i32_0 = arith.constant 0 : i32
    %c0_i32_1 = arith.constant 0 : i32
    return %arg0, %arg1, %c0_i32, %c0_i32_0 : i32, i32, i32, i32
  }
}

module attributes {stable_mosaic.version = 11 : i64} {
  func.func @kernel(%arg0: i32, %arg1: i32, %arg2: memref<1x10x10x8xbf16, #tpu.memory_space<vmem>>, %arg3: memref<9x8x8xbf16, #tpu.memory_space<vmem>>, %arg4: memref<1x8xf32, #tpu.memory_space<vmem>>, %arg5: memref<1x1xf32, #tpu.memory_space<smem>>, %arg6: memref<1x8x8x8xbf16, #tpu.memory_space<vmem>>) attributes {dimension_semantics = [#tpu.dimension_semantics<parallel>, #tpu.dimension_semantics<arbitrary>], iteration_bounds = array<i64: 2, 1>, scalar_prefetch = 0 : i64, scratch_operands = 0 : i64, tpu.core_type = #tpu.core_type<tc>, window_params = [{transform_indices = @transform_0, window_bounds = array<i64: 1, 10, 10, 8>}, {pipeline_mode = #tpu.pipeline_mode<synchronous>, transform_indices = @transform_1, window_bounds = array<i64: 9, 8, 8>}, {pipeline_mode = #tpu.pipeline_mode<synchronous>, transform_indices = @transform_2, window_bounds = array<i64: 1, 8>}, {transform_indices = @transform_3, window_bounds = array<i64: 1, 1>}, {transform_indices = @transform_4, window_bounds = array<i64: 1, 8, 8, 8>}]} {
    %c8_i32 = arith.constant 8 : i32
    %0 = arith.muli %arg1, %c8_i32 : i32
    %cst = arith.constant 0.000000e+00 : f32
    %1 = vector.broadcast %cst : f32 to vector<64x8xf32>
    %c0_i32 = arith.constant 0 : i32
    %2 = arith.addi %0, %c0_i32 : i32
    %c0 = arith.constant 0 : index
    %3 = arith.index_cast %2 : i32 to index
    %c0_0 = arith.constant 0 : index
    %c0_1 = arith.constant 0 : index
    %4 = vector.load %arg2[%c0, %3, %c0_0, %c0_1] : memref<1x10x10x8xbf16, #tpu.memory_space<vmem>>, vector<1x8x8x8xbf16>
    %5 = vector.shape_cast %4 : vector<1x8x8x8xbf16> to vector<64x8xbf16>
    %c0_2 = arith.constant 0 : index
    %c0_3 = arith.constant 0 : index
    %c0_4 = arith.constant 0 : index
    %6 = vector.load %arg3[%c0_2, %c0_3, %c0_4] : memref<9x8x8xbf16, #tpu.memory_space<vmem>>, vector<1x8x8xbf16>
    %7 = vector.shape_cast %6 : vector<1x8x8xbf16> to vector<8x8xbf16>
    %cst_5 = arith.constant dense<0.000000e+00> : vector<64x8xf32>
    %8 = tpu.matmul %5, %7, %cst_5 {dimension_numbers = #tpu.dot_dimension_numbers<[1], [0], [0], [1], [0, 0, 1, 1], [], []>} : vector<64x8xbf16>, vector<8x8xbf16>, vector<64x8xf32> -> vector<64x8xf32>
    %9 = arith.addf %1, %8 : vector<64x8xf32>
    %c0_i32_6 = arith.constant 0 : i32
    %10 = arith.addi %0, %c0_i32_6 : i32
    %c0_7 = arith.constant 0 : index
    %11 = arith.index_cast %10 : i32 to index
    %c1 = arith.constant 1 : index
    %c0_8 = arith.constant 0 : index
    %12 = vector.load %arg2[%c0_7, %11, %c1, %c0_8] : memref<1x10x10x8xbf16, #tpu.memory_space<vmem>>, vector<1x8x8x8xbf16>
    %13 = vector.shape_cast %12 : vector<1x8x8x8xbf16> to vector<64x8xbf16>
    %c1_9 = arith.constant 1 : index
    %c0_10 = arith.constant 0 : index
    %c0_11 = arith.constant 0 : index
    %14 = vector.load %arg3[%c1_9, %c0_10, %c0_11] : memref<9x8x8xbf16, #tpu.memory_space<vmem>>, vector<1x8x8xbf16>
    %15 = vector.shape_cast %14 : vector<1x8x8xbf16> to vector<8x8xbf16>
    %cst_12 = arith.constant dense<0.000000e+00> : vector<64x8xf32>
    %16 = tpu.matmul %13, %15, %cst_12 {dimension_numbers = #tpu.dot_dimension_numbers<[1], [0], [0], [1], [0, 0, 1, 1], [], []>} : vector<64x8xbf16>, vector<8x8xbf16>, vector<64x8xf32> -> vector<64x8xf32>
    %17 = arith.addf %9, %16 : vector<64x8xf32>
    %c0_i32_13 = arith.constant 0 : i32
    %18 = arith.addi %0, %c0_i32_13 : i32
    %c0_14 = arith.constant 0 : index
    %19 = arith.index_cast %18 : i32 to index
    %c2 = arith.constant 2 : index
    %c0_15 = arith.constant 0 : index
    %20 = vector.load %arg2[%c0_14, %19, %c2, %c0_15] : memref<1x10x10x8xbf16, #tpu.memory_space<vmem>>, vector<1x8x8x8xbf16>
    %21 = vector.shape_cast %20 : vector<1x8x8x8xbf16> to vector<64x8xbf16>
    %c2_16 = arith.constant 2 : index
    %c0_17 = arith.constant 0 : index
    %c0_18 = arith.constant 0 : index
    %22 = vector.load %arg3[%c2_16, %c0_17, %c0_18] : memref<9x8x8xbf16, #tpu.memory_space<vmem>>, vector<1x8x8xbf16>
    %23 = vector.shape_cast %22 : vector<1x8x8xbf16> to vector<8x8xbf16>
    %cst_19 = arith.constant dense<0.000000e+00> : vector<64x8xf32>
    %24 = tpu.matmul %21, %23, %cst_19 {dimension_numbers = #tpu.dot_dimension_numbers<[1], [0], [0], [1], [0, 0, 1, 1], [], []>} : vector<64x8xbf16>, vector<8x8xbf16>, vector<64x8xf32> -> vector<64x8xf32>
    %25 = arith.addf %17, %24 : vector<64x8xf32>
    %c1_i32 = arith.constant 1 : i32
    %26 = arith.addi %0, %c1_i32 : i32
    %c0_20 = arith.constant 0 : index
    %27 = arith.index_cast %26 : i32 to index
    %c0_21 = arith.constant 0 : index
    %c0_22 = arith.constant 0 : index
    %28 = vector.load %arg2[%c0_20, %27, %c0_21, %c0_22] : memref<1x10x10x8xbf16, #tpu.memory_space<vmem>>, vector<1x8x8x8xbf16>
    %29 = vector.shape_cast %28 : vector<1x8x8x8xbf16> to vector<64x8xbf16>
    %c3 = arith.constant 3 : index
    %c0_23 = arith.constant 0 : index
    %c0_24 = arith.constant 0 : index
    %30 = vector.load %arg3[%c3, %c0_23, %c0_24] : memref<9x8x8xbf16, #tpu.memory_space<vmem>>, vector<1x8x8xbf16>
    %31 = vector.shape_cast %30 : vector<1x8x8xbf16> to vector<8x8xbf16>
    %cst_25 = arith.constant dense<0.000000e+00> : vector<64x8xf32>
    %32 = tpu.matmul %29, %31, %cst_25 {dimension_numbers = #tpu.dot_dimension_numbers<[1], [0], [0], [1], [0, 0, 1, 1], [], []>} : vector<64x8xbf16>, vector<8x8xbf16>, vector<64x8xf32> -> vector<64x8xf32>
    %33 = arith.addf %25, %32 : vector<64x8xf32>
    %c1_i32_26 = arith.constant 1 : i32
    %34 = arith.addi %0, %c1_i32_26 : i32
    %c0_27 = arith.constant 0 : index
    %35 = arith.index_cast %34 : i32 to index
    %c1_28 = arith.constant 1 : index
    %c0_29 = arith.constant 0 : index
    %36 = vector.load %arg2[%c0_27, %35, %c1_28, %c0_29] : memref<1x10x10x8xbf16, #tpu.memory_space<vmem>>, vector<1x8x8x8xbf16>
    %37 = vector.shape_cast %36 : vector<1x8x8x8xbf16> to vector<64x8xbf16>
    %c4 = arith.constant 4 : index
    %c0_30 = arith.constant 0 : index
    %c0_31 = arith.constant 0 : index
    %38 = vector.load %arg3[%c4, %c0_30, %c0_31] : memref<9x8x8xbf16, #tpu.memory_space<vmem>>, vector<1x8x8xbf16>
    %39 = vector.shape_cast %38 : vector<1x8x8xbf16> to vector<8x8xbf16>
    %cst_32 = arith.constant dense<0.000000e+00> : vector<64x8xf32>
    %40 = tpu.matmul %37, %39, %cst_32 {dimension_numbers = #tpu.dot_dimension_numbers<[1], [0], [0], [1], [0, 0, 1, 1], [], []>} : vector<64x8xbf16>, vector<8x8xbf16>, vector<64x8xf32> -> vector<64x8xf32>
    %41 = arith.addf %33, %40 : vector<64x8xf32>
    %c1_i32_33 = arith.constant 1 : i32
    %42 = arith.addi %0, %c1_i32_33 : i32
    %c0_34 = arith.constant 0 : index
    %43 = arith.index_cast %42 : i32 to index
    %c2_35 = arith.constant 2 : index
    %c0_36 = arith.constant 0 : index
    %44 = vector.load %arg2[%c0_34, %43, %c2_35, %c0_36] : memref<1x10x10x8xbf16, #tpu.memory_space<vmem>>, vector<1x8x8x8xbf16>
    %45 = vector.shape_cast %44 : vector<1x8x8x8xbf16> to vector<64x8xbf16>
    %c5 = arith.constant 5 : index
    %c0_37 = arith.constant 0 : index
    %c0_38 = arith.constant 0 : index
    %46 = vector.load %arg3[%c5, %c0_37, %c0_38] : memref<9x8x8xbf16, #tpu.memory_space<vmem>>, vector<1x8x8xbf16>
    %47 = vector.shape_cast %46 : vector<1x8x8xbf16> to vector<8x8xbf16>
    %cst_39 = arith.constant dense<0.000000e+00> : vector<64x8xf32>
    %48 = tpu.matmul %45, %47, %cst_39 {dimension_numbers = #tpu.dot_dimension_numbers<[1], [0], [0], [1], [0, 0, 1, 1], [], []>} : vector<64x8xbf16>, vector<8x8xbf16>, vector<64x8xf32> -> vector<64x8xf32>
    %49 = arith.addf %41, %48 : vector<64x8xf32>
    %c2_i32 = arith.constant 2 : i32
    %50 = arith.addi %0, %c2_i32 : i32
    %c0_40 = arith.constant 0 : index
    %51 = arith.index_cast %50 : i32 to index
    %c0_41 = arith.constant 0 : index
    %c0_42 = arith.constant 0 : index
    %52 = vector.load %arg2[%c0_40, %51, %c0_41, %c0_42] : memref<1x10x10x8xbf16, #tpu.memory_space<vmem>>, vector<1x8x8x8xbf16>
    %53 = vector.shape_cast %52 : vector<1x8x8x8xbf16> to vector<64x8xbf16>
    %c6 = arith.constant 6 : index
    %c0_43 = arith.constant 0 : index
    %c0_44 = arith.constant 0 : index
    %54 = vector.load %arg3[%c6, %c0_43, %c0_44] : memref<9x8x8xbf16, #tpu.memory_space<vmem>>, vector<1x8x8xbf16>
    %55 = vector.shape_cast %54 : vector<1x8x8xbf16> to vector<8x8xbf16>
    %cst_45 = arith.constant dense<0.000000e+00> : vector<64x8xf32>
    %56 = tpu.matmul %53, %55, %cst_45 {dimension_numbers = #tpu.dot_dimension_numbers<[1], [0], [0], [1], [0, 0, 1, 1], [], []>} : vector<64x8xbf16>, vector<8x8xbf16>, vector<64x8xf32> -> vector<64x8xf32>
    %57 = arith.addf %49, %56 : vector<64x8xf32>
    %c2_i32_46 = arith.constant 2 : i32
    %58 = arith.addi %0, %c2_i32_46 : i32
    %c0_47 = arith.constant 0 : index
    %59 = arith.index_cast %58 : i32 to index
    %c1_48 = arith.constant 1 : index
    %c0_49 = arith.constant 0 : index
    %60 = vector.load %arg2[%c0_47, %59, %c1_48, %c0_49] : memref<1x10x10x8xbf16, #tpu.memory_space<vmem>>, vector<1x8x8x8xbf16>
    %61 = vector.shape_cast %60 : vector<1x8x8x8xbf16> to vector<64x8xbf16>
    %c7 = arith.constant 7 : index
    %c0_50 = arith.constant 0 : index
    %c0_51 = arith.constant 0 : index
    %62 = vector.load %arg3[%c7, %c0_50, %c0_51] : memref<9x8x8xbf16, #tpu.memory_space<vmem>>, vector<1x8x8xbf16>
    %63 = vector.shape_cast %62 : vector<1x8x8xbf16> to vector<8x8xbf16>
    %cst_52 = arith.constant dense<0.000000e+00> : vector<64x8xf32>
    %64 = tpu.matmul %61, %63, %cst_52 {dimension_numbers = #tpu.dot_dimension_numbers<[1], [0], [0], [1], [0, 0, 1, 1], [], []>} : vector<64x8xbf16>, vector<8x8xbf16>, vector<64x8xf32> -> vector<64x8xf32>
    %65 = arith.addf %57, %64 : vector<64x8xf32>
    %c2_i32_53 = arith.constant 2 : i32
    %66 = arith.addi %0, %c2_i32_53 : i32
    %c0_54 = arith.constant 0 : index
    %67 = arith.index_cast %66 : i32 to index
    %c2_55 = arith.constant 2 : index
    %c0_56 = arith.constant 0 : index
    %68 = vector.load %arg2[%c0_54, %67, %c2_55, %c0_56] : memref<1x10x10x8xbf16, #tpu.memory_space<vmem>>, vector<1x8x8x8xbf16>
    %69 = vector.shape_cast %68 : vector<1x8x8x8xbf16> to vector<64x8xbf16>
    %c8 = arith.constant 8 : index
    %c0_57 = arith.constant 0 : index
    %c0_58 = arith.constant 0 : index
    %70 = vector.load %arg3[%c8, %c0_57, %c0_58] : memref<9x8x8xbf16, #tpu.memory_space<vmem>>, vector<1x8x8xbf16>
    %71 = vector.shape_cast %70 : vector<1x8x8xbf16> to vector<8x8xbf16>
    %cst_59 = arith.constant dense<0.000000e+00> : vector<64x8xf32>
    %72 = tpu.matmul %69, %71, %cst_59 {dimension_numbers = #tpu.dot_dimension_numbers<[1], [0], [0], [1], [0, 0, 1, 1], [], []>} : vector<64x8xbf16>, vector<8x8xbf16>, vector<64x8xf32> -> vector<64x8xf32>
    %73 = arith.addf %65, %72 : vector<64x8xf32>
    %c0_60 = arith.constant 0 : index
    %c0_61 = arith.constant 0 : index
    %74 = vector.load %arg4[%c0_60, %c0_61] : memref<1x8xf32, #tpu.memory_space<vmem>>, vector<1x8xf32>
    %75 = vector.broadcast %74 : vector<1x8xf32> to vector<64x8xf32>
    %76 = arith.addf %73, %75 : vector<64x8xf32>
    %c0_62 = arith.constant 0 : index
    %c0_63 = arith.constant 0 : index
    %77 = memref.load %arg5[%c0_62, %c0_63] : memref<1x1xf32, #tpu.memory_space<smem>>
    %cst_64 = arith.constant 0.000000e+00 : f32
    %78 = vector.broadcast %cst_64 : f32 to vector<64x8xf32>
    %79 = arith.cmpf oge, %76, %78 : vector<64x8xf32>
    %80 = vector.broadcast %77 : f32 to vector<64x8xf32>
    %81 = arith.mulf %80, %76 : vector<64x8xf32>
    %82 = arith.select %79, %76, %81 : vector<64x8xi1>, vector<64x8xf32>
    %83 = vector.shape_cast %82 : vector<64x8xf32> to vector<1x8x8x8xf32>
    %84 = arith.truncf %83 : vector<1x8x8x8xf32> to vector<1x8x8x8xbf16>
    %c0_65 = arith.constant 0 : index
    %c0_66 = arith.constant 0 : index
    %c0_67 = arith.constant 0 : index
    %c0_68 = arith.constant 0 : index
    %85 = vector.load %arg6[%c0_65, %c0_66, %c0_67, %c0_68] : memref<1x8x8x8xbf16, #tpu.memory_space<vmem>>, vector<1x8x8x8xbf16>
    tpu.vector_store %arg6[%c0_65, %c0_66, %c0_67, %c0_68], %84 {strides = array<i32>} : memref<1x8x8x8xbf16, #tpu.memory_space<vmem>>, vector<1x8x8x8xbf16>,
    return
  }
  func.func @transform_0(%arg0: i32, %arg1: i32) -> (i32, i32, i32, i32) {
    %c0_i32 = arith.constant 0 : i32
    %c0_i32_0 = arith.constant 0 : i32
    %c0_i32_1 = arith.constant 0 : i32
    %c0_i32_2 = arith.constant 0 : i32
    return %arg0, %c0_i32, %c0_i32_0, %c0_i32_1 : i32, i32, i32, i32
  }
  func.func @transform_1(%arg0: i32, %arg1: i32) -> (i32, i32, i32) {
    %c0_i32 = arith.constant 0 : i32
    %c0_i32_0 = arith.constant 0 : i32
    %c0_i32_1 = arith.constant 0 : i32
    %c0_i32_2 = arith.constant 0 : i32
    return %c0_i32, %c0_i32_0, %c0_i32_1 : i32, i32, i32
  }
  func.func @transform_2(%arg0: i32, %arg1: i32) -> (i32, i32) {
    %c0_i32 = arith.constant 0 : i32
    %c0_i32_0 = arith.constant 0 : i32
    %c0_i32_1 = arith.constant 0 : i32
    return %c0_i32, %c0_i32_0 : i32, i32
  }
  func.func @transform_3(%arg0: i32, %arg1: i32) -> (i32, i32) {
    %c0_i32 = arith.constant 0 : i32
    %c0_i32_0 = arith.constant 0 : i32
    %c0_i32_1 = arith.constant 0 : i32
    return %c0_i32, %c0_i32_0 : i32, i32
  }
  func.func @transform_4(%arg0: i32, %arg1: i32) -> (i32, i32, i32, i32) {
    %c0_i32 = arith.constant 0 : i32
    %c0_i32_0 = arith.constant 0 : i32
    %c0_i32_1 = arith.constant 0 : i32
    return %arg0, %arg1, %c0_i32, %c0_i32_0 : i32, i32, i32, i32
  }
}

module attributes {stable_mosaic.version = 11 : i64} {
  func.func @kernel(%arg0: i32, %arg1: i32, %arg2: memref<1x5x5x32xbf16, #tpu.memory_space<vmem>>, %arg3: memref<4x32x8xbf16, #tpu.memory_space<vmem>>, %arg4: memref<1x8xf32, #tpu.memory_space<vmem>>, %arg5: memref<1x1xf32, #tpu.memory_space<smem>>, %arg6: memref<1x4x4x8xbf16, #tpu.memory_space<vmem>>) attributes {dimension_semantics = [#tpu.dimension_semantics<parallel>, #tpu.dimension_semantics<arbitrary>], iteration_bounds = array<i64: 2, 1>, scalar_prefetch = 0 : i64, scratch_operands = 0 : i64, tpu.core_type = #tpu.core_type<tc>, window_params = [{transform_indices = @transform_0, window_bounds = array<i64: 1, 5, 5, 32>}, {pipeline_mode = #tpu.pipeline_mode<synchronous>, transform_indices = @transform_1, window_bounds = array<i64: 4, 32, 8>}, {pipeline_mode = #tpu.pipeline_mode<synchronous>, transform_indices = @transform_2, window_bounds = array<i64: 1, 8>}, {transform_indices = @transform_3, window_bounds = array<i64: 1, 1>}, {transform_indices = @transform_4, window_bounds = array<i64: 1, 4, 4, 8>}]} {
    %c4_i32 = arith.constant 4 : i32
    %0 = arith.muli %arg1, %c4_i32 : i32
    %cst = arith.constant 0.000000e+00 : f32
    %1 = vector.broadcast %cst : f32 to vector<16x8xf32>
    %c0_i32 = arith.constant 0 : i32
    %2 = arith.addi %0, %c0_i32 : i32
    %c0 = arith.constant 0 : index
    %3 = arith.index_cast %2 : i32 to index
    %c0_0 = arith.constant 0 : index
    %c0_1 = arith.constant 0 : index
    %4 = vector.load %arg2[%c0, %3, %c0_0, %c0_1] : memref<1x5x5x32xbf16, #tpu.memory_space<vmem>>, vector<1x4x4x32xbf16>
    %5 = vector.shape_cast %4 : vector<1x4x4x32xbf16> to vector<16x32xbf16>
    %c0_2 = arith.constant 0 : index
    %c0_3 = arith.constant 0 : index
    %c0_4 = arith.constant 0 : index
    %6 = vector.load %arg3[%c0_2, %c0_3, %c0_4] : memref<4x32x8xbf16, #tpu.memory_space<vmem>>, vector<1x32x8xbf16>
    %7 = vector.shape_cast %6 : vector<1x32x8xbf16> to vector<32x8xbf16>
    %cst_5 = arith.constant dense<0.000000e+00> : vector<16x8xf32>
    %8 = tpu.matmul %5, %7, %cst_5 {dimension_numbers = #tpu.dot_dimension_numbers<[1], [0], [0], [1], [0, 0, 1, 1], [], []>} : vector<16x32xbf16>, vector<32x8xbf16>, vector<16x8xf32> -> vector<16x8xf32>
    %9 = arith.addf %1, %8 : vector<16x8xf32>
    %c0_i32_6 = arith.constant 0 : i32
    %10 = arith.addi %0, %c0_i32_6 : i32
    %c0_7 = arith.constant 0 : index
    %11 = arith.index_cast %10 : i32 to index
    %c1 = arith.constant 1 : index
    %c0_8 = arith.constant 0 : index
    %12 = vector.load %arg2[%c0_7, %11, %c1, %c0_8] : memref<1x5x5x32xbf16, #tpu.memory_space<vmem>>, vector<1x4x4x32xbf16>
    %13 = vector.shape_cast %12 : vector<1x4x4x32xbf16> to vector<16x32xbf16>
    %c1_9 = arith.constant 1 : index
    %c0_10 = arith.constant 0 : index
    %c0_11 = arith.constant 0 : index
    %14 = vector.load %arg3[%c1_9, %c0_10, %c0_11] : memref<4x32x8xbf16, #tpu.memory_space<vmem>>, vector<1x32x8xbf16>
    %15 = vector.shape_cast %14 : vector<1x32x8xbf16> to vector<32x8xbf16>
    %cst_12 = arith.constant dense<0.000000e+00> : vector<16x8xf32>
    %16 = tpu.matmul %13, %15, %cst_12 {dimension_numbers = #tpu.dot_dimension_numbers<[1], [0], [0], [1], [0, 0, 1, 1], [], []>} : vector<16x32xbf16>, vector<32x8xbf16>, vector<16x8xf32> -> vector<16x8xf32>
    %17 = arith.addf %9, %16 : vector<16x8xf32>
    %c1_i32 = arith.constant 1 : i32
    %18 = arith.addi %0, %c1_i32 : i32
    %c0_13 = arith.constant 0 : index
    %19 = arith.index_cast %18 : i32 to index
    %c0_14 = arith.constant 0 : index
    %c0_15 = arith.constant 0 : index
    %20 = vector.load %arg2[%c0_13, %19, %c0_14, %c0_15] : memref<1x5x5x32xbf16, #tpu.memory_space<vmem>>, vector<1x4x4x32xbf16>
    %21 = vector.shape_cast %20 : vector<1x4x4x32xbf16> to vector<16x32xbf16>
    %c2 = arith.constant 2 : index
    %c0_16 = arith.constant 0 : index
    %c0_17 = arith.constant 0 : index
    %22 = vector.load %arg3[%c2, %c0_16, %c0_17] : memref<4x32x8xbf16, #tpu.memory_space<vmem>>, vector<1x32x8xbf16>
    %23 = vector.shape_cast %22 : vector<1x32x8xbf16> to vector<32x8xbf16>
    %cst_18 = arith.constant dense<0.000000e+00> : vector<16x8xf32>
    %24 = tpu.matmul %21, %23, %cst_18 {dimension_numbers = #tpu.dot_dimension_numbers<[1], [0], [0], [1], [0, 0, 1, 1], [], []>} : vector<16x32xbf16>, vector<32x8xbf16>, vector<16x8xf32> -> vector<16x8xf32>
    %25 = arith.addf %17, %24 : vector<16x8xf32>
    %c1_i32_19 = arith.constant 1 : i32
    %26 = arith.addi %0, %c1_i32_19 : i32
    %c0_20 = arith.constant 0 : index
    %27 = arith.index_cast %26 : i32 to index
    %c1_21 = arith.constant 1 : index
    %c0_22 = arith.constant 0 : index
    %28 = vector.load %arg2[%c0_20, %27, %c1_21, %c0_22] : memref<1x5x5x32xbf16, #tpu.memory_space<vmem>>, vector<1x4x4x32xbf16>
    %29 = vector.shape_cast %28 : vector<1x4x4x32xbf16> to vector<16x32xbf16>
    %c3 = arith.constant 3 : index
    %c0_23 = arith.constant 0 : index
    %c0_24 = arith.constant 0 : index
    %30 = vector.load %arg3[%c3, %c0_23, %c0_24] : memref<4x32x8xbf16, #tpu.memory_space<vmem>>, vector<1x32x8xbf16>
    %31 = vector.shape_cast %30 : vector<1x32x8xbf16> to vector<32x8xbf16>
    %cst_25 = arith.constant dense<0.000000e+00> : vector<16x8xf32>
    %32 = tpu.matmul %29, %31, %cst_25 {dimension_numbers = #tpu.dot_dimension_numbers<[1], [0], [0], [1], [0, 0, 1, 1], [], []>} : vector<16x32xbf16>, vector<32x8xbf16>, vector<16x8xf32> -> vector<16x8xf32>
    %33 = arith.addf %25, %32 : vector<16x8xf32>
    %c0_26 = arith.constant 0 : index
    %c0_27 = arith.constant 0 : index
    %34 = vector.load %arg4[%c0_26, %c0_27] : memref<1x8xf32, #tpu.memory_space<vmem>>, vector<1x8xf32>
    %35 = vector.broadcast %34 : vector<1x8xf32> to vector<16x8xf32>
    %36 = arith.addf %33, %35 : vector<16x8xf32>
    %c0_28 = arith.constant 0 : index
    %c0_29 = arith.constant 0 : index
    %37 = memref.load %arg5[%c0_28, %c0_29] : memref<1x1xf32, #tpu.memory_space<smem>>
    %cst_30 = arith.constant 0.000000e+00 : f32
    %38 = vector.broadcast %cst_30 : f32 to vector<16x8xf32>
    %39 = arith.cmpf oge, %36, %38 : vector<16x8xf32>
    %40 = vector.broadcast %37 : f32 to vector<16x8xf32>
    %41 = arith.mulf %40, %36 : vector<16x8xf32>
    %42 = arith.select %39, %36, %41 : vector<16x8xi1>, vector<16x8xf32>
    %43 = vector.shape_cast %42 : vector<16x8xf32> to vector<1x4x4x8xf32>
    %44 = arith.truncf %43 : vector<1x4x4x8xf32> to vector<1x4x4x8xbf16>
    %c0_31 = arith.constant 0 : index
    %c0_32 = arith.constant 0 : index
    %c0_33 = arith.constant 0 : index
    %c0_34 = arith.constant 0 : index
    %45 = vector.load %arg6[%c0_31, %c0_32, %c0_33, %c0_34] : memref<1x4x4x8xbf16, #tpu.memory_space<vmem>>, vector<1x4x4x8xbf16>
    tpu.vector_store %arg6[%c0_31, %c0_32, %c0_33, %c0_34], %44 {strides = array<i32>} : memref<1x4x4x8xbf16, #tpu.memory_space<vmem>>, vector<1x4x4x8xbf16>,
    return
  }
  func.func @transform_0(%arg0: i32, %arg1: i32) -> (i32, i32, i32, i32) {
    %c0_i32 = arith.constant 0 : i32
    %c0_i32_0 = arith.constant 0 : i32
    %c0_i32_1 = arith.constant 0 : i32
    %c0_i32_2 = arith.constant 0 : i32
    return %arg0, %c0_i32, %c0_i32_0, %c0_i32_1 : i32, i32, i32, i32
  }
  func.func @transform_1(%arg0: i32, %arg1: i32) -> (i32, i32, i32) {
    %c0_i32 = arith.constant 0 : i32
    %c0_i32_0 = arith.constant 0 : i32
    %c0_i32_1 = arith.constant 0 : i32
    %c0_i32_2 = arith.constant 0 : i32
    return %c0_i32, %c0_i32_0, %c0_i32_1 : i32, i32, i32
  }
  func.func @transform_2(%arg0: i32, %arg1: i32) -> (i32, i32) {
    %c0_i32 = arith.constant 0 : i32
    %c0_i32_0 = arith.constant 0 : i32
    %c0_i32_1 = arith.constant 0 : i32
    return %c0_i32, %c0_i32_0 : i32, i32
  }
  func.func @transform_3(%arg0: i32, %arg1: i32) -> (i32, i32) {
    %c0_i32 = arith.constant 0 : i32
    %c0_i32_0 = arith.constant 0 : i32
    %c0_i32_1 = arith.constant 0 : i32
    return %c0_i32, %c0_i32_0 : i32, i32
  }
  func.func @transform_4(%arg0: i32, %arg1: i32) -> (i32, i32, i32, i32) {
    %c0_i32 = arith.constant 0 : i32
    %c0_i32_0 = arith.constant 0 : i32
    %c0_i32_1 = arith.constant 0 : i32
    return %arg0, %arg1, %c0_i32, %c0_i32_0 : i32, i32, i32, i32
  }
}

module attributes {stable_mosaic.version = 11 : i64} {
  func.func @kernel(%arg0: i32, %arg1: i32, %arg2: memref<1x6x6x8xbf16, #tpu.memory_space<vmem>>, %arg3: memref<9x8x8xbf16, #tpu.memory_space<vmem>>, %arg4: memref<1x8xf32, #tpu.memory_space<vmem>>, %arg5: memref<1x1xf32, #tpu.memory_space<smem>>, %arg6: memref<1x4x4x8xbf16, #tpu.memory_space<vmem>>) attributes {dimension_semantics = [#tpu.dimension_semantics<parallel>, #tpu.dimension_semantics<arbitrary>], iteration_bounds = array<i64: 2, 1>, scalar_prefetch = 0 : i64, scratch_operands = 0 : i64, tpu.core_type = #tpu.core_type<tc>, window_params = [{transform_indices = @transform_0, window_bounds = array<i64: 1, 6, 6, 8>}, {pipeline_mode = #tpu.pipeline_mode<synchronous>, transform_indices = @transform_1, window_bounds = array<i64: 9, 8, 8>}, {pipeline_mode = #tpu.pipeline_mode<synchronous>, transform_indices = @transform_2, window_bounds = array<i64: 1, 8>}, {transform_indices = @transform_3, window_bounds = array<i64: 1, 1>}, {transform_indices = @transform_4, window_bounds = array<i64: 1, 4, 4, 8>}]} {
    %c4_i32 = arith.constant 4 : i32
    %0 = arith.muli %arg1, %c4_i32 : i32
    %cst = arith.constant 0.000000e+00 : f32
    %1 = vector.broadcast %cst : f32 to vector<16x8xf32>
    %c0_i32 = arith.constant 0 : i32
    %2 = arith.addi %0, %c0_i32 : i32
    %c0 = arith.constant 0 : index
    %3 = arith.index_cast %2 : i32 to index
    %c0_0 = arith.constant 0 : index
    %c0_1 = arith.constant 0 : index
    %4 = vector.load %arg2[%c0, %3, %c0_0, %c0_1] : memref<1x6x6x8xbf16, #tpu.memory_space<vmem>>, vector<1x4x4x8xbf16>
    %5 = vector.shape_cast %4 : vector<1x4x4x8xbf16> to vector<16x8xbf16>
    %c0_2 = arith.constant 0 : index
    %c0_3 = arith.constant 0 : index
    %c0_4 = arith.constant 0 : index
    %6 = vector.load %arg3[%c0_2, %c0_3, %c0_4] : memref<9x8x8xbf16, #tpu.memory_space<vmem>>, vector<1x8x8xbf16>
    %7 = vector.shape_cast %6 : vector<1x8x8xbf16> to vector<8x8xbf16>
    %cst_5 = arith.constant dense<0.000000e+00> : vector<16x8xf32>
    %8 = tpu.matmul %5, %7, %cst_5 {dimension_numbers = #tpu.dot_dimension_numbers<[1], [0], [0], [1], [0, 0, 1, 1], [], []>} : vector<16x8xbf16>, vector<8x8xbf16>, vector<16x8xf32> -> vector<16x8xf32>
    %9 = arith.addf %1, %8 : vector<16x8xf32>
    %c0_i32_6 = arith.constant 0 : i32
    %10 = arith.addi %0, %c0_i32_6 : i32
    %c0_7 = arith.constant 0 : index
    %11 = arith.index_cast %10 : i32 to index
    %c1 = arith.constant 1 : index
    %c0_8 = arith.constant 0 : index
    %12 = vector.load %arg2[%c0_7, %11, %c1, %c0_8] : memref<1x6x6x8xbf16, #tpu.memory_space<vmem>>, vector<1x4x4x8xbf16>
    %13 = vector.shape_cast %12 : vector<1x4x4x8xbf16> to vector<16x8xbf16>
    %c1_9 = arith.constant 1 : index
    %c0_10 = arith.constant 0 : index
    %c0_11 = arith.constant 0 : index
    %14 = vector.load %arg3[%c1_9, %c0_10, %c0_11] : memref<9x8x8xbf16, #tpu.memory_space<vmem>>, vector<1x8x8xbf16>
    %15 = vector.shape_cast %14 : vector<1x8x8xbf16> to vector<8x8xbf16>
    %cst_12 = arith.constant dense<0.000000e+00> : vector<16x8xf32>
    %16 = tpu.matmul %13, %15, %cst_12 {dimension_numbers = #tpu.dot_dimension_numbers<[1], [0], [0], [1], [0, 0, 1, 1], [], []>} : vector<16x8xbf16>, vector<8x8xbf16>, vector<16x8xf32> -> vector<16x8xf32>
    %17 = arith.addf %9, %16 : vector<16x8xf32>
    %c0_i32_13 = arith.constant 0 : i32
    %18 = arith.addi %0, %c0_i32_13 : i32
    %c0_14 = arith.constant 0 : index
    %19 = arith.index_cast %18 : i32 to index
    %c2 = arith.constant 2 : index
    %c0_15 = arith.constant 0 : index
    %20 = vector.load %arg2[%c0_14, %19, %c2, %c0_15] : memref<1x6x6x8xbf16, #tpu.memory_space<vmem>>, vector<1x4x4x8xbf16>
    %21 = vector.shape_cast %20 : vector<1x4x4x8xbf16> to vector<16x8xbf16>
    %c2_16 = arith.constant 2 : index
    %c0_17 = arith.constant 0 : index
    %c0_18 = arith.constant 0 : index
    %22 = vector.load %arg3[%c2_16, %c0_17, %c0_18] : memref<9x8x8xbf16, #tpu.memory_space<vmem>>, vector<1x8x8xbf16>
    %23 = vector.shape_cast %22 : vector<1x8x8xbf16> to vector<8x8xbf16>
    %cst_19 = arith.constant dense<0.000000e+00> : vector<16x8xf32>
    %24 = tpu.matmul %21, %23, %cst_19 {dimension_numbers = #tpu.dot_dimension_numbers<[1], [0], [0], [1], [0, 0, 1, 1], [], []>} : vector<16x8xbf16>, vector<8x8xbf16>, vector<16x8xf32> -> vector<16x8xf32>
    %25 = arith.addf %17, %24 : vector<16x8xf32>
    %c1_i32 = arith.constant 1 : i32
    %26 = arith.addi %0, %c1_i32 : i32
    %c0_20 = arith.constant 0 : index
    %27 = arith.index_cast %26 : i32 to index
    %c0_21 = arith.constant 0 : index
    %c0_22 = arith.constant 0 : index
    %28 = vector.load %arg2[%c0_20, %27, %c0_21, %c0_22] : memref<1x6x6x8xbf16, #tpu.memory_space<vmem>>, vector<1x4x4x8xbf16>
    %29 = vector.shape_cast %28 : vector<1x4x4x8xbf16> to vector<16x8xbf16>
    %c3 = arith.constant 3 : index
    %c0_23 = arith.constant 0 : index
    %c0_24 = arith.constant 0 : index
    %30 = vector.load %arg3[%c3, %c0_23, %c0_24] : memref<9x8x8xbf16, #tpu.memory_space<vmem>>, vector<1x8x8xbf16>
    %31 = vector.shape_cast %30 : vector<1x8x8xbf16> to vector<8x8xbf16>
    %cst_25 = arith.constant dense<0.000000e+00> : vector<16x8xf32>
    %32 = tpu.matmul %29, %31, %cst_25 {dimension_numbers = #tpu.dot_dimension_numbers<[1], [0], [0], [1], [0, 0, 1, 1], [], []>} : vector<16x8xbf16>, vector<8x8xbf16>, vector<16x8xf32> -> vector<16x8xf32>
    %33 = arith.addf %25, %32 : vector<16x8xf32>
    %c1_i32_26 = arith.constant 1 : i32
    %34 = arith.addi %0, %c1_i32_26 : i32
    %c0_27 = arith.constant 0 : index
    %35 = arith.index_cast %34 : i32 to index
    %c1_28 = arith.constant 1 : index
    %c0_29 = arith.constant 0 : index
    %36 = vector.load %arg2[%c0_27, %35, %c1_28, %c0_29] : memref<1x6x6x8xbf16, #tpu.memory_space<vmem>>, vector<1x4x4x8xbf16>
    %37 = vector.shape_cast %36 : vector<1x4x4x8xbf16> to vector<16x8xbf16>
    %c4 = arith.constant 4 : index
    %c0_30 = arith.constant 0 : index
    %c0_31 = arith.constant 0 : index
    %38 = vector.load %arg3[%c4, %c0_30, %c0_31] : memref<9x8x8xbf16, #tpu.memory_space<vmem>>, vector<1x8x8xbf16>
    %39 = vector.shape_cast %38 : vector<1x8x8xbf16> to vector<8x8xbf16>
    %cst_32 = arith.constant dense<0.000000e+00> : vector<16x8xf32>
    %40 = tpu.matmul %37, %39, %cst_32 {dimension_numbers = #tpu.dot_dimension_numbers<[1], [0], [0], [1], [0, 0, 1, 1], [], []>} : vector<16x8xbf16>, vector<8x8xbf16>, vector<16x8xf32> -> vector<16x8xf32>
    %41 = arith.addf %33, %40 : vector<16x8xf32>
    %c1_i32_33 = arith.constant 1 : i32
    %42 = arith.addi %0, %c1_i32_33 : i32
    %c0_34 = arith.constant 0 : index
    %43 = arith.index_cast %42 : i32 to index
    %c2_35 = arith.constant 2 : index
    %c0_36 = arith.constant 0 : index
    %44 = vector.load %arg2[%c0_34, %43, %c2_35, %c0_36] : memref<1x6x6x8xbf16, #tpu.memory_space<vmem>>, vector<1x4x4x8xbf16>
    %45 = vector.shape_cast %44 : vector<1x4x4x8xbf16> to vector<16x8xbf16>
    %c5 = arith.constant 5 : index
    %c0_37 = arith.constant 0 : index
    %c0_38 = arith.constant 0 : index
    %46 = vector.load %arg3[%c5, %c0_37, %c0_38] : memref<9x8x8xbf16, #tpu.memory_space<vmem>>, vector<1x8x8xbf16>
    %47 = vector.shape_cast %46 : vector<1x8x8xbf16> to vector<8x8xbf16>
    %cst_39 = arith.constant dense<0.000000e+00> : vector<16x8xf32>
    %48 = tpu.matmul %45, %47, %cst_39 {dimension_numbers = #tpu.dot_dimension_numbers<[1], [0], [0], [1], [0, 0, 1, 1], [], []>} : vector<16x8xbf16>, vector<8x8xbf16>, vector<16x8xf32> -> vector<16x8xf32>
    %49 = arith.addf %41, %48 : vector<16x8xf32>
    %c2_i32 = arith.constant 2 : i32
    %50 = arith.addi %0, %c2_i32 : i32
    %c0_40 = arith.constant 0 : index
    %51 = arith.index_cast %50 : i32 to index
    %c0_41 = arith.constant 0 : index
    %c0_42 = arith.constant 0 : index
    %52 = vector.load %arg2[%c0_40, %51, %c0_41, %c0_42] : memref<1x6x6x8xbf16, #tpu.memory_space<vmem>>, vector<1x4x4x8xbf16>
    %53 = vector.shape_cast %52 : vector<1x4x4x8xbf16> to vector<16x8xbf16>
    %c6 = arith.constant 6 : index
    %c0_43 = arith.constant 0 : index
    %c0_44 = arith.constant 0 : index
    %54 = vector.load %arg3[%c6, %c0_43, %c0_44] : memref<9x8x8xbf16, #tpu.memory_space<vmem>>, vector<1x8x8xbf16>
    %55 = vector.shape_cast %54 : vector<1x8x8xbf16> to vector<8x8xbf16>
    %cst_45 = arith.constant dense<0.000000e+00> : vector<16x8xf32>
    %56 = tpu.matmul %53, %55, %cst_45 {dimension_numbers = #tpu.dot_dimension_numbers<[1], [0], [0], [1], [0, 0, 1, 1], [], []>} : vector<16x8xbf16>, vector<8x8xbf16>, vector<16x8xf32> -> vector<16x8xf32>
    %57 = arith.addf %49, %56 : vector<16x8xf32>
    %c2_i32_46 = arith.constant 2 : i32
    %58 = arith.addi %0, %c2_i32_46 : i32
    %c0_47 = arith.constant 0 : index
    %59 = arith.index_cast %58 : i32 to index
    %c1_48 = arith.constant 1 : index
    %c0_49 = arith.constant 0 : index
    %60 = vector.load %arg2[%c0_47, %59, %c1_48, %c0_49] : memref<1x6x6x8xbf16, #tpu.memory_space<vmem>>, vector<1x4x4x8xbf16>
    %61 = vector.shape_cast %60 : vector<1x4x4x8xbf16> to vector<16x8xbf16>
    %c7 = arith.constant 7 : index
    %c0_50 = arith.constant 0 : index
    %c0_51 = arith.constant 0 : index
    %62 = vector.load %arg3[%c7, %c0_50, %c0_51] : memref<9x8x8xbf16, #tpu.memory_space<vmem>>, vector<1x8x8xbf16>
    %63 = vector.shape_cast %62 : vector<1x8x8xbf16> to vector<8x8xbf16>
    %cst_52 = arith.constant dense<0.000000e+00> : vector<16x8xf32>
    %64 = tpu.matmul %61, %63, %cst_52 {dimension_numbers = #tpu.dot_dimension_numbers<[1], [0], [0], [1], [0, 0, 1, 1], [], []>} : vector<16x8xbf16>, vector<8x8xbf16>, vector<16x8xf32> -> vector<16x8xf32>
    %65 = arith.addf %57, %64 : vector<16x8xf32>
    %c2_i32_53 = arith.constant 2 : i32
    %66 = arith.addi %0, %c2_i32_53 : i32
    %c0_54 = arith.constant 0 : index
    %67 = arith.index_cast %66 : i32 to index
    %c2_55 = arith.constant 2 : index
    %c0_56 = arith.constant 0 : index
    %68 = vector.load %arg2[%c0_54, %67, %c2_55, %c0_56] : memref<1x6x6x8xbf16, #tpu.memory_space<vmem>>, vector<1x4x4x8xbf16>
    %69 = vector.shape_cast %68 : vector<1x4x4x8xbf16> to vector<16x8xbf16>
    %c8 = arith.constant 8 : index
    %c0_57 = arith.constant 0 : index
    %c0_58 = arith.constant 0 : index
    %70 = vector.load %arg3[%c8, %c0_57, %c0_58] : memref<9x8x8xbf16, #tpu.memory_space<vmem>>, vector<1x8x8xbf16>
    %71 = vector.shape_cast %70 : vector<1x8x8xbf16> to vector<8x8xbf16>
    %cst_59 = arith.constant dense<0.000000e+00> : vector<16x8xf32>
    %72 = tpu.matmul %69, %71, %cst_59 {dimension_numbers = #tpu.dot_dimension_numbers<[1], [0], [0], [1], [0, 0, 1, 1], [], []>} : vector<16x8xbf16>, vector<8x8xbf16>, vector<16x8xf32> -> vector<16x8xf32>
    %73 = arith.addf %65, %72 : vector<16x8xf32>
    %c0_60 = arith.constant 0 : index
    %c0_61 = arith.constant 0 : index
    %74 = vector.load %arg4[%c0_60, %c0_61] : memref<1x8xf32, #tpu.memory_space<vmem>>, vector<1x8xf32>
    %75 = vector.broadcast %74 : vector<1x8xf32> to vector<16x8xf32>
    %76 = arith.addf %73, %75 : vector<16x8xf32>
    %c0_62 = arith.constant 0 : index
    %c0_63 = arith.constant 0 : index
    %77 = memref.load %arg5[%c0_62, %c0_63] : memref<1x1xf32, #tpu.memory_space<smem>>
    %cst_64 = arith.constant 0.000000e+00 : f32
    %78 = vector.broadcast %cst_64 : f32 to vector<16x8xf32>
    %79 = arith.cmpf oge, %76, %78 : vector<16x8xf32>
    %80 = vector.broadcast %77 : f32 to vector<16x8xf32>
    %81 = arith.mulf %80, %76 : vector<16x8xf32>
    %82 = arith.select %79, %76, %81 : vector<16x8xi1>, vector<16x8xf32>
    %83 = vector.shape_cast %82 : vector<16x8xf32> to vector<1x4x4x8xf32>
    %84 = arith.truncf %83 : vector<1x4x4x8xf32> to vector<1x4x4x8xbf16>
    %c0_65 = arith.constant 0 : index
    %c0_66 = arith.constant 0 : index
    %c0_67 = arith.constant 0 : index
    %c0_68 = arith.constant 0 : index
    %85 = vector.load %arg6[%c0_65, %c0_66, %c0_67, %c0_68] : memref<1x4x4x8xbf16, #tpu.memory_space<vmem>>, vector<1x4x4x8xbf16>
    tpu.vector_store %arg6[%c0_65, %c0_66, %c0_67, %c0_68], %84 {strides = array<i32>} : memref<1x4x4x8xbf16, #tpu.memory_space<vmem>>, vector<1x4x4x8xbf16>,
    return
  }
  func.func @transform_0(%arg0: i32, %arg1: i32) -> (i32, i32, i32, i32) {
    %c0_i32 = arith.constant 0 : i32
    %c0_i32_0 = arith.constant 0 : i32
    %c0_i32_1 = arith.constant 0 : i32
    %c0_i32_2 = arith.constant 0 : i32
    return %arg0, %c0_i32, %c0_i32_0, %c0_i32_1 : i32, i32, i32, i32
  }
  func.func @transform_1(%arg0: i32, %arg1: i32) -> (i32, i32, i32) {
    %c0_i32 = arith.constant 0 : i32
    %c0_i32_0 = arith.constant 0 : i32
    %c0_i32_1 = arith.constant 0 : i32
    %c0_i32_2 = arith.constant 0 : i32
    return %c0_i32, %c0_i32_0, %c0_i32_1 : i32, i32, i32
  }
  func.func @transform_2(%arg0: i32, %arg1: i32) -> (i32, i32) {
    %c0_i32 = arith.constant 0 : i32
    %c0_i32_0 = arith.constant 0 : i32
    %c0_i32_1 = arith.constant 0 : i32
    return %c0_i32, %c0_i32_0 : i32, i32
  }
  func.func @transform_3(%arg0: i32, %arg1: i32) -> (i32, i32) {
    %c0_i32 = arith.constant 0 : i32
    %c0_i32_0 = arith.constant 0 : i32
    %c0_i32_1 = arith.constant 0 : i32
    return %c0_i32, %c0_i32_0 : i32, i32
  }
  func.func @transform_4(%arg0: i32, %arg1: i32) -> (i32, i32, i32, i32) {
    %c0_i32 = arith.constant 0 : i32
    %c0_i32_0 = arith.constant 0 : i32
    %c0_i32_1 = arith.constant 0 : i32
    return %arg0, %arg1, %c0_i32, %c0_i32_0 : i32, i32, i32, i32
  }
}

</mosaic_0001>

<bundles_post_ra>
// kernel: ds_forward.4
= control target key start
LH: loop header
LB: loop body
LE: loop exit
PB: predicated region body
PF: predicated region fallthrough
CT: control target
= control target key end

     0   :  { %s1376_s17 = smov 0   ;;  %s1378_s18 = smov 0   ;;  %s1594_s0 = inlined_call_operand.vmem [shape: bf16[2,9,9,32], index: 0, kind: input, shape index: {}]   ;;  %s1595_s1 = inlined_call_operand.vmem [shape: bf16[4,32,8], index: 1, kind: input, shape index: {}]   ;;  %s1596_s2 = inlined_call_operand.vmem [shape: f32[1,8], index: 2, kind: input, shape index: {}]   ;;  %s1597_s3 = inlined_call_operand.<no memory space> [shape: f32[1,1], index: 3, kind: input, shape index: {}]   ;;  %s1598_s4 = inlined_call_operand.vmem [shape: bf16[2,8,8,8], index: 4, kind: output, shape index: {}]  }
   0x1   :  { %9 = sst [smem:[#allocation2]] %s1597_s3  ;;  %s1380_s19 = smov 0  }
   0x2 LB: > { %s27_s3 = sadd.s32 1, %s1342_s18  ;;  %p1103_p0 = scmp.ge.s32.totalorder %s1346_s19, 1  ;;  %s1346_s19 = sphi %s1380_s19, %s15_s19   ;;  %s1342_s18 = sphi %s1378_s18, %s1602_s18   ;;  %s1338_s17 = sphi %s1376_s17, %s1601_s17  }
   0x3   : > { %p29_p1 = scmp.ge.s32.totalorder %s27_s3, 2  ;;  %p177_p2 = scmp.lt.s32.totalorder %s1346_s19, 3 }
   0x5   : > { %s1604_s3 = smov (%p29_p1, %s27_s3), 0  ;;  %p178_p3 = pnand %p1103_p0, %p177_p2 }
   0x6   : > { %v1308_v0 = vld [vmem:[%s1595_s1 + $0x20] sm:$0xff] (!%p178_p3)   ;;  %p207_p4 = scmp.lt.s32.totalorder (!%p178_p3), %s1338_s17, 1  ;;  %v1309_v1 = vld [vmem:[%s1595_s1 + $0x28] sm:$0xff] (!%p178_p3)   ;;  %v1311_v2 = vld [vmem:[%s1595_s1 + $0x10] sm:$0xff] (!%p178_p3)   ;;  %vm247_vm0 = vsmask.f32 (!%p178_p3), 3328 }
   0x7   : > { %181 = sbr.rel (%p178_p3) target bundleno = 298 (0x12a), region = 36  ;;  %1235 = vmatprep.subr.bf16.mxu0 (!%p178_p3), %v1308_v0  ;;  %v1313_v3 = vld [vmem:[%s1595_s1 + $0x18] sm:$0xff] (!%p178_p3)   ;;  %1211 = vmatprep.subr.bf16.mxu1 (!%p178_p3), %v1311_v2  ;;  %vm248_vm1 = vsmask.f32 (!%p178_p3), 7440  ;;  %v1412_v4 = vld [vmem:[%s1595_s1] sm:$0xff] (!%p178_p3)   ;;  %vm391_vm2 = vcmask (!%p178_p3), 261120  }
   0x8   : > { %1236 = vmatpush3.bf16.msra.mxu0 (!%p178_p3), %v1308_v0  ;;  %1212 = vmatpush3.bf16.msra.mxu1 (!%p178_p3), %v1311_v2  ;;  %v1317_v5 = vld [vmem:[%s1595_s1 + $0x30] sm:$0xff] (!%p178_p3)   ;;  %vm1454_vm3 = vmor (!%p178_p3), %vm247_vm0, %vm248_vm1  ;;  %v1318_v38 = vld [vmem:[%s1595_s1 + $0x38] sm:$0xff] (!%p178_p3)   ;;  %s969_s14 = sld [smem:[#allocation2]] (!%p178_p3)  ;;  %vm1003_vm6 = vcmask (!%p178_p3), 60416  }
   0x9   : > { %1237 = vmatprep.subr.bf16.mxu0 (!%p178_p3), %v1309_v1  ;;  %1213 = vmatprep.subr.bf16.mxu1 (!%p178_p3), %v1313_v3 }
   0xc   : > { %1238 = vmatpush3.bf16.msra.mxu0 (!%p178_p3), %v1309_v1  ;;  %1214 = vmatpush3.bf16.msra.mxu1 (!%p178_p3), %v1313_v3 }
   0xd   : > { %1247 = vmatprep.subr.bf16.mxu0 (!%p178_p3), %v1317_v5  ;;  %1223 = vmatprep.subr.bf16.mxu1 (!%p178_p3), %v1412_v4 }
   0xe   : > { %s1606_s17 = smov (!%p207_p4, %s1338_s17), 1 }
   0xf   : > { %s1283_s28 = smul.u32 72, %s1606_s17  ;;  %s1186_s20 = sshll.u32 %s1606_s17, 5 }
  0x10   : > { %s1567_s23 = scalar_lea.vmem %s1598_s4, %s1186_s20 }
  0x11   : > { %s1417_s7 = scalar_lea.vmem %s1594_s0, %s1283_s28 }
  0x12   : > { %v1310_v6 = vld [vmem:[%s1417_s7 + $0x8] ss:$8 sps:$4 sm:$0xff]   ;;  %v1312_v7 = vld [vmem:[%s1417_s7 + $0x18] ss:$8 sps:$4 sm:$0xff]   ;;  %v239_v11 = vld [vmem:[%s1417_s7 + $0x4] sm:$0x1] }
  0x13   : > { %1239 = vmatprep.mubr.msk.bf16.mxu0 %vm391_vm2, %v1310_v6  ;;  %v1314_v8 = vld [vmem:[%s1417_s7 + $0x28] ss:$8 sps:$4 sm:$0xff]   ;;  %v1428_v9 = vld [vmem:[%s1417_s7] sm:$0xf]  ;;  %v240_v12 = vld [vmem:[%s1417_s7 + $0xc] sm:$0x1] }
  0x14   : > { %1240 = vmatmul.mubr.msk.bf16.vlgmr.msra.gmra.mrb[0].mxu0 %vm391_vm2, %v1312_v7  ;;  %v1431_v10 = vld [vmem:[%s1417_s7 + $0x8] sm:$0xf]  ;;  %v251_v13 = vshrl.u32 %v1428_v9, 16  ;;  %v254_v14 = vshll.u32 %v1428_v9, 16  ;;  %v260_v15 = vshll.u32 %v239_v11, 16  ;;  %v274_v18 = vshll.u32 %v240_v12, 16 }
  0x15   : > { %1243 = vmatprep.mubr.msk.bf16.mxu0 %vm391_vm2, %v1314_v8  ;;  %v265_v16 = vshrl.u32 %v1431_v10, 16  ;;  %1248 = vmatpush3.bf16.msra.mxu0 %v1317_v5  ;;  %v268_v17 = vshll.u32 %v1431_v10, 16  ;;  %v1316_v23 = vld [vmem:[%s1417_s7 + $0x38] ss:$8 sps:$4 sm:$0xff]   ;;  %v1443_v26 = vld [vmem:[%s1417_s7 + $0x10] sm:$0xf] }
  0x16   : > { %v253_v19 = vrot.slane %v251_v13, 4  ;;  %v256_v20 = vrot.slane %v254_v14, 5  ;;  %v262_v21 = vrot.slane %v260_v15, 5  ;;  %v276_v25 = vrot.slane %v274_v18, 5  ;;  %v1446_v27 = vld [vmem:[%s1417_s7 + $0x18] sm:$0xf]  ;;  %1249 = vmatprep.subr.bf16.mxu0 %v1318_v38 }
  0x17   : > { %v267_v22 = vrot.slane %v265_v16, 4  ;;  %v270_v24 = vrot.slane %v268_v17, 5  ;;  %v241_v29 = vld [vmem:[%s1417_s7 + $0x14] sm:$0x1]  ;;  %v242_v30 = vld [vmem:[%s1417_s7 + $0x1c] sm:$0x1] }
  0x18   : > { %v257_v28 = vor.u32 %v256_v20, %v253_v19  ;;  %v279_v31 = vshrl.u32 %v1443_v26, 16  ;;  %v282_v32 = vshll.u32 %v1443_v26, 16  ;;  %v288_v35 = vshll.u32 %v241_v29, 16  ;;  %v1153_v47 = vld [vmem:[%s1417_s7 + $0x8] sm:$0xf] }
  0x19   : > { %v271_v34 = vor.u32 %v270_v24, %v267_v22  ;;  %v293_v36 = vshrl.u32 %v1446_v27, 16  ;;  %v296_v37 = vshll.u32 %v1446_v27, 16  ;;  %v302_v42 = vshll.u32 %v242_v30, 16  ;;  %1250 = vmatpush3.bf16.msra.mxu0 %v1318_v38  ;;  %v1154_v51 = vld [vmem:[%s1417_s7 + $0xc] sm:$0x1] }
  0x1a   : > { %v258_v39 = vrot.slane %v257_v28, 4  ;;  %v281_v40 = vrot.slane %v279_v31, 4  ;;  %v284_v41 = vrot.slane %v282_v32, 5  ;;  %v290_v44 = vrot.slane %v288_v35, 5  ;;  %v1155_v52 = vld [vmem:[%s1417_s7 + $0x10] sm:$0xf] }
  0x1b   : > { %v272_v43 = vrot.slane %v271_v34, 4  ;;  %v295_v45 = vrot.slane %v293_v36, 4  ;;  %v298_v46 = vrot.slane %v296_v37, 5  ;;  %v304_v50 = vrot.slane %v302_v42, 5  ;;  %v1156_v56 = vld [vmem:[%s1417_s7 + $0x14] sm:$0x1] }
  0x1c   : > { %1244 = vmatmul.mubr.msk.bf16.gmra.mrb[4].mxu0 %vm391_vm2, %v1316_v23  ;;  %v263_v48 = vsel %vm1454_vm3, %v258_v39, %v262_v21  ;;  %v285_v49 = vor.u32 %v284_v41, %v281_v40  ;;  %v729_v53 = vshrl.u32 %v1153_v47, 16  ;;  %v732_v57 = vshll.u32 %v1153_v47, 16  ;;  %v1473_v59 = vld [vmem:[%s1417_s7 + $0x20] sm:$0xf]  ;;  %v1476_v0 = vld [vmem:[%s1417_s7 + $0x28] sm:$0xf] }
  0x1d   : > { %v277_v54 = vsel %vm1454_vm3, %v272_v43, %v276_v25  ;;  %v299_v55 = vor.u32 %v298_v46, %v295_v45  ;;  %v738_v58 = vshll.u32 %v1154_v51, 16  ;;  %v743_v63 = vshrl.u32 %v1155_v52, 16  ;;  %v243_v6 = vld [vmem:[%s1417_s7 + $0x24] sm:$0x1]  ;;  %v244_v12 = vld [vmem:[%s1417_s7 + $0x2c] sm:$0x1] }
  0x1e   : > { %v1111_v60 = vcombine.low %v263_v48, %v277_v54  ;;  %v286_v61 = vrot.slane %v285_v49, 4  ;;  %v731_v62 = vrot.slane %v729_v53, 4  ;;  %v734_v2 = vrot.slane %v732_v57, 5  ;;  %v1319_v22 = vld [vmem:[%s1595_s1 + $0x8] sm:$0xff]   ;;  %v1157_v23 = vld [vmem:[%s1417_s7 + $0x18] sm:$0xf] }
  0x1f   : > { %v300_v1 = vrot.slane %v299_v55, 4  ;;  %v740_v3 = vrot.slane %v738_v58, 5  ;;  %v746_v5 = vshll.u32 %v1155_v52, 16  ;;  %v745_v8 = vrot.slane %v743_v63, 4  ;;  %v1158_v30 = vld [vmem:[%s1417_s7 + $0x1c] sm:$0x1] }
  0x20   : > { %1215 = vmatprep.mubr.msk.bf16.mxu1 %vm391_vm2, %v1111_v60  ;;  %v291_v7 = vsel %vm1454_vm3, %v286_v61, %v290_v44  ;;  %v752_v11 = vshll.u32 %v1156_v56, 16  ;;  %v307_v13 = vshrl.u32 %v1473_v59, 16  ;;  %v735_v15 = vor.u32 %v734_v2, %v731_v62  ;;  %v1159_v35 = vld [vmem:[%s1417_s7 + $0x20] sm:$0xf]  ;;  %v1160_v43 = vld [vmem:[%s1417_s7 + $0x24] sm:$0x1] }
  0x21   : > { %v305_v14 = vsel %vm1454_vm3, %v300_v1, %v304_v50  ;;  %v748_v16 = vrot.slane %v746_v5, 5  ;;  %v310_v17 = vshll.u32 %v1473_v59, 16  ;;  %v316_v21 = vshll.u32 %v243_v6, 16  ;;  %v1503_v49 = vld [vmem:[%s1417_s7 + $0x30] sm:$0xf] }
  0x22   : > { %v1112_v18 = vcombine.low %v291_v7, %v305_v14  ;;  %v754_v19 = vrot.slane %v752_v11, 5  ;;  %v309_v20 = vrot.slane %v307_v13, 4  ;;  %v736_v24 = vrot.slane %v735_v15, 4  ;;  %v1506_v54 = vld [vmem:[%s1417_s7 + $0x38] sm:$0xf] }
  0x23   : > { %v749_v25 = vor.u32 %v748_v16, %v745_v8  ;;  %v312_v28 = vrot.slane %v310_v17, 5  ;;  %v321_v29 = vshrl.u32 %v1476_v0, 16  ;;  %v318_v31 = vrot.slane %v316_v21, 5  ;;  %v245_v55 = vld [vmem:[%s1417_s7 + $0x34] sm:$0x1] }
  0x24   : > { %1216 = vmatmul.mubr.msk.bf16.vlgmr.msra.gmra.mrb[0].mxu1 %vm391_vm2, %v1112_v18  ;;  %v324_v32 = vshll.u32 %v1476_v0, 16  ;;  %v330_v34 = vshll.u32 %v244_v12, 16  ;;  %v757_v36 = vshrl.u32 %v1157_v23, 16  ;;  %v741_v37 = vsel %vm1454_vm3, %v736_v24, %v740_v3  ;;  %v246_v3 = vld [vmem:[%s1417_s7 + $0x3c] sm:$0x1] }
  0x25   : > { %1224 = vmatpush3.bf16.msra.mxu1 %v1412_v4  ;;  %v750_v38 = vrot.slane %v749_v25, 4  ;;  %v313_v39 = vor.u32 %v312_v28, %v309_v20  ;;  %v323_v40 = vrot.slane %v321_v29, 4  ;;  %v760_v45 = vshll.u32 %v1157_v23, 16  ;;  %v1161_v14 = vld [vmem:[%s1417_s7 + $0x28] sm:$0xf] }
  0x26   : > { %v326_v41 = vrot.slane %v324_v32, 5  ;;  %v332_v42 = vrot.slane %v330_v34, 5  ;;  %1225 = vmatprep.subr.bf16.mxu1 %v1319_v22  ;;  %v759_v44 = vrot.slane %v757_v36, 4  ;;  %v766_v48 = vshll.u32 %v1158_v30, 16  ;;  %v1162_v15 = vld [vmem:[%s1417_s7 + $0x2c] sm:$0x1] }
  0x27   : > { %v755_v46 = vsel %vm1454_vm3, %v750_v38, %v754_v19  ;;  %v314_v47 = vrot.slane %v313_v39, 4  ;;  %v771_v4 = vshrl.u32 %v1159_v35, 16  ;;  %v762_v52 = vrot.slane %v760_v45, 5  ;;  %v1163_v19 = vld [vmem:[%s1417_s7 + $0x30] sm:$0xf] }
  0x28   : > { %v1173_v50 = vcombine.low %v741_v37, %v755_v46  ;;  %v327_v51 = vor.u32 %v326_v41, %v323_v40  ;;  %v774_v53 = vshll.u32 %v1159_v35, 16  ;;  %v768_v57 = vrot.slane %v766_v48, 5  ;;  %v1164_v28 = vld [vmem:[%s1417_s7 + $0x34] sm:$0x1]  ;;  %v1165_v35 = vld [vmem:[%s1417_s7 + $0x38] sm:$0xf] }
  0x29   : > { %v319_v56 = vsel %vm1454_vm3, %v314_v47, %v318_v31  ;;  %v773_v58 = vrot.slane %v771_v4, 4  ;;  %v780_v60 = vshll.u32 %v1160_v43, 16  ;;  %1226 = vmatpush3.bf16.msra.mxu1 %v1319_v22  ;;  %v763_v62 = vor.u32 %v762_v52, %v759_v44  ;;  %v1166_v40 = vld [vmem:[%s1417_s7 + $0x3c] sm:$0x1]  ;;  %v1167_v45 = vld [vmem:[%s1417_s7 + $0x40] sm:$0xf] }
  0x2a   : > { %1251 = vmatprep.mubr.msk.bf16.mxu0 %vm391_vm2, %v1173_v50  ;;  %v328_v61 = vrot.slane %v327_v51, 4  ;;  %v776_v63 = vrot.slane %v774_v53, 5  ;;  %v335_v1 = vshrl.u32 %v1503_v49, 16  ;;  %v338_v5 = vshll.u32 %v1503_v49, 16 }
  0x2b   : > { %v782_v2 = vrot.slane %v780_v60, 5  ;;  %v344_v6 = vshll.u32 %v245_v55, 16  ;;  %v349_v7 = vshrl.u32 %v1506_v54, 16  ;;  %v764_v11 = vrot.slane %v763_v62, 4 }
  0x2c   : > { %v333_v8 = vsel %vm1454_vm3, %v328_v61, %v332_v42  ;;  %v777_v12 = vor.u32 %v776_v63, %v773_v58  ;;  %v337_v13 = vrot.slane %v335_v1, 4  ;;  %v340_v17 = vrot.slane %v338_v5, 5 }
  0x2d   : > { %v1113_v16 = vcombine.low %v319_v56, %v333_v8  ;;  %v351_v18 = vrot.slane %v349_v7, 4  ;;  %v1121_v20 = vcombine.low %v1428_v9, %v1431_v10  ;;  %v769_v21 = vsel %vm1454_vm3, %v764_v11, %v768_v57  ;;  %v1168_v56 = vld [vmem:[%s1417_s7 + $0x44] sm:$0x1] }
  0x2e   : > { %v778_v22 = vrot.slane %v777_v12, 4  ;;  %v352_v23 = vshll.u32 %v1506_v54, 16  ;;  %v358_v24 = vshll.u32 %v246_v3, 16  ;;  %v341_v25 = vor.u32 %v340_v17, %v337_v13 }
  0x2f   : > { %1219 = vmatprep.mubr.msk.bf16.mxu1 %vm391_vm2, %v1113_v16  ;;  %v785_v29 = vshrl.u32 %v1161_v14, 16  ;;  %v788_v30 = vshll.u32 %v1161_v14, 16  ;;  %v794_v31 = vshll.u32 %v1162_v15, 16  ;;  %v346_v9 = vrot.slane %v344_v6, 5 }
  0x30   : > { %v783_v32 = vsel %vm1454_vm3, %v778_v22, %v782_v2  ;;  %v354_v10 = vrot.slane %v352_v23, 5  ;;  %v799_v34 = vshrl.u32 %v1163_v19, 16  ;;  %v342_v37 = vrot.slane %v341_v25, 4 }
  0x31   : > { %v1174_v36 = vcombine.low %v769_v21, %v783_v32  ;;  %v787_v38 = vrot.slane %v785_v29, 4  ;;  %v790_v39 = vrot.slane %v788_v30, 5  ;;  %v360_v42 = vrot.slane %v358_v24, 5 }
  0x32   : > { %v355_v41 = vor.u32 %v354_v10, %v351_v18  ;;  %v801_v43 = vrot.slane %v799_v34, 4  ;;  %v802_v44 = vshll.u32 %v1163_v19, 16  ;;  %v796_v47 = vrot.slane %v794_v31, 5 }
  0x33   : > { %1252 = vmatmul.mubr.msk.bf16.vlgmr.msra.gmra.mrb[0].mxu0 %vm391_vm2, %v1174_v36  ;;  %v791_v46 = vor.u32 %v790_v39, %v787_v38  ;;  %v808_v48 = vshll.u32 %v1164_v28, 16  ;;  %v813_v4 = vshrl.u32 %v1165_v35, 16  ;;  %v347_v50 = vsel %vm1454_vm3, %v342_v37, %v346_v9 }
  0x34   : > { %v356_v51 = vrot.slane %v355_v41, 4  ;;  %v804_v52 = vrot.slane %v802_v44, 5  ;;  %v816_v53 = vshll.u32 %v1165_v35, 16  ;;  %v822_v58 = vshll.u32 %v1166_v40, 16 }
  0x35   : > { %v792_v55 = vrot.slane %v791_v46, 4  ;;  %v815_v57 = vrot.slane %v813_v4, 4  ;;  %v827_v60 = vshrl.u32 %v1167_v45, 16  ;;  %v810_v63 = vrot.slane %v808_v48, 5 }
  0x36   : > { %v361_v61 = vsel %vm1454_vm3, %v356_v51, %v360_v42  ;;  %v805_v62 = vor.u32 %v804_v52, %v801_v43  ;;  %v818_v1 = vrot.slane %v816_v53, 5  ;;  %v830_v5 = vshll.u32 %v1167_v45, 16 }
  0x37   : > { %v1114_v2 = vcombine.low %v347_v50, %v361_v61  ;;  %v829_v3 = vrot.slane %v827_v60, 4  ;;  %v797_v6 = vsel %vm1454_vm3, %v792_v55, %v796_v47  ;;  %v836_v11 = vshll.u32 %v1168_v56, 16 }
  0x38   : > { %v806_v7 = vrot.slane %v805_v62, 4  ;;  %v819_v8 = vor.u32 %v818_v1, %v815_v57  ;;  %v824_v12 = vrot.slane %v822_v58, 5  ;;  %v832_v13 = vrot.slane %v830_v5, 5 }
  0x39   : > { %1220 = vmatmul.mubr.msk.bf16.gmra.mrb[4].mxu1 %vm391_vm2, %v1114_v2  ;;  %v838_v18 = vrot.slane %v836_v11, 5  ;;  %v1122_v22 = vcombine.low %v1443_v26, %v1446_v27  ;;  %v1123_v23 = vcombine.low %v1473_v59, %v1476_v0  ;;  %v1124_v25 = vcombine.low %v1503_v49, %v1506_v54  ;;  %v1183_v0 = vld [vmem:[%s1596_s2] ss:$0 sm:$0xff] }
  0x3a   : > { %v811_v14 = vsel %vm1454_vm3, %v806_v7, %v810_v63  ;;  %1227 = vmatprep.mubr.msk.bf16.mxu1 %vm391_vm2, %v1121_v20  ;;  %v820_v15 = vrot.slane %v819_v8, 4  ;;  %v833_v17 = vor.u32 %v832_v13, %v829_v3  ;;  %v978_v32 = vstv %s969_s14 }
  0x3b   : > { %v1175_v16 = vcombine.low %v797_v6, %v811_v14 }
  0x3c   : > { %v825_v19 = vsel %vm1454_vm3, %v820_v15, %v824_v12  ;;  %v834_v21 = vrot.slane %v833_v17, 4 }
  0x3d   : > { %1255 = vmatprep.mubr.msk.bf16.mxu0 %vm391_vm2, %v1175_v16 }
  0x3e   : > { %v839_v24 = vsel %vm1454_vm3, %v834_v21, %v838_v18 }
  0x3f   : > { %v1176_v20 = vcombine.low %v825_v19, %v839_v24 }
  0x41   : > { %1228 = vmatmul.mubr.msk.bf16.vlgmr.msra.gmra.mrb[0].mxu1 %vm391_vm2, %v1122_v22  ;;  %1256 = vmatmul.mubr.msk.bf16.gmra.mrb[4].mxu0 %vm391_vm2, %v1176_v20 }
  0x42   : > { %1231 = vmatprep.mubr.msk.bf16.mxu1 %vm391_vm2, %v1123_v23 }
  0x49   : > { %1232 = vmatmul.mubr.msk.bf16.gmra.mrb[4].mxu1 %vm391_vm2, %v1124_v25 }
 0x106   : > { %v1253_v28 = vpop.f32.mrb[0].mxu0 }
 0x107   : > { %v915_v26 = vpop.f32.mrb[1].mxu0 }
 0x108   : > { %v1254_v27 = vpop.f32.mrb[2].mxu0 }
 0x109   : > { %v918_v59 = vpop.f32.mrb[3].mxu0 }
 0x114   : > { %v1229_v33 = vpop.f32.mrb[0].mxu1  ;;  %v1257_v29 = vpop.f32.mrb[4].mxu0 }
 0x115   : > { %v1259_v30 = vadd.f32 %v1253_v28, %v1229_v33  ;;  %v547_v31 = vpop.f32.mrb[1].mxu1  ;;  %v931_v9 = vpop.f32.mrb[5].mxu0 }
 0x116   : > { %v1260_v10 = vadd.f32 %v915_v26, %v547_v31  ;;  %v1230_v49 = vpop.f32.mrb[2].mxu1  ;;  %v1258_v34 = vpop.f32.mrb[6].mxu0 }
 0x117   : > { %v963_v54 = vadd.f32 %v1259_v30, %v1183_v0  ;;  %v1261_v35 = vadd.f32 %v1254_v27, %v1230_v49  ;;  %v550_v36 = vpop.f32.mrb[3].mxu1  ;;  %v934_v38 = vpop.f32.mrb[7].mxu0 }
 0x118   : > { %v961_v37 = vadd.f32 %v1260_v10, %v1183_v0  ;;  %v1262_v39 = vadd.f32 %v918_v59, %v550_v36 }
 0x119   : > { %vm972_vm4 = vcmp.ge.f32.partialorder %v963_v54, 0.0  ;;  %v981_v40 = vmul.f32 %v978_v32, %v963_v54  ;;  %v964_v41 = vadd.f32 %v1261_v35, %v1183_v0 }
 0x11a   : > { %vm970_vm5 = vcmp.ge.f32.partialorder %v961_v37, 0.0  ;;  %v979_v42 = vmul.f32 %v978_v32, %v961_v37  ;;  %v962_v43 = vadd.f32 %v1262_v39, %v1183_v0 }
 0x11b   : > { %v989_v44 = vsel %vm972_vm4, %v963_v54, %v981_v40  ;;  %vm973_vm7 = vcmp.ge.f32.partialorder %v964_v41, 0.0  ;;  %v982_v45 = vmul.f32 %v978_v32, %v964_v41 }
 0x11c   : > { %v997_v46 = vpack.c.bf16 %v989_v44, %v989_v44  ;;  %v987_v47 = vsel %vm970_vm5, %v961_v37, %v979_v42  ;;  %vm971_vm8 = vcmp.ge.f32.partialorder %v962_v43, 0.0  ;;  %v980_v48 = vmul.f32 %v978_v32, %v962_v43  ;;  %v1233_v4 = vpop.f32.mrb[4].mxu1 }
 0x11d   : > { %v995_v50 = vpack.c.bf16 %v987_v47, %v987_v47  ;;  %v990_v51 = vsel %vm973_vm7, %v964_v41, %v982_v45  ;;  %v1263_v52 = vadd.f32 %v1257_v29, %v1233_v4  ;;  %v563_v53 = vpop.f32.mrb[5].mxu1 }
 0x11e   : > { %1006 = vst.msk [vmem:[%s1567_s23 + $0x8] sm:$0xf] %vm1003_vm6, %v997_v46  ;;  %v998_v55 = vpack.c.bf16 %v990_v51, %v990_v51  ;;  %v988_v56 = vsel %vm971_vm8, %v962_v43, %v980_v48  ;;  %v1264_v57 = vadd.f32 %v931_v9, %v563_v53  ;;  %v1234_v58 = vpop.f32.mrb[6].mxu1 }
 0x11f   : > { %1004 = vst.msk [vmem:[%s1567_s23] sm:$0xf] %vm1003_vm6, %v995_v50  ;;  %v996_v60 = vpack.c.bf16 %v988_v56, %v988_v56  ;;  %v967_v61 = vadd.f32 %v1263_v52, %v1183_v0  ;;  %v1265_v62 = vadd.f32 %v1258_v34, %v1234_v58  ;;  %v566_v63 = vpop.f32.mrb[7].mxu1 }
 0x120   : > { %1007 = vst.msk [vmem:[%s1567_s23 + $0xc] sm:$0xf] %vm1003_vm6, %v998_v55  ;;  %v965_v1 = vadd.f32 %v1264_v57, %v1183_v0  ;;  %v1266_v2 = vadd.f32 %v934_v38, %v566_v63 }
 0x121   : > { %1005 = vst.msk [vmem:[%s1567_s23 + $0x4] sm:$0xf] %vm1003_vm6, %v996_v60  ;;  %vm976_vm9 = vcmp.ge.f32.partialorder %v967_v61, 0.0  ;;  %v985_v3 = vmul.f32 %v978_v32, %v967_v61  ;;  %v968_v5 = vadd.f32 %v1265_v62, %v1183_v0 }
 0x122   : > { %vm974_vm10 = vcmp.ge.f32.partialorder %v965_v1, 0.0  ;;  %v983_v6 = vmul.f32 %v978_v32, %v965_v1  ;;  %v966_v7 = vadd.f32 %v1266_v2, %v1183_v0 }
 0x123   : > { %v993_v8 = vsel %vm976_vm9, %v967_v61, %v985_v3  ;;  %vm977_vm11 = vcmp.ge.f32.partialorder %v968_v5, 0.0  ;;  %v986_v11 = vmul.f32 %v978_v32, %v968_v5 }
 0x124   : > { %v1001_v12 = vpack.c.bf16 %v993_v8, %v993_v8  ;;  %v991_v13 = vsel %vm974_vm10, %v965_v1, %v983_v6  ;;  %vm975_vm12 = vcmp.ge.f32.partialorder %v966_v7, 0.0  ;;  %v984_v14 = vmul.f32 %v978_v32, %v966_v7 }
 0x125   : > { %v999_v15 = vpack.c.bf16 %v991_v13, %v991_v13  ;;  %v994_v16 = vsel %vm977_vm11, %v968_v5, %v986_v11 }
 0x126   : > { %1010 = vst.msk [vmem:[%s1567_s23 + $0x18] sm:$0xf] %vm1003_vm6, %v1001_v12  ;;  %v1002_v17 = vpack.c.bf16 %v994_v16, %v994_v16  ;;  %v992_v18 = vsel %vm975_vm12, %v966_v7, %v984_v14 }
 0x127   : > { %1008 = vst.msk [vmem:[%s1567_s23 + $0x10] sm:$0xf] %vm1003_vm6, %v999_v15  ;;  %v1000_v19 = vpack.c.bf16 %v992_v18, %v992_v18 }
 0x128   : > { %1011 = vst.msk [vmem:[%s1567_s23 + $0x1c] sm:$0xf] %vm1003_vm6, %v1002_v17 }
 0x129   : > { %1009 = vst.msk [vmem:[%s1567_s23 + $0x14] sm:$0xf] %vm1003_vm6, %v1000_v19 }
 0x12a PF: > { %s15_s19 = sadd.s32 1, %s1346_s19   ;;  %s1601_s17 = smov %s1342_s18 }
 0x12b   : > { %p12_p5 = scmp.ge.s32.totalorder %s15_s19, 4   ;;  %s1602_s18 = smov %s1604_s3 }
 0x12d   :  { %14 = sbr.rel (!%p12_p5) target bundleno = 2 (0x2), region = 71 }

// kernel: ds_forward.5
= control target key start
LH: loop header
LB: loop body
LE: loop exit
PB: predicated region body
PF: predicated region fallthrough
CT: control target
= control target key end

     0   :  { %s2365_s17 = smov 0   ;;  %s2367_s18 = smov 0   ;;  %s2912_s0 = inlined_call_operand.vmem [shape: bf16[2,10,10,8], index: 0, kind: input, shape index: {}]   ;;  %s2913_s1 = inlined_call_operand.vmem [shape: bf16[9,8,8], index: 1, kind: input, shape index: {}]   ;;  %s2914_s2 = inlined_call_operand.vmem [shape: f32[1,8], index: 2, kind: input, shape index: {}]   ;;  %s2915_s3 = inlined_call_operand.<no memory space> [shape: f32[1,1], index: 3, kind: input, shape index: {}]   ;;  %s2916_s4 = inlined_call_operand.vmem [shape: bf16[2,8,8,8], index: 4, kind: output, shape index: {}]  }
   0x1   :  { %9 = sst [smem:[#allocation2]] %s2915_s3  ;;  %s2369_s19 = smov 0  }
   0x2 LB: > { %s27_s3 = sadd.s32 1, %s2331_s18  ;;  %p1889_p0 = scmp.ge.s32.totalorder %s2335_s19, 1  ;;  %s2335_s19 = sphi %s2369_s19, %s15_s19   ;;  %s2331_s18 = sphi %s2367_s18, %s2922_s18   ;;  %s2327_s17 = sphi %s2365_s17, %s2921_s17  }
   0x3   : > { %p29_p1 = scmp.ge.s32.totalorder %s27_s3, 2  ;;  %p177_p2 = scmp.lt.s32.totalorder %s2335_s19, 3 }
   0x5   : > { %s2924_s3 = smov (%p29_p1, %s27_s3), 0  ;;  %p178_p3 = pnand %p1889_p0, %p177_p2 }
   0x6   : > { %v1893_v0 = vld [vmem:[%s2913_s1 + $0x4] sm:$0xf] (!%p178_p3)  ;;  %vm386_vm0 = vcmask (!%p178_p3), 1043456   ;;  %v2389_v1 = vld [vmem:[%s2913_s1 + $0x10] sm:$0xf] (!%p178_p3)  ;;  %p207_p4 = scmp.lt.s32.totalorder (!%p178_p3), %s2327_s17, 1 }
   0x7   : > { %181 = sbr.rel (%p178_p3) target bundleno = 340 (0x154), region = 36  ;;  %2266 = vmatprep.subr.msk.bf16.mxu1 (!%p178_p3), %vm386_vm0, %v1893_v0  ;;  %2270 = vmatprep.subr.msk.bf16.mxu0 (!%p178_p3), %vm386_vm0, %v2389_v1  ;;  %v388_v2 = vsel (!%p178_p3), %vm386_vm0, %v1893_v0, 0  ;;  %v2397_v3 = vsel (!%p178_p3), %vm386_vm0, %v2389_v1, 0  ;;  %v235_v4 = vld [vmem:[%s2913_s1] sm:$0xf] (!%p178_p3)  ;;  %vm373_vm3 = vcmask (!%p178_p3), 64512  }
   0x8   : > { %2111 = vmatpush3.bf16.msra.mxu1 (!%p178_p3), %v388_v2  ;;  %2151 = vmatpush3.bf16.msra.mxu0 (!%p178_p3), %v2397_v3  ;;  %v1985_v5 = vld [vmem:[%s2913_s1 + $0x14] sm:$0xf] (!%p178_p3)  ;;  %vm244_vm1 = vsmask.f32 (!%p178_p3), 3328  ;;  %vm245_vm2 = vsmask.f32 (!%p178_p3), 7440 }
   0x9   : > { %2267 = vmatprep.subr.msk.bf16.mxu1 (!%p178_p3), %vm386_vm0, %v235_v4  ;;  %2272 = vmatprep.subr.msk.bf16.mxu0 (!%p178_p3), %vm386_vm0, %v1985_v5  ;;  %v2436_v17 = vsel (!%p178_p3), %vm386_vm0, %v235_v4, 0  ;;  %v2449_v31 = vld [vmem:[%s2913_s1 + $0x18] sm:$0xf] (!%p178_p3)  ;;  %vm2453_vm4 = vmor (!%p178_p3), %vm244_vm1, %vm245_vm2  ;;  %v2465_v42 = vsel (!%p178_p3), %vm386_vm0, %v1985_v5, 0  ;;  %vm579_vm5 = vcmask (!%p178_p3), 1042432   ;;  %vm580_vm6 = vcmask (!%p178_p3), 1046532  }
   0xa   : > { %v2472_v47 = vsel (!%p178_p3), %vm386_vm0, %v2449_v31, 0  ;;  %vm2564_vm7 = vmor (!%p178_p3), %vm579_vm5, %vm580_vm6  ;;  %s1751_s16 = sld [smem:[#allocation2]] (!%p178_p3)  ;;  %vm1785_vm10 = vcmask (!%p178_p3), 60416  }
   0xe   : > { %s2926_s17 = smov (!%p207_p4, %s2327_s17), 1 }
   0xf   : > { %s2276_s28 = smul.u32 80, %s2926_s17  ;;  %s2064_s22 = sshll.u32 %s2926_s17, 5 }
  0x10   : > { %s2885_s25 = scalar_lea.vmem %s2916_s4, %s2064_s22 }
  0x11   : > { %s2414_s5 = scalar_lea.vmem %s2912_s0, %s2276_s28 }
  0x12   : > { %v2417_v6 = vld [vmem:[%s2414_s5] sm:$0xf]  ;;  %v2420_v7 = vld [vmem:[%s2414_s5 + $0x8] sm:$0xf]  ;;  %v2423_v8 = vld [vmem:[%s2414_s5 + $0x4] sm:$0x1] }
  0x13   : > { %v2426_v9 = vld [vmem:[%s2414_s5 + $0xc] sm:$0x1]  ;;  %v248_v10 = vshrl.u32 %v2417_v6, 16  ;;  %v251_v11 = vshll.u32 %v2417_v6, 16  ;;  %v257_v12 = vshll.u32 %v2423_v8, 16  ;;  %v262_v13 = vshrl.u32 %v2420_v7, 16 }
  0x14   : > { %v265_v14 = vshll.u32 %v2420_v7, 16  ;;  %v271_v15 = vshll.u32 %v2426_v9, 16  ;;  %v1944_v16 = vld [vmem:[%s2414_s5 + $0x8] sm:$0xf]  ;;  %v2439_v22 = vld [vmem:[%s2414_s5 + $0xc] sm:$0x1] }
  0x15   : > { %v250_v18 = vrot.slane %v248_v10, 4  ;;  %v253_v19 = vrot.slane %v251_v11, 5  ;;  %v259_v20 = vrot.slane %v257_v12, 5  ;;  %v264_v21 = vrot.slane %v262_v13, 4  ;;  %v1946_v25 = vld [vmem:[%s2414_s5 + $0x10] sm:$0xf] }
  0x16   : > { %v267_v23 = vrot.slane %v265_v14, 5  ;;  %v273_v24 = vrot.slane %v271_v15, 5  ;;  %v2443_v26 = vld [vmem:[%s2414_s5 + $0x14] sm:$0x1]  ;;  %v855_v28 = vshrl.u32 %v1944_v16, 16  ;;  %v858_v29 = vshll.u32 %v1944_v16, 16 }
  0x17   : > { %v254_v27 = vor.u32 %v253_v19, %v250_v18  ;;  %v864_v30 = vshll.u32 %v2439_v22, 16  ;;  %v869_v34 = vshrl.u32 %v1946_v25, 16  ;;  %v872_v35 = vshll.u32 %v1946_v25, 16  ;;  %v2459_v37 = vld [vmem:[%s2414_s5 + $0x10] sm:$0xf] }
  0x18   : > { %v268_v33 = vor.u32 %v267_v23, %v264_v21  ;;  %v878_v36 = vshll.u32 %v2443_v26, 16  ;;  %v857_v39 = vrot.slane %v855_v28, 4  ;;  %v860_v40 = vrot.slane %v858_v29, 5  ;;  %v2462_v41 = vld [vmem:[%s2414_s5 + $0x18] sm:$0xf] }
  0x19   : > { %v255_v38 = vrot.slane %v254_v27, 4  ;;  %v871_v44 = vrot.slane %v869_v34, 4  ;;  %v874_v45 = vrot.slane %v872_v35, 5  ;;  %v2468_v46 = vld [vmem:[%s2414_s5 + $0x14] sm:$0x1]  ;;  %v866_v50 = vrot.slane %v864_v30, 5 }
  0x1a   : > { %v269_v43 = vrot.slane %v268_v33, 4  ;;  %v861_v49 = vor.u32 %v860_v40, %v857_v39  ;;  %v880_v51 = vrot.slane %v878_v36, 5  ;;  %v2479_v54 = vld [vmem:[%s2414_s5 + $0x1c] sm:$0x1]  ;;  %v276_v55 = vshrl.u32 %v2459_v37, 16 }
  0x1b   : > { %v260_v48 = vsel %vm2453_vm4, %v255_v38, %v259_v20  ;;  %v875_v53 = vor.u32 %v874_v45, %v871_v44  ;;  %v279_v56 = vshll.u32 %v2459_v37, 16  ;;  %v285_v59 = vshll.u32 %v2468_v46, 16  ;;  %v1948_v2 = vld [vmem:[%s2414_s5 + $0x18] sm:$0xf]  ;;  %v2493_v12 = vld [vmem:[%s2414_s5 + $0x1c] sm:$0x1] }
  0x1c   : > { %v274_v52 = vsel %vm2453_vm4, %v269_v43, %v273_v24  ;;  %v862_v58 = vrot.slane %v861_v49, 4  ;;  %v290_v60 = vshrl.u32 %v2462_v41, 16  ;;  %v278_v62 = vrot.slane %v276_v55, 4  ;;  %v1950_v18 = vld [vmem:[%s2414_s5 + $0x20] sm:$0xf] }
  0x1d   : > { %v1894_v57 = vcombine.low %v260_v48, %v274_v52  ;;  %v876_v61 = vrot.slane %v875_v53, 4  ;;  %v281_v63 = vrot.slane %v279_v56, 5  ;;  %v293_v0 = vshll.u32 %v2462_v41, 16  ;;  %v2499_v19 = vld [vmem:[%s2414_s5 + $0x24] sm:$0x1] }
  0x1e   : > { %v867_v4 = vsel %vm2453_vm4, %v862_v58, %v866_v50  ;;  %v1094_v5 = vrot.slane %v2439_v22, 5  ;;  %v292_v10 = vrot.slane %v290_v60, 4  ;;  %v299_v11 = vshll.u32 %v2479_v54, 16  ;;  %v2506_v36 = vld [vmem:[%s2414_s5 + $0x20] sm:$0xf] }
  0x1f   : > { %2112 = vmatprep.mubr.msk.bf16.mxu1 %vm373_vm3, %v1894_v57  ;;  %v881_v13 = vsel %vm2453_vm4, %v876_v61, %v880_v51  ;;  %v282_v14 = vor.u32 %v281_v63, %v278_v62  ;;  %v287_v15 = vrot.slane %v285_v59, 5  ;;  %v295_v16 = vrot.slane %v293_v0, 5  ;;  %v2511_v44 = vld [vmem:[%s2414_s5 + $0x24] sm:$0x1]  ;;  %v2515_v51 = vld [vmem:[%s2414_s5 + $0x28] sm:$0xf] }
  0x20   : > { %v1961_v20 = vcombine.low %v867_v4, %v881_v13  ;;  %v1098_v21 = vrot.slane %v2443_v26, 5  ;;  %v301_v23 = vrot.slane %v299_v11, 5  ;;  %v883_v24 = vshrl.u32 %v1948_v2, 16  ;;  %v2521_v56 = vld [vmem:[%s2414_s5 + $0x2c] sm:$0x1] }
  0x21   : > { %v283_v25 = vrot.slane %v282_v14, 4  ;;  %v296_v27 = vor.u32 %v295_v16, %v292_v10  ;;  %v886_v28 = vshll.u32 %v1948_v2, 16  ;;  %v892_v29 = vshll.u32 %v2493_v12, 16  ;;  %v2527_v62 = vld [vmem:[%s2414_s5 + $0x30] sm:$0xf] }
  0x22   : > { %2152 = vmatprep.mubr.msk.bf16.mxu0 %vm373_vm3, %v1961_v20  ;;  %v885_v30 = vrot.slane %v883_v24, 4  ;;  %v897_v33 = vshrl.u32 %v1950_v18, 16  ;;  %v900_v34 = vshll.u32 %v1950_v18, 16  ;;  %v906_v35 = vshll.u32 %v2499_v19, 16  ;;  %v2532_v63 = vld [vmem:[%s2913_s1 + $0x8] sm:$0xf] }
  0x23   : > { %v288_v38 = vsel %vm2453_vm4, %v283_v25, %v287_v15  ;;  %v297_v39 = vrot.slane %v296_v27, 4  ;;  %v888_v40 = vrot.slane %v886_v28, 5  ;;  %v894_v43 = vrot.slane %v892_v29, 5  ;;  %v2537_v11 = vld [vmem:[%s2414_s5 + $0x38] sm:$0xf] }
  0x24   : > { %v899_v45 = vrot.slane %v897_v33, 4  ;;  %v902_v48 = vrot.slane %v900_v34, 5  ;;  %v908_v49 = vrot.slane %v906_v35, 5  ;;  %v1102_v50 = vrot.slane %v2493_v12, 5  ;;  %v2542_v18 = vld [vmem:[%s2414_s5 + $0x34] sm:$0x1] }
  0x25   : > { %v302_v52 = vsel %vm2453_vm4, %v297_v39, %v301_v23  ;;  %v889_v53 = vor.u32 %v888_v40, %v885_v30  ;;  %v1106_v55 = vrot.slane %v2499_v19, 5  ;;  %v304_v57 = vshrl.u32 %v2506_v36, 16  ;;  %v2548_v25 = vld [vmem:[%s2414_s5 + $0x3c] sm:$0x1]  ;;  %v1969_v34 = vld [vmem:[%s2414_s5 + $0x8] sm:$0xe] }
  0x26   : > { %v1895_v58 = vcombine.low %v288_v38, %v302_v52  ;;  %v903_v59 = vor.u32 %v902_v48, %v899_v45  ;;  %v307_v60 = vshll.u32 %v2506_v36, 16  ;;  %v313_v61 = vshll.u32 %v2511_v44, 16  ;;  %v2617_v19 = vld [vmem:[%s2414_s5 + $0x44] sm:$0x1] }
  0x27   : > { %v890_v0 = vrot.slane %v889_v53, 4  ;;  %v306_v2 = vrot.slane %v304_v57, 4  ;;  %v318_v4 = vshrl.u32 %v2515_v51, 16  ;;  %v321_v10 = vshll.u32 %v2515_v51, 16  ;;  %v1972_v57 = vld [vmem:[%s2414_s5 + $0x20] sm:$0xe] }
  0x28   : > { %2113 = vmatmul.mubr.msk.bf16.vlgmr.msra.gmra.mrb[0].mxu1 %vm373_vm3, %v1895_v58  ;;  %v904_v13 = vrot.slane %v903_v59, 4  ;;  %v309_v14 = vrot.slane %v307_v60, 5  ;;  %v315_v15 = vrot.slane %v313_v61, 5  ;;  %v327_v16 = vshll.u32 %v2521_v56, 16 }
  0x29   : > { %2121 = vmatpush3.bf16.msra.mxu1 %v2436_v17  ;;  %v895_v20 = vsel %vm2453_vm4, %v890_v0, %v894_v43  ;;  %v320_v23 = vrot.slane %v318_v4, 4  ;;  %v323_v24 = vrot.slane %v321_v10, 5  ;;  %v332_v27 = vshrl.u32 %v2527_v62, 16  ;;  %v1970_v17 = vld [vmem:[%s2414_s5 + $0x10] sm:$0xe] }
  0x2a   : > { %v909_v28 = vsel %vm2453_vm4, %v904_v13, %v908_v49  ;;  %v310_v29 = vor.u32 %v309_v14, %v306_v2  ;;  %v329_v30 = vrot.slane %v327_v16, 5  ;;  %v335_v33 = vshll.u32 %v2527_v62, 16  ;;  %2268 = vmatprep.subr.msk.bf16.mxu1 %vm386_vm0, %v2532_v63  ;;  %v1971_v43 = vld [vmem:[%s2414_s5 + $0x18] sm:$0xe]  ;;  %v1973_v0 = vld [vmem:[%s2414_s5 + $0x28] sm:$0xe] }
  0x2b   : > { %v1962_v35 = vcombine.low %v895_v20, %v909_v28  ;;  %v324_v38 = vor.u32 %v323_v24, %v320_v23  ;;  %v334_v39 = vrot.slane %v332_v27, 4  ;;  %v341_v40 = vshll.u32 %v2542_v18, 16 }
  0x2c   : > { %v311_v45 = vrot.slane %v310_v29, 4  ;;  %v337_v48 = vrot.slane %v335_v33, 5  ;;  %v346_v49 = vshrl.u32 %v2537_v11, 16  ;;  %v349_v52 = vshll.u32 %v2537_v11, 16  ;;  %v2587_v29 = vld [vmem:[%s2414_s5 + $0x34] sm:$0x1] }
  0x2d   : > { %2153 = vmatmul.mubr.msk.bf16.vlgmr.msra.gmra.mrb[0].mxu0 %vm373_vm3, %v1962_v35  ;;  %v325_v58 = vrot.slane %v324_v38, 4  ;;  %v343_v59 = vrot.slane %v341_v40, 5  ;;  %v355_v60 = vshll.u32 %v2548_v25, 16  ;;  %v1977_v61 = vrot.slane %v1969_v34, 9  ;;  %v1975_v38 = vld [vmem:[%s2414_s5 + $0x38] sm:$0xe] }
  0x2e   : > { %2161 = vmatpush3.bf16.msra.mxu0 %v2465_v42  ;;  %v316_v2 = vsel %vm2453_vm4, %v311_v45, %v315_v15  ;;  %v338_v4 = vor.u32 %v337_v48, %v334_v39  ;;  %v348_v10 = vrot.slane %v346_v49, 4  ;;  %v351_v13 = vrot.slane %v349_v52, 5  ;;  %v2584_v42 = vld [vmem:[%s2414_s5 + $0x2c] sm:$0x1]  ;;  %v1976_v45 = vld [vmem:[%s2414_s5 + $0x40] sm:$0xe] }
  0x2f   : > { %v330_v14 = vsel %vm2453_vm4, %v325_v58, %v329_v30  ;;  %v357_v16 = vrot.slane %v355_v60, 5  ;;  %v1095_v20 = vsel %vm2564_vm7, %v1977_v61, %v1094_v5  ;;  %v1978_v23 = vrot.slane %v1970_v17, 9  ;;  %2273 = vmatprep.subr.msk.bf16.mxu0 %vm386_vm0, %v2449_v31  ;;  %v1974_v30 = vld [vmem:[%s2414_s5 + $0x30] sm:$0xe]  ;;  %v2595_v31 = vld [vmem:[%s2414_s5 + $0x3c] sm:$0x1] }
  0x30   : > { %v1896_v15 = vcombine.low %v316_v2, %v330_v14  ;;  %v339_v24 = vrot.slane %v338_v4, 4  ;;  %v352_v27 = vor.u32 %v351_v13, %v348_v10  ;;  %v1979_v28 = vrot.slane %v1971_v43, 9  ;;  %v2626_v48 = vld [vmem:[%s2913_s1 + $0xc] sm:$0xf]  ;;  %v556_v58 = vld [vmem:[%s2414_s5 + $0x8] sm:$0xe] }
  0x31   : > { %v1099_v22 = vsel %vm2564_vm7, %v1978_v23, %v1098_v21  ;;  %v1980_v5 = vrot.slane %v1972_v57, 9  ;;  %v1981_v33 = vrot.slane %v1973_v0, 9  ;;  %v1110_v39 = vrot.slane %v2584_v42, 5  ;;  %v558_v4 = vld [vmem:[%s2414_s5 + $0x18] sm:$0xe] }
  0x32   : > { %2116 = vmatprep.mubr.msk.bf16.mxu1 %vm373_vm3, %v1896_v15  ;;  %v344_v34 = vsel %vm2453_vm4, %v339_v24, %v343_v59  ;;  %v353_v17 = vrot.slane %v352_v27, 4  ;;  %v1986_v35 = vcombine.low %v1095_v20, %v1099_v22  ;;  %v1103_v26 = vsel %vm2564_vm7, %v1979_v28, %v1102_v50  ;;  %v557_v59 = vld [vmem:[%s2414_s5 + $0x10] sm:$0xe]  ;;  %v559_v20 = vld [vmem:[%s2414_s5 + $0x20] sm:$0xe] }
  0x33   : > { %v1107_v21 = vsel %vm2564_vm7, %v1980_v5, %v1106_v55  ;;  %v1982_v40 = vrot.slane %v1974_v30, 9  ;;  %v1114_v43 = vrot.slane %v2587_v29, 5  ;;  %v1902_v50 = vcombine.low %v2417_v6, %v2420_v7  ;;  %v2027_v55 = vld [vmem:[%s2913_s1 + $0x1c] sm:$0xf]  ;;  %v555_v7 = vld [vmem:[%s2414_s5] sm:$0xe] }
  0x34   : > { %v358_v12 = vsel %vm2453_vm4, %v353_v17, %v357_v16  ;;  %2162 = vmatprep.mubr.msk.bf16.mxu0 %vm373_vm3, %v1986_v35  ;;  %v1987_v52 = vcombine.low %v1103_v26, %v1107_v21  ;;  %v1111_v57 = vsel %vm2564_vm7, %v1981_v33, %v1110_v39  ;;  %v584_v60 = vrot.slane %v2423_v8, 5  ;;  %v2011_v5 = vld [vmem:[%s2414_s5 + $0x10] sm:$0xf]  ;;  %v560_v17 = vld [vmem:[%s2414_s5 + $0x28] sm:$0xe] }
  0x35   : > { %v1897_v49 = vcombine.low %v344_v34, %v358_v12  ;;  %v1115_v6 = vsel %vm2564_vm7, %v1982_v40, %v1114_v43  ;;  %v1983_v0 = vrot.slane %v1975_v38, 9  ;;  %v1118_v2 = vrot.slane %v2595_v31, 5  ;;  %v561_v35 = vld [vmem:[%s2414_s5 + $0x30] sm:$0xe]  ;;  %v2013_v26 = vld [vmem:[%s2414_s5 + $0x18] sm:$0xf] }
  0x36   : > { %v1988_v61 = vcombine.low %v1111_v57, %v1115_v6  ;;  %v588_v10 = vrot.slane %v2426_v9, 5  ;;  %v592_v13 = vrot.slane %v2468_v46, 5  ;;  %v1984_v14 = vrot.slane %v1976_v45, 9  ;;  %v2305_v38 = vld [vmem:[%s2414_s5 + $0x10] ss:$8 sps:$4 sm:$0xff]  }
  0x37   : > { %2117 = vmatmul.mubr.msk.bf16.gmra.mrb[4].mxu1 %vm373_vm3, %v1897_v49  ;;  %v1122_v16 = vrot.slane %v2617_v19, 5  ;;  %v596_v23 = vrot.slane %v2479_v54, 5  ;;  %v1910_v8 = vrot.slane %v555_v7, 9  ;;  %v1911_v15 = vrot.slane %v556_v58, 9  ;;  %v2689_v21 = vld [vmem:[%s2414_s5 + $0x38] sm:$0xe] }
  0x38   : > { %2122 = vmatprep.mubr.msk.bf16.mxu1 %vm373_vm3, %v1902_v50  ;;  %v1912_v24 = vrot.slane %v557_v59, 9  ;;  %v641_v9 = vsel %vm386_vm0, %v2532_v63, 0  ;;  %v2649_v46 = vsel %vm386_vm0, %v2027_v55, 0  ;;  %v1913_v27 = vrot.slane %v558_v4, 9  ;;  %v2692_v39 = vld [vmem:[%s2414_s5 + $0x14] sm:$0x1] }
  0x39   : > { %2163 = vmatmul.mubr.msk.bf16.vlgmr.msra.gmra.mrb[0].mxu0 %vm373_vm3, %v1987_v52  ;;  %v2653_v54 = vsel %vm386_vm0, %v2626_v48, 0  ;;  %v1119_v28 = vsel %vm2564_vm7, %v1983_v0, %v1118_v2  ;;  %v1123_v63 = vsel %vm2564_vm7, %v1984_v14, %v1122_v16  ;;  %v1914_v30 = vrot.slane %v559_v20, 9  ;;  %v2017_v52 = vld [vmem:[%s2414_s5 + $0x28] sm:$0xf]  ;;  %v2711_v59 = vld [vmem:[%s2414_s5 + $0x1c] sm:$0x1] }
  0x3a   : > { %2171 = vmatpush3.bf16.msra.mxu0 %v2472_v47  ;;  %2166 = vmatprep.mubr.msk.bf16.mxu0 %vm373_vm3, %v1988_v61  ;;  %v600_v22 = vrot.slane %v2511_v44, 5  ;;  %v1903_v33 = vcombine.low %v2459_v37, %v2462_v41  ;;  %v2668_v47 = vsel %vm2564_vm7, %v1910_v8, %v584_v60  ;;  %v2672_v34 = vsel %vm2564_vm7, %v1911_v15, %v588_v10  ;;  %v2719_v2 = vld [vmem:[%s2414_s5 + $0x24] sm:$0x1]  ;;  %v2019_v20 = vld [vmem:[%s2414_s5 + $0x30] sm:$0xf] }
  0x3b   : > { %2274 = vmatprep.subr.msk.bf16.mxu0 %vm386_vm0, %v2027_v55  ;;  %v1904_v44 = vcombine.low %v2506_v36, %v2515_v51  ;;  %v2682_v37 = vsel %vm2564_vm7, %v1912_v24, %v592_v13  ;;  %v2686_v41 = vsel %vm2564_vm7, %v1913_v27, %v596_v23  ;;  %v1989_v40 = vcombine.low %v1119_v28, %v1123_v63  ;;  %v2015_v36 = vld [vmem:[%s2414_s5 + $0x20] sm:$0xf]  ;;  %v2730_v15 = vld [vmem:[%s2414_s5 + $0x2c] sm:$0x1]  ;;  %v2307_v27 = vld [vmem:[%s2414_s5 + $0x30] ss:$8 sps:$4 sm:$0xff]  }
  0x3c   : > { %v1905_v43 = vcombine.low %v2527_v62, %v2537_v11  ;;  %v1365_v12 = vshrl.u32 %v2011_v5, 16  ;;  %v1368_v50 = vshll.u32 %v2011_v5, 16  ;;  %v1919_v51 = vcombine.low %v2668_v47, %v2672_v34  ;;  %v2306_v23 = vld [vmem:[%s2414_s5 + $0x20] ss:$8 sps:$4 sm:$0xff]   ;;  %v2021_v5 = vld [vmem:[%s2414_s5 + $0x38] sm:$0xf] }
  0x3d   : > { %v2701_v45 = vsel %vm2564_vm7, %v1914_v30, %v600_v22  ;;  %v1915_v55 = vrot.slane %v560_v17, 9  ;;  %v1379_v49 = vshrl.u32 %v2013_v26, 16  ;;  %v1920_v62 = vcombine.low %v2682_v37, %v2686_v41  ;;  %v2741_v17 = vld [vmem:[%s2414_s5 + $0x34] sm:$0x1] }
  0x3e   : > { %v604_v11 = vrot.slane %v2521_v56, 5  ;;  %v1367_v57 = vrot.slane %v1365_v12, 4  ;;  %v1370_v6 = vrot.slane %v1368_v50, 5  ;;  %v1916_v7 = vrot.slane %v561_v35, 9  ;;  %v2023_v12 = vld [vmem:[%s2414_s5 + $0x40] sm:$0xf] }
  0x3f   : > { %2123 = vmatmul.mubr.msk.bf16.vlgmr.msra.gmra.mrb[0].mxu1 %vm373_vm3, %v1903_v33  ;;  %v608_v58 = vrot.slane %v2542_v18, 5  ;;  %v1381_v60 = vrot.slane %v1379_v49, 4  ;;  %v1382_v61 = vshll.u32 %v2013_v26, 16  ;;  %v1917_v56 = vrot.slane %v2689_v21, 9  ;;  %v2751_v21 = vld [vmem:[%s2414_s5 + $0x3c] sm:$0x1] }
  0x40   : > { %2131 = vmatpush3.bf16.msra.mxu1 %v641_v9  ;;  %2126 = vmatprep.mubr.msk.bf16.mxu1 %vm373_vm3, %v1904_v44  ;;  %v1374_v0 = vshll.u32 %v2692_v39, 16  ;;  %v1393_v18 = vshrl.u32 %v2015_v36, 16  ;;  %v1396_v4 = vshll.u32 %v2015_v36, 16  ;;  %v1371_v10 = vor.u32 %v1370_v6, %v1367_v57  ;;  %v2025_v6 = vld [vmem:[%s2414_s5 + $0x48] sm:$0xf] }
  0x41   : > { %2167 = vmatmul.mubr.msk.bf16.gmra.mrb[4].mxu0 %vm373_vm3, %v1989_v40  ;;  %2269 = vmatprep.subr.msk.bf16.mxu1 %vm386_vm0, %v2626_v48  ;;  %v1384_v13 = vrot.slane %v1382_v61, 5  ;;  %v1407_v14 = vshrl.u32 %v2017_v52, 16  ;;  %v1410_v16 = vshll.u32 %v2017_v52, 16  ;;  %v2726_v48 = vsel %vm2564_vm7, %v1915_v55, %v604_v11 }
  0x42   : > { %2172 = vmatprep.mubr.msk.bf16.mxu0 %vm373_vm3, %v2305_v38  ;;  %v1388_v8 = vshll.u32 %v2711_v59, 16  ;;  %v1395_v24 = vrot.slane %v1393_v18, 4  ;;  %v1398_v9 = vrot.slane %v1396_v4, 5  ;;  %v612_v28 = vrot.slane %v2548_v25, 5  ;;  %v2748_v25 = vld [vmem:[%s2913_s1 + $0x20] sm:$0xf] }
  0x43   : > { %v1385_v63 = vor.u32 %v1384_v13, %v1381_v60  ;;  %v1409_v30 = vrot.slane %v1407_v14, 4  ;;  %v1412_v22 = vrot.slane %v1410_v16, 5  ;;  %v2737_v33 = vsel %vm2564_vm7, %v1916_v7, %v608_v58  ;;  %v2776_v13 = vld [vmem:[%s2414_s5 + $0x44] sm:$0x1] }
  0x44   : > { %v1376_v47 = vrot.slane %v1374_v0, 5  ;;  %v1402_v34 = vshll.u32 %v2719_v2, 16  ;;  %v1421_v35 = vshrl.u32 %v2019_v20, 16  ;;  %v1921_v26 = vcombine.low %v2701_v45, %v2726_v48 }
  0x45   : > { %v1372_v44 = vrot.slane %v1371_v10, 4  ;;  %v1399_v38 = vor.u32 %v1398_v9, %v1395_v24  ;;  %v1424_v40 = vshll.u32 %v2019_v20, 16  ;;  %v1386_v50 = vrot.slane %v1385_v63, 4  ;;  %v2779_v20 = vld [vmem:[%s2414_s5 + $0x4c] sm:$0x1] }
  0x46   : > { %v1390_v36 = vrot.slane %v1388_v8, 5  ;;  %v1423_v55 = vrot.slane %v1421_v35, 4  ;;  %v1435_v49 = vshrl.u32 %v2021_v5, 16  ;;  %v2758_v45 = vsel %vm2564_vm7, %v1917_v56, %v612_v28  ;;  %v2308_v8 = vld [vmem:[%s2414_s5 + $0x40] ss:$8 sps:$4 sm:$0xff]  }
  0x47   : > { %2127 = vmatmul.mubr.msk.bf16.gmra.mrb[4].mxu1 %vm373_vm3, %v1905_v43  ;;  %v1413_v52 = vor.u32 %v1412_v22, %v1409_v30  ;;  %v1416_v11 = vshll.u32 %v2730_v15, 16  ;;  %v1426_v57 = vrot.slane %v1424_v40, 5  ;;  %v2763_v7 = vrot.slane %v1402_v34, 5 }
  0x48   : > { %2132 = vmatprep.mubr.msk.bf16.mxu1 %vm373_vm3, %v1919_v51  ;;  %v1430_v43 = vshll.u32 %v2741_v17, 16  ;;  %v1437_v58 = vrot.slane %v1435_v49, 4  ;;  %v1438_v60 = vshll.u32 %v2021_v5, 16  ;;  %v1377_v51 = vsel %vm2453_vm4, %v1372_v44, %v1376_v47  ;;  %v1954_v49 = vld [vmem:[%s2414_s5 + $0x30] sm:$0xf] }
  0x49   : > { %2173 = vmatmul.mubr.msk.bf16.vlgmr.msra.gmra.mrb[0].mxu0 %vm373_vm3, %v2306_v23  ;;  %v1400_v61 = vrot.slane %v1399_v38, 4  ;;  %v1427_v56 = vor.u32 %v1426_v57, %v1423_v55  ;;  %v1449_v0 = vshrl.u32 %v2023_v12, 16  ;;  %v1391_v18 = vsel %vm2453_vm4, %v1386_v50, %v1390_v36  ;;  %v2036_v38 = vld [vmem:[%s2414_s5 + $0x10] sm:$0xe]  ;;  %v2037_v50 = vld [vmem:[%s2414_s5 + $0x18] sm:$0xe] }
  0x4a   : > { %2181 = vmatpush3.bf16.msra.mxu0 %v2649_v46  ;;  %2176 = vmatprep.mubr.msk.bf16.mxu0 %vm373_vm3, %v2307_v27  ;;  %v1440_v4 = vrot.slane %v1438_v60, 5  ;;  %v1444_v10 = vshll.u32 %v2751_v21, 16  ;;  %v1452_v46 = vshll.u32 %v2023_v12, 16  ;;  %v1414_v14 = vrot.slane %v1413_v52, 4  ;;  %v2309_v57 = vld [vmem:[%s2414_s5 + $0x8] ss:$8 sps:$4 sm:$0xff]  }
  0x4b   : > { %2275 = vmatprep.subr.msk.bf16.mxu0 %vm386_vm0, %v2748_v25  ;;  %v1418_v16 = vrot.slane %v1416_v11, 5  ;;  %v1451_v23 = vrot.slane %v1449_v0, 4  ;;  %v1463_v48 = vshrl.u32 %v2025_v6, 16  ;;  %v1432_v24 = vrot.slane %v1430_v43, 5 }
  0x4c   : > { %v1441_v9 = vor.u32 %v1440_v4, %v1437_v58  ;;  %v1454_v27 = vrot.slane %v1452_v46, 5  ;;  %v1466_v28 = vshll.u32 %v2025_v6, 16  ;;  %v2028_v63 = vcombine.low %v1377_v51, %v1391_v18 }
  0x4d   : > { %v1428_v30 = vrot.slane %v1427_v56, 4  ;;  %v1458_v22 = vshll.u32 %v2776_v13, 16  ;;  %v1465_v5 = vrot.slane %v1463_v48, 4  ;;  %v1446_v34 = vrot.slane %v1444_v10, 5 }
  0x4e   : > { %v1442_v47 = vrot.slane %v1441_v9, 4  ;;  %v1468_v35 = vrot.slane %v1466_v28, 5  ;;  %v1472_v44 = vshll.u32 %v2779_v20, 16  ;;  %v1922_v40 = vcombine.low %v2737_v33, %v2758_v45  ;;  %v1958_v28 = vld [vmem:[%s2414_s5 + $0x40] sm:$0xf] }
  0x4f   : > { %2133 = vmatmul.mubr.msk.bf16.vlgmr.msra.gmra.mrb[0].mxu1 %vm373_vm3, %v1920_v62  ;;  %v1455_v12 = vor.u32 %v1454_v27, %v1451_v23  ;;  %v1405_v37 = vsel %vm2453_vm4, %v1400_v61, %v2763_v7  ;;  %v1419_v41 = vsel %vm2453_vm4, %v1414_v14, %v1418_v16  ;;  %v1952_v62 = vld [vmem:[%s2414_s5 + $0x28] sm:$0xf]  ;;  %v1433_v33 = vsel %vm2453_vm4, %v1428_v30, %v1432_v24  ;;  %v1956_v27 = vld [vmem:[%s2414_s5 + $0x38] sm:$0xf] }
  0x50   : > { %2141 = vmatpush3.bf16.msra.mxu1 %v2653_v54  ;;  %2136 = vmatprep.mubr.msk.bf16.mxu1 %vm373_vm3, %v1921_v26  ;;  %v1469_v54 = vor.u32 %v1468_v35, %v1465_v5  ;;  %v1460_v26 = vrot.slane %v1458_v22, 5  ;;  %v2044_v36 = vrot.slane %v2036_v38, 9  ;;  %v1604_v55 = vrot.slane %v2692_v39, 5  ;;  %v2311_v38 = vld [vmem:[%s2414_s5 + $0x28] ss:$8 sps:$4 sm:$0xff]  }
  0x51   : > { %2177 = vmatmul.mubr.msk.bf16.gmra.mrb[4].mxu0 %vm373_vm3, %v2308_v8  ;;  %2271 = vmatprep.subr.msk.bf16.mxu1 %vm386_vm0, %v2389_v1  ;;  %v1447_v45 = vsel %vm2453_vm4, %v1442_v47, %v1446_v34  ;;  %v1474_v52 = vrot.slane %v1472_v44, 5  ;;  %v2045_v11 = vrot.slane %v2037_v50, 9  ;;  %v1608_v1 = vrot.slane %v2711_v59, 5  ;;  %v2038_v59 = vld [vmem:[%s2414_s5 + $0x20] sm:$0xe] }
  0x52   : > { %2182 = vmatprep.mubr.msk.bf16.mxu0 %vm373_vm3, %v2028_v63  ;;  %v1456_v6 = vrot.slane %v1455_v12, 4  ;;  %v1470_v7 = vrot.slane %v1469_v54, 4  ;;  %v911_v43 = vshrl.u32 %v1952_v62, 16  ;;  %v914_v58 = vshll.u32 %v1952_v62, 16  ;;  %v2310_v63 = vld [vmem:[%s2414_s5 + $0x18] ss:$8 sps:$4 sm:$0xff]  }
  0x53   : > { %v2029_v60 = vcombine.low %v1405_v37, %v1419_v41  ;;  %v925_v51 = vshrl.u32 %v1954_v49, 16  ;;  %v928_v61 = vshll.u32 %v1954_v49, 16  ;;  %v2030_v56 = vcombine.low %v1433_v33, %v1447_v45  ;;  %v2040_v44 = vld [vmem:[%s2414_s5 + $0x30] sm:$0xe] }
  0x54   : > { %v913_v39 = vrot.slane %v911_v43, 4  ;;  %v916_v0 = vrot.slane %v914_v58, 5  ;;  %v1661_v18 = vsel %vm386_vm0, %v2748_v25, 0  ;;  %v1461_v46 = vsel %vm2453_vm4, %v1456_v6, %v1460_v26  ;;  %v2039_v25 = vld [vmem:[%s2414_s5 + $0x28] sm:$0xe] }
  0x55   : > { %v927_v4 = vrot.slane %v925_v51, 4  ;;  %v930_v10 = vrot.slane %v928_v61, 5  ;;  %v1475_v14 = vsel %vm2453_vm4, %v1470_v7, %v1474_v52  ;;  %v1605_v16 = vsel %vm2564_vm7, %v2044_v36, %v1604_v55  ;;  %v2042_v6 = vld [vmem:[%s2414_s5 + $0x40] sm:$0xe]  ;;  %v2043_v7 = vld [vmem:[%s2414_s5 + $0x48] sm:$0xe] }
  0x56   : > { %v1609_v23 = vsel %vm2564_vm7, %v2045_v11, %v1608_v1  ;;  %v917_v48 = vor.u32 %v916_v0, %v913_v39  ;;  %v920_v8 = vshll.u32 %v2584_v42, 16  ;;  %v934_v9 = vshll.u32 %v2587_v29, 16  ;;  %v2041_v42 = vld [vmem:[%s2414_s5 + $0x38] sm:$0xe] }
  0x57   : > { %2137 = vmatmul.mubr.msk.bf16.gmra.mrb[4].mxu1 %vm373_vm3, %v1922_v40  ;;  %v931_v24 = vor.u32 %v930_v10, %v927_v4  ;;  %v2046_v30 = vrot.slane %v2038_v59, 9  ;;  %v1612_v22 = vrot.slane %v2719_v2, 5  ;;  %v2031_v5 = vcombine.low %v1461_v46, %v1475_v14 }
  0x58   : > { %2142 = vmatprep.mubr.msk.bf16.mxu1 %vm373_vm3, %v2309_v57  ;;  %v2053_v47 = vcombine.low %v1605_v16, %v1609_v23  ;;  %v2047_v34 = vrot.slane %v2039_v25, 9  ;;  %v1616_v35 = vrot.slane %v2730_v15, 5  ;;  %v939_v40 = vshrl.u32 %v1956_v27, 16  ;;  %v2312_v57 = vld [vmem:[%s2414_s5 + $0x38] ss:$8 sps:$4 sm:$0xff]  }
  0x59   : > { %2183 = vmatmul.mubr.msk.bf16.vlgmr.msra.gmra.mrb[0].mxu0 %vm373_vm3, %v2029_v60  ;;  %v942_v12 = vshll.u32 %v1956_v27, 16  ;;  %v953_v29 = vshrl.u32 %v1958_v28, 16  ;;  %v956_v50 = vshll.u32 %v1958_v28, 16  ;;  %v918_v37 = vrot.slane %v917_v48, 4  ;;  %v2061_v27 = vld [vmem:[%s2914_s2] ss:$0 sm:$0xff] }
  0x5a   : > { %2191 = vmatpush3.bf16.msra.mxu0 %v1661_v18  ;;  %2186 = vmatprep.mubr.msk.bf16.mxu0 %vm373_vm3, %v2030_v56  ;;  %v922_v41 = vrot.slane %v920_v8, 5  ;;  %v932_v54 = vrot.slane %v931_v24, 4  ;;  %v936_v62 = vrot.slane %v934_v9, 5  ;;  %v2048_v33 = vrot.slane %v2040_v44, 9 }
  0x5b   : > { %v1620_v26 = vrot.slane %v2741_v17, 5  ;;  %v2049_v2 = vrot.slane %v2041_v42, 9  ;;  %v1624_v36 = vrot.slane %v2751_v21, 5  ;;  %v941_v15 = vrot.slane %v939_v40, 4 }
  0x5c   : > { %v944_v55 = vrot.slane %v942_v12, 5  ;;  %v955_v49 = vrot.slane %v953_v29, 4  ;;  %v958_v45 = vrot.slane %v956_v50, 5  ;;  %v948_v52 = vshll.u32 %v2595_v31, 16 }
  0x5d   : > { %v923_v17 = vsel %vm2453_vm4, %v918_v37, %v922_v41  ;;  %v937_v21 = vsel %vm2453_vm4, %v932_v54, %v936_v62  ;;  %v1617_v11 = vsel %vm2564_vm7, %v2047_v34, %v1616_v35  ;;  %v1621_v1 = vsel %vm2564_vm7, %v2048_v33, %v1620_v26 }
  0x5e   : > { %v1625_v31 = vsel %vm2564_vm7, %v2049_v2, %v1624_v36  ;;  %v962_v43 = vshll.u32 %v2617_v19, 16  ;;  %v1963_v58 = vcombine.low %v923_v17, %v937_v21  ;;  %v945_v60 = vor.u32 %v944_v55, %v941_v15 }
  0x5f   : > { %2143 = vmatmul.mubr.msk.bf16.vlgmr.msra.gmra.mrb[0].mxu1 %vm373_vm3, %v2310_v63  ;;  %v959_v51 = vor.u32 %v958_v45, %v955_v49  ;;  %v2055_v56 = vcombine.low %v1621_v1, %v1625_v31  ;;  %v2050_v39 = vrot.slane %v2042_v6, 9  ;;  %v1628_v0 = vrot.slane %v2776_v13, 5 }
  0x60   : > { %2201 = vmatpush3.bf16.msra.mxu1 %v2397_v3  ;;  %2146 = vmatprep.mubr.msk.bf16.mxu1 %vm373_vm3, %v2311_v38  ;;  %v1613_v3 = vsel %vm2564_vm7, %v2046_v30, %v1612_v22  ;;  %v2051_v18 = vrot.slane %v2043_v7, 9  ;;  %v1632_v59 = vrot.slane %v2779_v20, 5  ;;  %v950_v4 = vrot.slane %v948_v52, 5 }
  0x61   : > { %2187 = vmatmul.mubr.msk.bf16.gmra.mrb[4].mxu0 %vm373_vm3, %v2031_v5  ;;  %v2054_v61 = vcombine.low %v1613_v3, %v1617_v11  ;;  %v964_v10 = vrot.slane %v962_v43, 5  ;;  %v946_v46 = vrot.slane %v945_v60, 4  ;;  %v960_v14 = vrot.slane %v959_v51, 4 }
  0x62   : > { %2192 = vmatprep.mubr.msk.bf16.mxu0 %vm373_vm3, %v2053_v47  ;;  %v1629_v19 = vsel %vm2564_vm7, %v2050_v39, %v1628_v0  ;;  %v1633_v13 = vsel %vm2564_vm7, %v2051_v18, %v1632_v59  ;;  %v1760_v63 = vstv %s1751_s16 }
  0x63   : > { %v951_v20 = vsel %vm2453_vm4, %v946_v46, %v950_v4  ;;  %v965_v16 = vsel %vm2453_vm4, %v960_v14, %v964_v10  ;;  %v2056_v23 = vcombine.low %v1629_v19, %v1633_v13 }
  0x64   : > { %v1964_v25 = vcombine.low %v951_v20, %v965_v16 }
  0x67   : > { %2147 = vmatmul.mubr.msk.bf16.gmra.mrb[4].mxu1 %vm373_vm3, %v2312_v57 }
  0x68   : > { %2156 = vmatprep.mubr.msk.bf16.mxu1 %vm373_vm3, %v1963_v58 }
  0x69   : > { %2193 = vmatmul.mubr.msk.bf16.vlgmr.msra.gmra.mrb[0].mxu0 %vm373_vm3, %v2054_v61 }
  0x6a   : > { %2196 = vmatprep.mubr.msk.bf16.mxu0 %vm373_vm3, %v2055_v56 }
  0x71   : > { %2197 = vmatmul.mubr.msk.bf16.gmra.mrb[4].mxu0 %vm373_vm3, %v2056_v23 }
  0x73   : > { %2157 = vmatmul.mubr.msk.bf16.vlgmr.msra.gmra.mrb[4].mxu1 %vm373_vm3, %v1964_v25 }
 0x132   : > { %v2144_v48 = vpop.f32.mrb[0].mxu1 }
 0x133   : > { %v799_v8 = vpop.f32.mrb[1].mxu1 }
 0x134   : > { %v2145_v24 = vpop.f32.mrb[2].mxu1 }
 0x135   : > { %v802_v9 = vpop.f32.mrb[3].mxu1 }
 0x13c   : > { %v2194_v53 = vpop.f32.mrb[0].mxu0 }
 0x13d   : > { %v2202_v28 = vadd.f32 %v2194_v53, %v2144_v48  ;;  %v1697_v32 = vpop.f32.mrb[1].mxu0 }
 0x13e   : > { %v2203_v30 = vadd.f32 %v1697_v32, %v799_v8  ;;  %v2195_v22 = vpop.f32.mrb[2].mxu0 }
 0x13f   : > { %v1745_v5 = vadd.f32 %v2202_v28, %v2061_v27  ;;  %v2204_v47 = vadd.f32 %v2195_v22, %v2145_v24  ;;  %v1700_v34 = vpop.f32.mrb[3].mxu0 }
 0x140   : > { %v1743_v35 = vadd.f32 %v2203_v30, %v2061_v27  ;;  %v2205_v44 = vadd.f32 %v1700_v34, %v802_v9 }
 0x141   : > { %vm1754_vm8 = vcmp.ge.f32.partialorder %v1745_v5, 0.0  ;;  %v1763_v42 = vmul.f32 %v1760_v63, %v1745_v5  ;;  %v1746_v38 = vadd.f32 %v2204_v47, %v2061_v27 }
 0x142   : > { %vm1752_vm9 = vcmp.ge.f32.partialorder %v1743_v35, 0.0  ;;  %v1761_v40 = vmul.f32 %v1760_v63, %v1743_v35  ;;  %v1744_v12 = vadd.f32 %v2205_v44, %v2061_v27 }
 0x143   : > { %v1771_v29 = vsel %vm1754_vm8, %v1745_v5, %v1763_v42  ;;  %vm1755_vm11 = vcmp.ge.f32.partialorder %v1746_v38, 0.0  ;;  %v1764_v50 = vmul.f32 %v1760_v63, %v1746_v38 }
 0x144   : > { %v1779_v37 = vpack.c.bf16 %v1771_v29, %v1771_v29  ;;  %v1769_v41 = vsel %vm1752_vm9, %v1743_v35, %v1761_v40  ;;  %vm1753_vm12 = vcmp.ge.f32.partialorder %v1744_v12, 0.0  ;;  %v1762_v54 = vmul.f32 %v1760_v63, %v1744_v12  ;;  %v2198_v62 = vpop.f32.mrb[4].mxu0 }
 0x145   : > { %v1777_v33 = vpack.c.bf16 %v1769_v41, %v1769_v41  ;;  %v1772_v26 = vsel %vm1755_vm11, %v1746_v38, %v1764_v50  ;;  %v1713_v2 = vpop.f32.mrb[5].mxu0 }
 0x146   : > { %1788 = vst.msk [vmem:[%s2885_s25 + $0x8] sm:$0xf] %vm1785_vm10, %v1779_v37  ;;  %v1780_v36 = vpack.c.bf16 %v1772_v26, %v1772_v26  ;;  %v1770_v15 = vsel %vm1753_vm12, %v1744_v12, %v1762_v54  ;;  %v2158_v55 = vpop.f32.mrb[4].mxu1  ;;  %v2199_v49 = vpop.f32.mrb[6].mxu0 }
 0x147   : > { %1786 = vst.msk [vmem:[%s2885_s25] sm:$0xf] %vm1785_vm10, %v1777_v33  ;;  %v1778_v45 = vpack.c.bf16 %v1770_v15, %v1770_v15  ;;  %v2206_v52 = vadd.f32 %v2198_v62, %v2158_v55  ;;  %v1045_v17 = vpop.f32.mrb[5].mxu1  ;;  %v1716_v21 = vpop.f32.mrb[7].mxu0 }
 0x148   : > { %1789 = vst.msk [vmem:[%s2885_s25 + $0xc] sm:$0xf] %vm1785_vm10, %v1780_v36  ;;  %v2207_v3 = vadd.f32 %v1713_v2, %v1045_v17  ;;  %v2159_v11 = vpop.f32.mrb[6].mxu1 }
 0x149   : > { %1787 = vst.msk [vmem:[%s2885_s25 + $0x4] sm:$0xf] %vm1785_vm10, %v1778_v45  ;;  %v1749_v1 = vadd.f32 %v2206_v52, %v2061_v27  ;;  %v2208_v31 = vadd.f32 %v2199_v49, %v2159_v11  ;;  %v1048_v57 = vpop.f32.mrb[7].mxu1 }
 0x14a   : > { %v1747_v6 = vadd.f32 %v2207_v3, %v2061_v27  ;;  %v2209_v7 = vadd.f32 %v1716_v21, %v1048_v57 }
 0x14b   : > { %vm1758_vm13 = vcmp.ge.f32.partialorder %v1749_v1, 0.0  ;;  %v1767_v43 = vmul.f32 %v1760_v63, %v1749_v1  ;;  %v1750_v58 = vadd.f32 %v2208_v31, %v2061_v27 }
 0x14c   : > { %vm1756_vm14 = vcmp.ge.f32.partialorder %v1747_v6, 0.0  ;;  %v1765_v60 = vmul.f32 %v1760_v63, %v1747_v6  ;;  %v1748_v51 = vadd.f32 %v2209_v7, %v2061_v27 }
 0x14d   : > { %v1775_v61 = vsel %vm1758_vm13, %v1749_v1, %v1767_v43  ;;  %vm1759_vm15 = vcmp.ge.f32.partialorder %v1750_v58, 0.0  ;;  %v1768_v56 = vmul.f32 %v1760_v63, %v1750_v58 }
 0x14e   : > { %v1783_v39 = vpack.c.bf16 %v1775_v61, %v1775_v61  ;;  %v1773_v0 = vsel %vm1756_vm14, %v1747_v6, %v1765_v60  ;;  %vm1757_vm0 = vcmp.ge.f32.partialorder %v1748_v51, 0.0  ;;  %v1766_v18 = vmul.f32 %v1760_v63, %v1748_v51 }
 0x14f   : > { %v1781_v59 = vpack.c.bf16 %v1773_v0, %v1773_v0  ;;  %v1776_v4 = vsel %vm1759_vm15, %v1750_v58, %v1768_v56 }
 0x150   : > { %1792 = vst.msk [vmem:[%s2885_s25 + $0x18] sm:$0xf] %vm1785_vm10, %v1783_v39  ;;  %v1784_v10 = vpack.c.bf16 %v1776_v4, %v1776_v4  ;;  %v1774_v46 = vsel %vm1757_vm0, %v1748_v51, %v1766_v18 }
 0x151   : > { %1790 = vst.msk [vmem:[%s2885_s25 + $0x10] sm:$0xf] %vm1785_vm10, %v1781_v59  ;;  %v1782_v14 = vpack.c.bf16 %v1774_v46, %v1774_v46 }
 0x152   : > { %1793 = vst.msk [vmem:[%s2885_s25 + $0x1c] sm:$0xf] %vm1785_vm10, %v1784_v10 }
 0x153   : > { %1791 = vst.msk [vmem:[%s2885_s25 + $0x14] sm:$0xf] %vm1785_vm10, %v1782_v14 }
 0x154 PF: > { %s15_s19 = sadd.s32 1, %s2335_s19   ;;  %s2921_s17 = smov %s2331_s18 }
 0x155   : > { %p12_p5 = scmp.ge.s32.totalorder %s15_s19, 4   ;;  %s2922_s18 = smov %s2924_s3 }
 0x157   :  { %14 = sbr.rel (!%p12_p5) target bundleno = 2 (0x2), region = 77 }

// kernel: ds_forward.6
= control target key start
LH: loop header
LB: loop body
LE: loop exit
PB: predicated region body
PF: predicated region fallthrough
CT: control target
= control target key end

     0   :  { %s1074_s17 = smov 0   ;;  %s1076_s18 = smov 0   ;;  %s1197_s0 = inlined_call_operand.vmem [shape: bf16[2,5,5,32], index: 0, kind: input, shape index: {}]   ;;  %s1198_s1 = inlined_call_operand.vmem [shape: bf16[4,32,8], index: 1, kind: input, shape index: {}]   ;;  %s1199_s2 = inlined_call_operand.vmem [shape: f32[1,8], index: 2, kind: input, shape index: {}]   ;;  %s1200_s3 = inlined_call_operand.<no memory space> [shape: f32[1,1], index: 3, kind: input, shape index: {}]   ;;  %s1201_s4 = inlined_call_operand.vmem [shape: bf16[2,4,4,8], index: 4, kind: output, shape index: {}]  }
   0x1   :  { %9 = sst [smem:[#allocation2]] %s1200_s3  ;;  %s1078_s19 = smov 0  }
   0x2 LB: > { %s27_s3 = sadd.s32 1, %s1037_s18  ;;  %p883_p0 = scmp.ge.s32.totalorder %s1041_s19, 1  ;;  %s1041_s19 = sphi %s1078_s19, %s15_s19   ;;  %s1037_s18 = sphi %s1076_s18, %s1207_s18   ;;  %s1033_s17 = sphi %s1074_s17, %s1206_s17  }
   0x3   : > { %p29_p1 = scmp.ge.s32.totalorder %s27_s3, 2  ;;  %p177_p2 = scmp.lt.s32.totalorder %s1041_s19, 3 }
   0x5   : > { %s1209_s3 = smov (%p29_p1, %s27_s3), 0  ;;  %p178_p3 = pnand %p883_p0, %p177_p2 }
   0x6   : > { %v1003_v0 = vld [vmem:[%s1198_s1 + $0x10] sm:$0xff] (!%p178_p3)   ;;  %v1043_v1 = vmov (!%p178_p3), 0.0   ;;  %v1004_v2 = vld [vmem:[%s1198_s1] sm:$0xff] (!%p178_p3)   ;;  %v347_v3 = vlaneseq (!%p178_p3)  ;;  %v1005_v4 = vld [vmem:[%s1198_s1 + $0x18] sm:$0xff] (!%p178_p3)   ;;  %vm1044_vm0 = vmmov (!%p178_p3), 0   ;;  %p207_p4 = scmp.lt.s32.totalorder (!%p178_p3), %s1033_s17, 1 }
   0x7   : > { %181 = sbr.rel (%p178_p3) target bundleno = 278 (0x116), region = 36  ;;  %943 = vmatprep.subr.bf16.mxu0 (!%p178_p3), %v1043_v1  ;;  %951 = vmatprep.subr.bf16.mxu1 (!%p178_p3), %v1043_v1  ;;  %v1006_v5 = vld [vmem:[%s1198_s1 + $0x8] sm:$0xff] (!%p178_p3)   ;;  %v1045_v6 = vmov (!%p178_p3), 1983009808   ;;  %vm371_vm1 = vcmask (!%p178_p3), 261120   ;;  %v1010_v17 = vld [vmem:[%s1198_s1 + $0x30] sm:$0xff] (!%p178_p3)  }
   0x8   : > { %944 = vmatpush3.bf16.msra.mxu0 (!%p178_p3), %v1003_v0  ;;  %955 = vmatprep.mubr.msk.bf16.mxu1 (!%p178_p3), %vm1044_vm0, %v1043_v1  ;;  %v345_v7 = vunpack.c.l.s4 (!%p178_p3), %v1045_v6  ;;  %v348_v8 = vshrl.u32 (!%p178_p3), %v347_v3, 7  ;;  %vm274_vm2 = vsmask.f32 (!%p178_p3), 1280  ;;  %vm275_vm3 = vsmask.f32 (!%p178_p3), 3336  ;;  %v1012_v40 = vld [vmem:[%s1198_s1 + $0x38] sm:$0xff] (!%p178_p3)  }
   0x9   : > { %952 = vmatpush3.bf16.msra.mxu1 (!%p178_p3), %v1004_v2  ;;  %945 = vmatprep.subr.bf16.mxu0 (!%p178_p3), %v1043_v1  ;;  %vm277_vm4 = vsmask.f32 (!%p178_p3), 5392  ;;  %vm279_vm5 = vsmask.f32 (!%p178_p3), 7448  ;;  %vm276_vm6 = vmor (!%p178_p3), %vm274_vm2, %vm275_vm3  ;;  %s769_s14 = sld [smem:[#allocation2]] (!%p178_p3)  ;;  %vm787_vm10 = vcmask (!%p178_p3), 58368  }
   0xa   : > { %953 = vmatprep.subr.bf16.mxu1 (!%p178_p3), %v1043_v1  ;;  %947 = vmatprep.mubr.msk.bf16.mxu0 (!%p178_p3), %vm1044_vm0, %v1043_v1  ;;  %v346_v9 = vunpack.c.0.s8 (!%p178_p3), %v345_v7  ;;  %vm1134_vm7 = vmor (!%p178_p3), %vm276_vm6, %vm277_vm4  ;;  %v927_v41 = vld [vmem:[%s1199_s2] ss:$0 sm:$0xff] (!%p178_p3) }
   0xb   : > { %vm1147_vm8 = vmor (!%p178_p3), %vm1134_vm7, %vm279_vm5 }
   0xc   : > { %946 = vmatpush3.bf16.msra.mxu0 (!%p178_p3), %v1005_v4  ;;  %v1122_v10 = vsub.s32 (!%p178_p3), %v346_v9, %v348_v8 }
   0xd   : > { %954 = vmatpush3.bf16.msra.mxu1 (!%p178_p3), %v1006_v5  ;;  %959 = vmatprep.subr.bf16.mxu0 (!%p178_p3), %v1043_v1 }
   0xe   : > { %s1211_s17 = smov (!%p207_p4, %s1033_s17), 1  ;;  %967 = vmatprep.subr.bf16.mxu1 %v1043_v1 }
   0xf   : > { %s975_s28 = smul.u32 20, %s1211_s17  ;;  %s930_s20 = sshll.u32 %s1211_s17, 3 }
  0x10   : > { %s220_s23 = scalar_lea.vmem %s1201_s4, %s930_s20 }
  0x11   : > { %s1119_s5 = scalar_lea.vmem %s1197_s0, %s975_s28 }
  0x12   : > { %v1015_v11 = vld.sshfl [vmem:[%s1119_s5] sm:$0xf pattern:$0x76325410] }
  0x13   : > { %v1016_v12 = vld.sshfl [vmem:[%s1119_s5 + $0x8] sm:$0xf pattern:$0x76325410] }
  0x14   : > { %v887_v13 = vld.sshfl [vmem:[%s1119_s5] sm:$0x13 pattern:$0x76325410]  ;;  %v436_v22 = vcombine.low %v1015_v11, %v1016_v12 }
  0x15   : > { %v888_v14 = vld.sshfl [vmem:[%s1119_s5 + $0x4] sm:$0x13 pattern:$0x76325410]  ;;  %v249_v15 = vcombine.high %v887_v13, %v887_v13  ;;  %v282_v16 = vshrl.u32 %v887_v13, 16  ;;  %v285_v20 = vshll.u32 %v887_v13, 16 }
  0x16   : > { %v889_v18 = vld.sshfl [vmem:[%s1119_s5 + $0x8] sm:$0x13 pattern:$0x76325410]  ;;  %v257_v19 = vcombine.high %v888_v14, %v888_v14  ;;  %v296_v21 = vshrl.u32 %v888_v14, 16  ;;  %v299_v31 = vshll.u32 %v888_v14, 16  ;;  %956 = vmatmul.mubr.msk.bf16.vlgmr.msra.gmra.mrb[0].mxu1 %vm371_vm1, %v436_v22 }
  0x17   : > { %v890_v23 = vld.sshfl [vmem:[%s1119_s5 + $0xc] sm:$0x13 pattern:$0x76325410]  ;;  %v265_v24 = vcombine.high %v889_v18, %v889_v18  ;;  %v284_v25 = vrot.slane %v282_v16, 6  ;;  %v291_v26 = vshll.u32 %v249_v15, 16  ;;  %968 = vmatpush3.bf16.msra.mxu1 %v1010_v17  ;;  %971 = vmatprep.mubr.msk.bf16.mxu1 %vm1044_vm0, %v1043_v1 }
  0x18   : > { %v273_v27 = vcombine.high %v890_v23, %v890_v23  ;;  %v287_v29 = vrot.slane %v285_v20, 7  ;;  %v298_v30 = vrot.slane %v296_v21, 6  ;;  %v305_v33 = vshll.u32 %v257_v19, 16  ;;  %969 = vmatprep.subr.bf16.mxu1 %v1043_v1  ;;  %v1009_v17 = vld [vmem:[%s1198_s1 + $0x20] sm:$0xff]  }
  0x19   : > { %v293_v32 = vrot.slane %v291_v26, 7  ;;  %v310_v34 = vshrl.u32 %v889_v18, 16  ;;  %v313_v35 = vshll.u32 %v889_v18, 16  ;;  %v301_v37 = vrot.slane %v299_v31, 7 }
  0x1a   : > { %v288_v36 = vor.u32 %v287_v29, %v284_v25  ;;  %v319_v38 = vshll.u32 %v265_v24, 16  ;;  %v324_v39 = vshrl.u32 %v890_v23, 16  ;;  %v307_v42 = vrot.slane %v305_v33, 7 }
  0x1b   : > { %v312_v43 = vrot.slane %v310_v34, 6  ;;  %v315_v44 = vrot.slane %v313_v35, 7  ;;  %v327_v45 = vshll.u32 %v890_v23, 16  ;;  %v302_v47 = vor.u32 %v301_v37, %v298_v30  ;;  %970 = vmatpush3.bf16.msra.mxu1 %v1012_v40  ;;  %v1011_v23 = vld [vmem:[%s1198_s1 + $0x28] sm:$0xff]  }
  0x1c   : > { %v289_v46 = vrot.slane %v288_v36, 2  ;;  %v321_v48 = vrot.slane %v319_v38, 7  ;;  %v326_v49 = vrot.slane %v324_v39, 6  ;;  %v333_v52 = vshll.u32 %v273_v27, 16 }
  0x1d   : > { %v316_v50 = vor.u32 %v315_v44, %v312_v43  ;;  %v329_v51 = vrot.slane %v327_v45, 7  ;;  %v919_v53 = vld.sshfl [vmem:[%s1119_s5 + $0x10] sm:$0x13 pattern:$0x76325410]  ;;  %v303_v55 = vrot.slane %v302_v47, 2 }
  0x1e   : > { %v294_v54 = vsel %vm1147_vm8, %v289_v46, %v293_v32  ;;  %v623_v56 = vcombine.high %v919_v53, %v919_v53  ;;  %v667_v57 = vshrl.u32 %v919_v53, 16  ;;  %v335_v60 = vrot.slane %v333_v52, 7  ;;  %v1017_v15 = vld.sshfl [vmem:[%s1119_s5 + $0x4] sm:$0xf pattern:$0x76325410] }
  0x1f   : > { %v317_v58 = vrot.slane %v316_v50, 2  ;;  %v330_v59 = vor.u32 %v329_v51, %v326_v49  ;;  %v670_v61 = vshll.u32 %v919_v53, 16  ;;  %v308_v62 = vsel %vm1147_vm8, %v303_v55, %v307_v42  ;;  %v1018_v16 = vld.sshfl [vmem:[%s1119_s5 + $0xc] sm:$0xf pattern:$0x76325410] }
  0x20   : > { %v669_v63 = vrot.slane %v667_v57, 6  ;;  %v676_v0 = vshll.u32 %v623_v56, 16  ;;  %v342_v4 = vcombine.low %v294_v54, %v308_v62  ;;  %v525_v25 = vcombine.low %v1017_v15, %v1018_v16 }
  0x21   : > { %v322_v2 = vsel %vm1147_vm8, %v317_v58, %v321_v48  ;;  %v331_v3 = vrot.slane %v330_v59, 2  ;;  %v672_v5 = vrot.slane %v670_v61, 7  ;;  %v772_v46 = vstv %s769_s14 }
  0x22   : > { %v678_v8 = vrot.slane %v676_v0, 7  ;;  %v350_v11 = vrot.slane %v342_v4, %v1122_v10  ;;  %v685_v12 = vcombine.low %v308_v62, %v322_v2 }
  0x23   : > { %v336_v6 = vsel %vm1147_vm8, %v331_v3, %v335_v60  ;;  %v673_v7 = vor.u32 %v672_v5, %v669_v63 }
  0x24   : > { %v343_v9 = vcombine.low %v322_v2, %v336_v6  ;;  %v693_v21 = vrot.slane %v685_v12, %v1122_v10 }
  0x25   : > { %v674_v13 = vrot.slane %v673_v7, 2 }
  0x26   : > { %v357_v14 = vrot.slane %v343_v9, %v1122_v10 }
  0x27   : > { %v679_v18 = vsel %vm1147_vm8, %v674_v13, %v678_v8 }
  0x28   : > { %v358_v19 = vcombine.low %v350_v11, %v357_v14  ;;  %v686_v20 = vcombine.low %v336_v6, %v679_v18 }
  0x2a   : > { %948 = vmatmul.mubr.msk.bf16.vlgmr.msra.gmra.mrb[0].mxu0 %vm371_vm1, %v358_v19  ;;  %v700_v22 = vrot.slane %v686_v20, %v1122_v10 }
  0x2b   : > { %960 = vmatpush3.bf16.msra.mxu0 %v1009_v17  ;;  %963 = vmatprep.mubr.msk.bf16.mxu0 %vm1044_vm0, %v1043_v1 }
  0x2c   : > { %961 = vmatprep.subr.bf16.mxu0 %v1043_v1  ;;  %v701_v24 = vcombine.low %v693_v21, %v700_v22 }
  0x2e   : > { %972 = vmatmul.mubr.msk.bf16.vlgmr.msra.gmra.mrb[4].mxu1 %vm371_vm1, %v701_v24 }
  0x2f   : > { %962 = vmatpush3.bf16.msra.mxu0 %v1011_v23 }
  0x32   : > { %964 = vmatmul.mubr.msk.bf16.vlgmr.msra.gmra.mrb[4].mxu0 %vm371_vm1, %v525_v25 }
  0xe9   : > { %v486_v26 = vpop.f32.mrb[0].mxu1 }
  0xea   : > { %v957_v27 = vpop.f32.mrb[1].mxu1 }
  0xeb   : > { %v489_v10 = vpop.f32.mrb[2].mxu1 }
  0xec   : > { %v958_v28 = vpop.f32.mrb[3].mxu1 }
  0xfd   : > { %v409_v29 = vpop.f32.mrb[0].mxu0 }
  0xfe   : > { %v487_v30 = vadd.f32 %v486_v26, %v409_v29  ;;  %v949_v31 = vpop.f32.mrb[1].mxu0 }
  0xff   : > { %v412_v32 = vpop.f32.mrb[2].mxu0 }
 0x100   : > { %v490_v33 = vadd.f32 %v489_v10, %v412_v32  ;;  %v950_v34 = vpop.f32.mrb[3].mxu0 }
 0x101   : > { %v751_v35 = vpop.f32.mrb[4].mxu1 }
 0x102   : > { %v973_v1 = vpop.f32.mrb[5].mxu1 }
 0x103   : > { %v754_v36 = vpop.f32.mrb[6].mxu1 }
 0x104   : > { %v974_v37 = vpop.f32.mrb[7].mxu1 }
 0x105   : > { %v575_v38 = vpop.f32.mrb[4].mxu0 }
 0x106   : > { %v582_v39 = vadd.f32 %v575_v38, %v487_v30  ;;  %v965_v40 = vpop.f32.mrb[5].mxu0 }
 0x107   : > { %v578_v42 = vpop.f32.mrb[6].mxu0 }
 0x108   : > { %v758_v43 = vadd.f32 %v751_v35, %v582_v39  ;;  %v583_v44 = vadd.f32 %v578_v42, %v490_v33  ;;  %v966_v45 = vpop.f32.mrb[7].mxu0 }
 0x10a   : > { %v767_v47 = vadd.f32 %v927_v41, %v758_v43  ;;  %v759_v48 = vadd.f32 %v754_v36, %v583_v44 }
 0x10c   : > { %vm770_vm9 = vcmp.ge.f32.partialorder %v767_v47, 0.0  ;;  %v773_v49 = vmul.f32 %v772_v46, %v767_v47  ;;  %v768_v50 = vadd.f32 %v927_v41, %v759_v48 }
 0x10e   : > { %v775_v51 = vsel %vm770_vm9, %v767_v47, %v773_v49  ;;  %vm771_vm11 = vcmp.ge.f32.partialorder %v768_v50, 0.0  ;;  %v774_v52 = vmul.f32 %v772_v46, %v768_v50 }
 0x10f   : > { %v779_v53 = vcombine.high %v775_v51, %v775_v51  ;;  %v783_v54 = vpack.c.bf16 %v775_v51, %v775_v51 }
 0x110   : > { %v776_v55 = vsel %vm771_vm11, %v768_v50, %v774_v52 }
 0x111   : > { %v784_v56 = vpack.c.bf16 %v779_v53, %v779_v53  ;;  %788 = vst.msk [vmem:[%s220_s23] sm:$0x3] %vm787_vm10, %v783_v54  ;;  %v780_v57 = vcombine.high %v776_v55, %v776_v55  ;;  %v785_v58 = vpack.c.bf16 %v776_v55, %v776_v55 }
 0x113   : > { %789 = vst.msk [vmem:[%s220_s23 + $0x2] sm:$0x3] %vm787_vm10, %v784_v56  ;;  %v786_v59 = vpack.c.bf16 %v780_v57, %v780_v57  ;;  %790 = vst.msk [vmem:[%s220_s23 + $0x4] sm:$0x3] %vm787_vm10, %v785_v58 }
 0x115   : > { %791 = vst.msk [vmem:[%s220_s23 + $0x6] sm:$0x3] %vm787_vm10, %v786_v59 }
 0x116 PF: > { %s15_s19 = sadd.s32 1, %s1041_s19   ;;  %s1206_s17 = smov %s1037_s18 }
 0x117   : > { %p12_p5 = scmp.ge.s32.totalorder %s15_s19, 4   ;;  %s1207_s18 = smov %s1209_s3 }
 0x119   :  { %14 = sbr.rel (!%p12_p5) target bundleno = 2 (0x2), region = 71 }

// kernel: ds_forward.7
= control target key start
LH: loop header
LB: loop body
LE: loop exit
PB: predicated region body
PF: predicated region fallthrough
CT: control target
= control target key end

     0   :  { %s1714_s17 = smov 0   ;;  %s1716_s18 = smov 0   ;;  %s1925_s0 = inlined_call_operand.vmem [shape: bf16[2,6,6,8], index: 0, kind: input, shape index: {}]   ;;  %s1926_s1 = inlined_call_operand.vmem [shape: bf16[9,8,8], index: 1, kind: input, shape index: {}]   ;;  %s1927_s2 = inlined_call_operand.vmem [shape: f32[1,8], index: 2, kind: input, shape index: {}]   ;;  %s1928_s3 = inlined_call_operand.<no memory space> [shape: f32[1,1], index: 3, kind: input, shape index: {}]   ;;  %s1929_s4 = inlined_call_operand.vmem [shape: bf16[2,4,4,8], index: 4, kind: output, shape index: {}]  }
   0x1   :  { %9 = sst [smem:[#allocation2]] %s1928_s3  ;;  %s1718_s19 = smov 0  }
   0x2 LB: > { %s27_s3 = sadd.s32 1, %s1677_s18  ;;  %p1462_p0 = scmp.ge.s32.totalorder %s1681_s19, 1  ;;  %s1681_s19 = sphi %s1718_s19, %s15_s19   ;;  %s1677_s18 = sphi %s1716_s18, %s1937_s18   ;;  %s1673_s17 = sphi %s1714_s17, %s1936_s17  }
   0x3   : > { %p29_p1 = scmp.ge.s32.totalorder %s27_s3, 2  ;;  %p177_p2 = scmp.lt.s32.totalorder %s1681_s19, 3 }
   0x5   : > { %s1939_s3 = smov (%p29_p1, %s27_s3), 0  ;;  %p178_p3 = pnand %p1462_p0, %p177_p2 }
   0x6   : > { %v1470_v0 = vld [vmem:[%s1926_s1 + $0x4] sm:$0xf] (!%p178_p3)  ;;  %vm357_vm0 = vcmask (!%p178_p3), 1043456   ;;  %v230_v1 = vld [vmem:[%s1926_s1] sm:$0xf] (!%p178_p3)  ;;  %v1683_v2 = vmov (!%p178_p3), 0.0   ;;  %v341_v5 = vlaneseq (!%p178_p3) }
   0x7   : > { %181 = sbr.rel (%p178_p3) target bundleno = 300 (0x12c), region = 36  ;;  %1565 = vmatprep.subr.bf16.mxu0 (!%p178_p3), %v1683_v2  ;;  %v359_v3 = vsel (!%p178_p3), %vm357_vm0, %v1470_v0, 0  ;;  %1571 = vmatprep.subr.bf16.mxu1 (!%p178_p3), %v1683_v2  ;;  %v427_v4 = vsel (!%p178_p3), %vm357_vm0, %v230_v1, 0  ;;  %p207_p4 = scmp.lt.s32.totalorder (!%p178_p3), %s1673_s17, 1  ;;  %vm1684_vm1 = vmmov (!%p178_p3), 0   ;;  %vm510_vm6 = vcmask (!%p178_p3), 1040384  }
   0x8   : > { %1566 = vmatpush3.bf16.msra.mxu0 (!%p178_p3), %v359_v3  ;;  %1572 = vmatpush3.bf16.msra.mxu1 (!%p178_p3), %v427_v4  ;;  %vm271_vm2 = vsmask.f32 (!%p178_p3), 1280  ;;  %vm272_vm3 = vsmask.f32 (!%p178_p3), 3336  ;;  %v1685_v6 = vmov (!%p178_p3), 1983009808  }
   0x9   : > { %1567 = vmatprep.mubr.msk.bf16.mxu0 (!%p178_p3), %vm1684_vm1, %v1683_v2  ;;  %1573 = vmatprep.mubr.msk.bf16.mxu1 (!%p178_p3), %vm1684_vm1, %v1683_v2  ;;  %v339_v7 = vunpack.c.l.s4 (!%p178_p3), %v1685_v6  ;;  %v1487_v8 = vld [vmem:[%s1926_s1 + $0xc] sm:$0xf] (!%p178_p3)  ;;  %vm274_vm4 = vsmask.f32 (!%p178_p3), 5392  ;;  %vm276_vm5 = vsmask.f32 (!%p178_p3), 7448  ;;  %vm273_vm7 = vmor (!%p178_p3), %vm271_vm2, %vm272_vm3 }
   0xa   : > { %1577 = vmatprep.subr.bf16.mxu0 (!%p178_p3), %v1683_v2  ;;  %1583 = vmatprep.subr.bf16.mxu1 (!%p178_p3), %v1683_v2  ;;  %v342_v9 = vshrl.u32 (!%p178_p3), %v341_v5, 7  ;;  %v1760_v11 = vsel (!%p178_p3), %vm357_vm0, %v1487_v8, 0  ;;  %vm511_vm8 = vcmask (!%p178_p3), 1042434   ;;  %vm513_vm9 = vcmask (!%p178_p3), 1044484   ;;  %vm275_vm11 = vmor (!%p178_p3), %vm273_vm7, %vm274_vm4  ;;  %s1344_s16 = sld [smem:[#allocation2]] (!%p178_p3) }
   0xb   : > { %v340_v10 = vunpack.c.0.s8 (!%p178_p3), %v339_v7  ;;  %vm515_vm10 = vcmask (!%p178_p3), 1046534   ;;  %vm353_vm12 = vcmask (!%p178_p3), 64512   ;;  %vm1770_vm13 = vmor (!%p178_p3), %vm275_vm11, %vm276_vm5 }
   0xc   : > { %vm1776_vm14 = vmor (!%p178_p3), %vm510_vm6, %vm511_vm8 }
   0xd   : > { %v1767_v25 = vsub.s32 (!%p178_p3), %v340_v10, %v342_v9  ;;  %vm514_vm15 = vmor (!%p178_p3), %vm1776_vm14, %vm513_vm9 }
   0xe   : > { %s1941_s17 = smov (!%p207_p4, %s1673_s17), 1  ;;  %vm1796_vm2 = vmor %vm514_vm15, %vm515_vm10 }
   0xf   : > { %s1619_s26 = smul.u32 24, %s1941_s17  ;;  %s1546_s22 = sshll.u32 %s1941_s17, 3 }
  0x10   : > { %s220_s25 = scalar_lea.vmem %s1929_s4, %s1546_s22 }
  0x11   : > { %s1757_s29 = scalar_lea.vmem %s1925_s0, %s1619_s26 }
  0x12   : > { %v1466_v12 = vld.sshfl [vmem:[%s1757_s29] sm:$0x13 pattern:$0x76325410] }
  0x13   : > { %v1467_v13 = vld.sshfl [vmem:[%s1757_s29 + $0x4] sm:$0x13 pattern:$0x76325410]  ;;  %v246_v14 = vcombine.high %v1466_v12, %v1466_v12  ;;  %v279_v15 = vshrl.u32 %v1466_v12, 16  ;;  %v282_v16 = vshll.u32 %v1466_v12, 16 }
  0x14   : > { %v1468_v17 = vld.sshfl [vmem:[%s1757_s29 + $0x8] sm:$0x13 pattern:$0x76325410]  ;;  %v254_v18 = vcombine.high %v1467_v13, %v1467_v13  ;;  %v293_v19 = vshrl.u32 %v1467_v13, 16  ;;  %v296_v20 = vshll.u32 %v1467_v13, 16 }
  0x15   : > { %v1469_v21 = vld.sshfl [vmem:[%s1757_s29 + $0xc] sm:$0x13 pattern:$0x76325410]  ;;  %v262_v22 = vcombine.high %v1468_v17, %v1468_v17  ;;  %v281_v23 = vrot.slane %v279_v15, 6  ;;  %v284_v24 = vrot.slane %v282_v16, 7 }
  0x16   : > { %v270_v26 = vcombine.high %v1469_v21, %v1469_v21  ;;  %v288_v27 = vshll.u32 %v246_v14, 16  ;;  %v295_v28 = vrot.slane %v293_v19, 6  ;;  %v298_v29 = vrot.slane %v296_v20, 7  ;;  %v1481_v14 = vld [vmem:[%s1926_s1 + $0x8] sm:$0xf] }
  0x17   : > { %v285_v31 = vor.u32 %v284_v24, %v281_v23  ;;  %v302_v32 = vshll.u32 %v254_v18, 16  ;;  %v307_v33 = vshrl.u32 %v1468_v17, 16  ;;  %v310_v34 = vshll.u32 %v1468_v17, 16 }
  0x18   : > { %v290_v35 = vrot.slane %v288_v27, 7  ;;  %v299_v36 = vor.u32 %v298_v29, %v295_v28  ;;  %v316_v37 = vshll.u32 %v262_v22, 16  ;;  %v321_v38 = vshrl.u32 %v1469_v21, 16  ;;  %v1511_v22 = vld [vmem:[%s1926_s1 + $0x14] sm:$0xf] }
  0x19   : > { %v286_v40 = vrot.slane %v285_v31, 2  ;;  %v304_v41 = vrot.slane %v302_v32, 7  ;;  %v309_v42 = vrot.slane %v307_v33, 6  ;;  %v312_v43 = vrot.slane %v310_v34, 7 }
  0x1a   : > { %v1653_v44 = vld.sshfl [vmem:[%s1757_s29] sm:$0xf pattern:$0x76325410]  ;;  %v300_v45 = vrot.slane %v299_v36, 2  ;;  %v318_v46 = vrot.slane %v316_v37, 7 }
  0x1b   : > { %v323_v47 = vrot.slane %v321_v38, 6  ;;  %v324_v48 = vshll.u32 %v1469_v21, 16  ;;  %v1654_v49 = vld.sshfl [vmem:[%s1757_s29 + $0x8] sm:$0xf pattern:$0x76325410]  ;;  %v291_v50 = vsel %vm1770_vm13, %v286_v40, %v290_v35  ;;  %v313_v51 = vor.u32 %v312_v43, %v309_v42 }
  0x1c   : > { %v330_v52 = vshll.u32 %v270_v26, 16  ;;  %v1473_v53 = vld.sshfl [vmem:[%s1757_s29] sm:$0x12 pattern:$0x76325410]  ;;  %v1790_v54 = vsel %vm1770_vm13, %v300_v45, %v304_v41  ;;  %v422_v63 = vcombine.low %v1653_v44, %v1654_v49  ;;  %v556_v37 = vsel %vm357_vm0, %v1481_v14, 0 }
  0x1d   : > { %v326_v55 = vrot.slane %v324_v48, 7  ;;  %v1474_v56 = vld.sshfl [vmem:[%s1757_s29 + $0x4] sm:$0x12 pattern:$0x76325410]  ;;  %v485_v57 = vcombine.high %v1473_v53, %v1473_v53  ;;  %v314_v58 = vrot.slane %v313_v51, 2  ;;  %v336_v6 = vcombine.low %v291_v50, %v1790_v54 }
  0x1e   : > { %v332_v59 = vrot.slane %v330_v52, 7  ;;  %v1475_v60 = vld.sshfl [vmem:[%s1757_s29 + $0x8] sm:$0x12 pattern:$0x76325410]  ;;  %v493_v61 = vcombine.high %v1474_v56, %v1474_v56  ;;  %v1477_v4 = vrot.slane %v1473_v53, 9  ;;  %1574 = vmatmul.mubr.msk.bf16.vlgmr.msra.gmra.mrb[0].mxu1 %vm353_vm12, %v422_v63 }
  0x1f   : > { %v327_v62 = vor.u32 %v326_v55, %v323_v47  ;;  %v1476_v0 = vld.sshfl [vmem:[%s1757_s29 + $0xc] sm:$0x12 pattern:$0x76325410]  ;;  %v501_v1 = vcombine.high %v1475_v60, %v1475_v60  ;;  %v1802_v5 = vsel %vm1770_vm13, %v314_v58, %v318_v46  ;;  %v519_v8 = vrot.slane %v485_v57, 7  ;;  %1584 = vmatpush3.bf16.msra.mxu1 %v1760_v11  ;;  %1585 = vmatprep.mubr.msk.bf16.mxu1 %vm1684_vm1, %v1683_v2 }
  0x20   : > { %v509_v7 = vcombine.high %v1476_v0, %v1476_v0  ;;  %v1478_v10 = vrot.slane %v1474_v56, 9  ;;  %v523_v12 = vrot.slane %v493_v61, 7  ;;  %v1479_v13 = vrot.slane %v1475_v60, 9  ;;  %1595 = vmatprep.subr.bf16.mxu1 %v1683_v2 }
  0x21   : > { %v328_v9 = vrot.slane %v327_v62, 2  ;;  %v520_v15 = vsel %vm1796_vm2, %v1477_v4, %v519_v8  ;;  %v527_v16 = vrot.slane %v501_v1, 7  ;;  %v1480_v17 = vrot.slane %v1476_v0, 9 }
  0x22   : > { %v531_v18 = vrot.slane %v509_v7, 7  ;;  %v524_v20 = vsel %vm1796_vm2, %v1478_v10, %v523_v12  ;;  %v1655_v21 = vld.sshfl [vmem:[%s1757_s29 + $0x4] sm:$0xf pattern:$0x76325410]  ;;  %v344_v24 = vrot.slane %v336_v6, %v1767_v25  ;;  %v923_v39 = vsel %vm357_vm0, %v1511_v22, 0 }
  0x23   : > { %v1816_v19 = vsel %vm1770_vm13, %v328_v9, %v332_v59  ;;  %v1656_v11 = vld.sshfl [vmem:[%s1757_s29 + $0xc] sm:$0xf pattern:$0x76325410]  ;;  %v528_v26 = vsel %vm1796_vm2, %v1479_v13, %v527_v16  ;;  %v535_v29 = vcombine.low %v520_v15, %v524_v20  ;;  %v778_v4 = vcombine.low %v1790_v54, %v1802_v5  ;;  %v1527_v9 = vld [vmem:[%s1926_s1 + $0x1c] sm:$0xf] }
  0x24   : > { %v337_v23 = vcombine.low %v1802_v5, %v1816_v19  ;;  %v532_v27 = vsel %vm1796_vm2, %v1480_v17, %v531_v18  ;;  %v1496_v28 = vld.sshfl [vmem:[%s1757_s29 + $0x10] sm:$0x13 pattern:$0x76325410]  ;;  %v630_v38 = vcombine.low %v1655_v21, %v1656_v11  ;;  %v902_v48 = vcombine.low %v524_v20, %v528_v26  ;;  %v1517_v20 = vld [vmem:[%s1926_s1 + $0x18] sm:$0xf] }
  0x25   : > { %v719_v31 = vcombine.high %v1496_v28, %v1496_v28  ;;  %v1506_v32 = vld.sshfl [vmem:[%s1757_s29 + $0x10] sm:$0x12 pattern:$0x76325410]  ;;  %v536_v34 = vcombine.low %v528_v26, %v532_v27  ;;  %v763_v35 = vshrl.u32 %v1496_v28, 16  ;;  %v766_v36 = vshll.u32 %v1496_v28, 16 }
  0x26   : > { %v1836_v33 = vrot.slane %v337_v23, %v1767_v25  ;;  %v883_v44 = vcombine.high %v1506_v32, %v1506_v32  ;;  %v1526_v45 = vld.sshfl [vmem:[%s1757_s29 + $0x14] sm:$0x13 pattern:$0x76325410]  ;;  %v543_v46 = vrot.slane %v535_v29, %v1767_v25  ;;  %1586 = vmatmul.mubr.msk.bf16.vlgmr.msra.gmra.mrb[4].mxu1 %vm353_vm12, %v630_v38  ;;  %v1510_v47 = vrot.slane %v1506_v32, 9 }
  0x27   : > { %v772_v40 = vshll.u32 %v719_v31, 16  ;;  %v765_v42 = vrot.slane %v763_v35, 6  ;;  %v768_v43 = vrot.slane %v766_v36, 7  ;;  %v1846_v49 = vrot.slane %v536_v34, %v1767_v25  ;;  %1596 = vmatpush3.bf16.msra.mxu1 %v923_v39  ;;  %1597 = vmatprep.mubr.msk.bf16.mxu1 %vm1684_vm1, %v1683_v2  ;;  %v1497_v59 = vld [vmem:[%s1926_s1 + $0x10] sm:$0xf] }
  0x28   : > { %v352_v41 = vcombine.low %v344_v24, %v1836_v33  ;;  %v898_v52 = vrot.slane %v883_v44, 7  ;;  %v1086_v53 = vcombine.high %v1526_v45, %v1526_v45  ;;  %v1130_v55 = vshrl.u32 %v1526_v45, 16  ;;  %1607 = vmatprep.subr.bf16.mxu1 %v1683_v2  ;;  %v1536_v14 = vld.sshfl [vmem:[%s1757_s29 + $0x14] sm:$0x12 pattern:$0x76325410] }
  0x29   : > { %v769_v50 = vor.u32 %v768_v43, %v765_v42  ;;  %v774_v51 = vrot.slane %v772_v40, 7  ;;  %v1133_v58 = vshll.u32 %v1526_v45, 16  ;;  %v910_v61 = vrot.slane %v902_v48, %v1767_v25  ;;  %v1657_v22 = vld.sshfl [vmem:[%s1757_s29 + $0x8] sm:$0xf pattern:$0x76325410] }
  0x2a   : > { %1568 = vmatmul.mubr.msk.bf16.vlgmr.msra.gmra.mrb[0].mxu0 %vm353_vm12, %v352_v41  ;;  %v899_v57 = vsel %vm1796_vm2, %v1510_v47, %v898_v52  ;;  %v1132_v62 = vrot.slane %v1130_v55, 6  ;;  %v1139_v63 = vshll.u32 %v1086_v53, 16  ;;  %v551_v0 = vcombine.low %v543_v46, %v1846_v49  ;;  %v1658_v23 = vld.sshfl [vmem:[%s1757_s29 + $0x10] sm:$0xf pattern:$0x76325410] }
  0x2b   : > { %1578 = vmatpush3.bf16.msra.mxu0 %v556_v37  ;;  %1579 = vmatprep.mubr.msk.bf16.mxu0 %vm1684_vm1, %v1683_v2  ;;  %v770_v56 = vrot.slane %v769_v50, 2  ;;  %v903_v60 = vcombine.low %v532_v27, %v899_v57  ;;  %v1135_v6 = vrot.slane %v1133_v58, 7  ;;  %v799_v10 = vsel %vm357_vm0, %v1497_v59, 0  ;;  %v1541_v31 = vld [vmem:[%s1926_s1 + $0x20] sm:$0xf] }
  0x2c   : > { %1589 = vmatprep.subr.bf16.mxu0 %v1683_v2  ;;  %v1141_v13 = vrot.slane %v1139_v63, 7  ;;  %v786_v54 = vrot.slane %v778_v4, %v1767_v25  ;;  %v1166_v16 = vsel %vm357_vm0, %v1527_v9, 0  ;;  %v1250_v18 = vcombine.high %v1536_v14, %v1536_v14 }
  0x2d   : > { %v775_v1 = vsel %vm1770_vm13, %v770_v56, %v774_v51  ;;  %v917_v8 = vrot.slane %v903_v60, %v1767_v25  ;;  %v1136_v12 = vor.u32 %v1135_v6, %v1132_v62  ;;  %v1540_v26 = vrot.slane %v1536_v14, 9 }
  0x2e   : > { %v779_v7 = vcombine.low %v1816_v19, %v775_v1  ;;  %v1265_v27 = vrot.slane %v1250_v18, 7  ;;  %v1002_v28 = vsel %vm357_vm0, %v1517_v20, 0  ;;  %v997_v32 = vcombine.low %v1657_v22, %v1658_v23  ;;  %v1543_v20 = vld [vmem:[%s1927_s2] ss:$0 sm:$0xff] }
  0x2f   : > { %v918_v15 = vcombine.low %v910_v61, %v917_v8  ;;  %v1137_v17 = vrot.slane %v1136_v12, 2  ;;  %v1347_v22 = vstv %s1344_s16 }
  0x30   : > { %v793_v5 = vrot.slane %v779_v7, %v1767_v25  ;;  %v1266_v29 = vsel %vm1796_vm2, %v1540_v26, %v1265_v27 }
  0x31   : > { %1598 = vmatmul.mubr.msk.bf16.vlgmr.msra.gmra.mrb[8].mxu1 %vm353_vm12, %v918_v15  ;;  %v1142_v19 = vsel %vm1770_vm13, %v1137_v17, %v1141_v13  ;;  %v1270_v34 = vcombine.low %v899_v57, %v1266_v29 }
  0x32   : > { %1580 = vmatmul.mubr.msk.bf16.vlgmr.msra.gmra.mrb[4].mxu0 %vm353_vm12, %v551_v0  ;;  %1608 = vmatpush3.bf16.msra.mxu1 %v1166_v16  ;;  %v1146_v21 = vcombine.low %v775_v1, %v1142_v19  ;;  %v794_v11 = vcombine.low %v786_v54, %v793_v5 }
  0x33   : > { %1590 = vmatpush3.bf16.msra.mxu0 %v799_v10  ;;  %1591 = vmatprep.mubr.msk.bf16.mxu0 %vm1684_vm1, %v1683_v2  ;;  %v1284_v35 = vrot.slane %v1270_v34, %v1767_v25 }
  0x34   : > { %1601 = vmatprep.subr.bf16.mxu0 %v1683_v2  ;;  %1609 = vmatprep.mubr.msk.bf16.mxu1 %vm1684_vm1, %v1683_v2  ;;  %v1160_v24 = vrot.slane %v1146_v21, %v1767_v25 }
  0x35   : > { %v1285_v3 = vcombine.low %v1846_v49, %v1284_v35 }
  0x36   : > { %v1161_v30 = vcombine.low %v1836_v33, %v1160_v24  ;;  %v1290_v33 = vsel %vm357_vm0, %v1541_v31, 0 }
  0x39   : > { %1610 = vmatmul.mubr.msk.bf16.vlgmr.msra.gmra.mrb[12].mxu1 %vm353_vm12, %v1161_v30 }
  0x3a   : > { %1592 = vmatmul.mubr.msk.bf16.vlgmr.msra.gmra.mrb[8].mxu0 %vm353_vm12, %v794_v11 }
  0x3b   : > { %1602 = vmatpush3.bf16.msra.mxu0 %v1002_v28  ;;  %1603 = vmatprep.mubr.msk.bf16.mxu0 %vm1684_vm1, %v1683_v2 }
  0x3c   : > { %1613 = vmatprep.subr.bf16.mxu0 %v1683_v2 }
  0x42   : > { %1604 = vmatmul.mubr.msk.bf16.vlgmr.msra.gmra.mrb[12].mxu0 %vm353_vm12, %v997_v32 }
  0x43   : > { %1614 = vmatpush3.bf16.msra.mxu0 %v1290_v33  ;;  %1615 = vmatprep.mubr.msk.bf16.mxu0 %vm1684_vm1, %v1683_v2  ;;  %vm1362_vm1 = vcmask 58368  }
  0x4a   : > { %1616 = vmatmul.mubr.msk.bf16.vlgmr.msra.gmra.mrb[16].mxu0 %vm353_vm12, %v1285_v3 }
  0xf1   : > { %v463_v36 = vpop.f32.mrb[0].mxu1 }
  0xf2   : > { %v1575_v37 = vpop.f32.mrb[1].mxu1 }
  0xf3   : > { %v466_v38 = vpop.f32.mrb[2].mxu1 }
  0xf4   : > { %v1576_v39 = vpop.f32.mrb[3].mxu1 }
  0xf9   : > { %v671_v40 = vpop.f32.mrb[4].mxu1 }
  0xfa   : > { %v1587_v42 = vpop.f32.mrb[5].mxu1 }
  0xfb   : > { %v674_v45 = vpop.f32.mrb[6].mxu1 }
  0xfc   : > { %v1588_v25 = vpop.f32.mrb[7].mxu1 }
  0xfd   : > { %v395_v41 = vpop.f32.mrb[0].mxu0 }
  0xfe   : > { %v464_v43 = vadd.f32 %v463_v36, %v395_v41  ;;  %v1569_v44 = vpop.f32.mrb[1].mxu0 }
  0xff   : > { %v398_v46 = vpop.f32.mrb[2].mxu0 }
 0x100   : > { %v467_v47 = vadd.f32 %v466_v38, %v398_v46  ;;  %v1570_v48 = vpop.f32.mrb[3].mxu0 }
 0x104   : > { %v959_v52 = vpop.f32.mrb[8].mxu1 }
 0x105   : > { %v592_v50 = vpop.f32.mrb[4].mxu0  ;;  %v1599_v57 = vpop.f32.mrb[9].mxu1 }
 0x106   : > { %v599_v2 = vadd.f32 %v592_v50, %v464_v43  ;;  %v1581_v51 = vpop.f32.mrb[5].mxu0  ;;  %v962_v58 = vpop.f32.mrb[10].mxu1 }
 0x107   : > { %v595_v49 = vpop.f32.mrb[6].mxu0  ;;  %v1600_v60 = vpop.f32.mrb[11].mxu1 }
 0x108   : > { %v600_v53 = vadd.f32 %v595_v49, %v467_v47  ;;  %v678_v55 = vadd.f32 %v671_v40, %v599_v2  ;;  %v1582_v56 = vpop.f32.mrb[7].mxu0 }
 0x10a   : > { %v679_v59 = vadd.f32 %v674_v45, %v600_v53 }
 0x10c   : > { %v1202_v1 = vpop.f32.mrb[12].mxu1 }
 0x10d   : > { %v835_v61 = vpop.f32.mrb[8].mxu0  ;;  %v1611_v8 = vpop.f32.mrb[13].mxu1 }
 0x10e   : > { %v842_v62 = vadd.f32 %v835_v61, %v678_v55  ;;  %v1593_v63 = vpop.f32.mrb[9].mxu0  ;;  %v1205_v9 = vpop.f32.mrb[14].mxu1 }
 0x10f   : > { %v838_v0 = vpop.f32.mrb[10].mxu0  ;;  %v1612_v12 = vpop.f32.mrb[15].mxu1 }
 0x110   : > { %v843_v4 = vadd.f32 %v838_v0, %v679_v59  ;;  %v966_v6 = vadd.f32 %v959_v52, %v842_v62  ;;  %v1594_v7 = vpop.f32.mrb[11].mxu0 }
 0x112   : > { %v967_v10 = vadd.f32 %v962_v58, %v843_v4 }
 0x115   : > { %v1038_v13 = vpop.f32.mrb[12].mxu0 }
 0x116   : > { %v1045_v14 = vadd.f32 %v1038_v13, %v966_v6  ;;  %v1605_v15 = vpop.f32.mrb[13].mxu0 }
 0x117   : > { %v1041_v54 = vpop.f32.mrb[14].mxu0 }
 0x118   : > { %v1046_v5 = vadd.f32 %v1041_v54, %v967_v10  ;;  %v1209_v16 = vadd.f32 %v1202_v1, %v1045_v14  ;;  %v1606_v17 = vpop.f32.mrb[15].mxu0 }
 0x11a   : > { %v1210_v18 = vadd.f32 %v1205_v9, %v1046_v5 }
 0x11d   : > { %v1326_v19 = vpop.f32.mrb[16].mxu0 }
 0x11e   : > { %v1333_v21 = vadd.f32 %v1326_v19, %v1209_v16  ;;  %v1617_v11 = vpop.f32.mrb[17].mxu0 }
 0x11f   : > { %v1329_v23 = vpop.f32.mrb[18].mxu0 }
 0x120   : > { %v1342_v24 = vadd.f32 %v1543_v20, %v1333_v21  ;;  %v1334_v26 = vadd.f32 %v1329_v23, %v1210_v18  ;;  %v1618_v27 = vpop.f32.mrb[19].mxu0 }
 0x122   : > { %vm1345_vm0 = vcmp.ge.f32.partialorder %v1342_v24, 0.0  ;;  %v1348_v28 = vmul.f32 %v1347_v22, %v1342_v24  ;;  %v1343_v30 = vadd.f32 %v1543_v20, %v1334_v26 }
 0x124   : > { %v1350_v29 = vsel %vm1345_vm0, %v1342_v24, %v1348_v28  ;;  %vm1346_vm3 = vcmp.ge.f32.partialorder %v1343_v30, 0.0  ;;  %v1349_v31 = vmul.f32 %v1347_v22, %v1343_v30 }
 0x125   : > { %v1354_v32 = vcombine.high %v1350_v29, %v1350_v29  ;;  %v1358_v34 = vpack.c.bf16 %v1350_v29, %v1350_v29 }
 0x126   : > { %v1351_v33 = vsel %vm1346_vm3, %v1343_v30, %v1349_v31 }
 0x127   : > { %v1359_v35 = vpack.c.bf16 %v1354_v32, %v1354_v32  ;;  %1363 = vst.msk [vmem:[%s220_s25] sm:$0x3] %vm1362_vm1, %v1358_v34  ;;  %v1355_v3 = vcombine.high %v1351_v33, %v1351_v33  ;;  %v1360_v36 = vpack.c.bf16 %v1351_v33, %v1351_v33 }
 0x129   : > { %1364 = vst.msk [vmem:[%s220_s25 + $0x2] sm:$0x3] %vm1362_vm1, %v1359_v35  ;;  %v1361_v37 = vpack.c.bf16 %v1355_v3, %v1355_v3  ;;  %1365 = vst.msk [vmem:[%s220_s25 + $0x4] sm:$0x3] %vm1362_vm1, %v1360_v36 }
 0x12b   : > { %1366 = vst.msk [vmem:[%s220_s25 + $0x6] sm:$0x3] %vm1362_vm1, %v1361_v37 }
 0x12c PF: > { %s15_s19 = sadd.s32 1, %s1681_s19   ;;  %s1936_s17 = smov %s1677_s18 }
 0x12d   : > { %p12_p5 = scmp.ge.s32.totalorder %s15_s19, 4   ;;  %s1937_s18 = smov %s1939_s3 }
 0x12f   :  { %14 = sbr.rel (!%p12_p5) target bundleno = 2 (0x2), region = 77 }

</bundles_post_ra>
